<compile_context>
chip_gen: v5e
topology: v5e:2x2
jax: 0.10.0
libtpu: 0.0.40
codegen_flags: <defaults>
</compile_context>

<pallas_src>
import functools
import numpy as np

import jax
import jax.numpy as jnp
from jax import lax
from jax.experimental import pallas as pl
from jax.experimental.pallas import tpu as pltpu

# ------------------------- config -------------------------
HIDDEN = 32          # UNet / text hidden dim
LATENT_C = 4         # latent channels (SD convention)
SEQ = 8              # text sequence length
VOCAB = 64
IN_CH = 3            # image channels
IMG = 16             # input H = W
LH = IMG // 2        # latent H = W
SCALING_FACTOR = 0.18215
T_FINAL = 999        # self.timesteps = torch.tensor([999])

# DDPM single-step constants (scaled_linear betas, 1000 train steps, t=999,
# prev alpha_cumprod == 1  =>  prev_sample == (x - sqrt(1-abar)*eps)/sqrt(abar)).
_BETAS = np.linspace(0.00085 ** 0.5, 0.012 ** 0.5, 1000, dtype=np.float64) ** 2
_ACP = float(np.cumprod(1.0 - _BETAS)[T_FINAL])
SQRT_ACP = float(np.sqrt(_ACP))
SQRT_1M_ACP = float(np.sqrt(1.0 - _ACP))
# DDPM divide and vae.decode's /scaling_factor folded into one multiply.
DDPM_DECODE_SCALE = float(1.0 / (SQRT_ACP * SCALING_FACTOR))


# ------------------------- fused kernel -------------------------

def _im2col3x3(pad_ref, batch, cin):
    """Read 9 shifted (B,LH,LH,C) windows from a padded VMEM scratch and stack
    them along K -> (B*LH*LH, 9*C) bf16 (one matmul per conv)."""
    M = batch * LH * LH
    cols = []
    for di in range(3):
        for dj in range(3):
            cols.append(pad_ref[:, di:di + LH, dj:dj + LH, :].reshape(M, cin))
    return jnp.concatenate(cols, axis=-1).astype(jnp.bfloat16)


def _osediff_kernel(emb_ref, wk_ref, bk_ref, wv_ref, bv_ref,
                    xcols_ref, encw_ref, encb_ref, noise_ref,
                    cinw_ref, cinb_ref, wq_ref, bq_ref, wo_ref, bo_ref,
                    coutw_ref, coutb_ref, decw_ref, decb_ref,
                    out_ref, pad4_ref, padh_ref, *, batch):
    M = batch * LH * LH

    # ---- text branch: K / V of the prompt (text projection pre-folded into wk/wv) ----
    embb = emb_ref[...]
    k = (jnp.dot(embb, wk_ref[...], preferred_element_type=jnp.float32)
         + bk_ref[...]).astype(jnp.bfloat16)                               # (SEQ, H)
    v = (jnp.dot(embb, wv_ref[...], preferred_element_type=jnp.float32)
         + bv_ref[...]).astype(jnp.bfloat16)

    # ---- VAE encode: ONE (M,27)x(27,8) matmul (mean|logvar stacked on N),
    #      latent_dist.sample() * scaling_factor fused into the epilogue ----
    moments = (jnp.dot(xcols_ref[...], encw_ref[...],
                       preferred_element_type=jnp.float32) + encb_ref[...])  # (M, 8)
    mean = moments[:, :LATENT_C]
    logvar = moments[:, LATENT_C:]
    latent = (mean + jnp.exp(0.5 * logvar) * noise_ref[...]) * SCALING_FACTOR  # (M,4) f32

    # zero-init padded scratches once; borders stay zero for all later interior stores
    pad4_ref[...] = jnp.zeros_like(pad4_ref)
    padh_ref[...] = jnp.zeros_like(padh_ref)
    pad4_ref[:, 1:LH + 1, 1:LH + 1, :] = latent.reshape(batch, LH, LH, LATENT_C)

    # ---- UNet conv_in: in-VMEM im2col -> ONE (M,36)x(36,32) matmul;
    #      bias already contains the timestep-embedding projection (folded at init) ----
    cols = _im2col3x3(pad4_ref, batch, LATENT_C)
    h = jnp.dot(cols, cinw_ref[...], preferred_element_type=jnp.float32) + cinb_ref[...]

    # ---- single-head cross-attention (1/sqrt(D) pre-folded into wq) ----
    hb = h.astype(jnp.bfloat16)
    q = (jnp.dot(hb, wq_ref[...], preferred_element_type=jnp.float32)
         + bq_ref[...]).astype(jnp.bfloat16)                                # (M, H)
    s = lax.dot_general(q, k, (((1,), (1,)), ((), ())),
                        preferred_element_type=jnp.float32)                 # (M, SEQ)
    s = s - jnp.max(s, axis=-1, keepdims=True)
    p = jnp.exp(s)
    p = p * pl.reciprocal(jnp.sum(p, axis=-1, keepdims=True), approx=True)  # EUP
    a = jnp.dot(p.astype(jnp.bfloat16), v, preferred_element_type=jnp.float32)
    o = jnp.dot(a.astype(jnp.bfloat16), wo_ref[...],
                preferred_element_type=jnp.float32) + bo_ref[...]
    h = h + o                                                               # residual

    # ---- UNet conv_out (ONE (M,288)x(288,4) matmul) + DDPM step + /scaling_factor ----
    padh_ref[:, 1:LH + 1, 1:LH + 1, :] = h.reshape(batch, LH, LH, HIDDEN)
    colsh = _im2col3x3(padh_ref, batch, HIDDEN)                             # (M, 288)
    eps = (jnp.dot(colsh, coutw_ref[...], preferred_element_type=jnp.float32)
           + coutb_ref[...])                                                # model_pred
    sample = pad4_ref[:, 1:LH + 1, 1:LH + 1, :].reshape(M, LATENT_C)        # re-read latent
    z = (sample - SQRT_1M_ACP * eps) * DDPM_DECODE_SCALE                    # scheduler.step

    # ---- VAE decode: 2x nearest-upsample folded into ONE (12,36)x(36,M) matmul,
    #      output kept transposed -> lane-dense (12, M=128) store; fused clamp ----
    pad4_ref[:, 1:LH + 1, 1:LH + 1, :] = z.reshape(batch, LH, LH, LATENT_C)
    colsz = _im2col3x3(pad4_ref, batch, LATENT_C)                           # (M, 36)
    img_t = lax.dot_general(decw_ref[...], colsz, (((1,), (1,)), ((), ())),
                            preferred_element_type=jnp.float32)             # (12, M)
    out_ref[...] = jnp.clip(img_t + decb_ref[...], -1.0, 1.0)


def _osediff_pallas(params, emb, x_cols, noise, batch):
    kernel = functools.partial(_osediff_kernel, batch=batch)
    return pl.pallas_call(
        kernel,
        out_shape=jax.ShapeDtypeStruct((4 * IN_CH, batch * LH * LH), jnp.float32),
        scratch_shapes=[
            pltpu.VMEM((batch, LH + 2, LH + 2, LATENT_C), jnp.float32),  # latent / z halo
            pltpu.VMEM((batch, LH + 2, LH + 2, HIDDEN), jnp.float32),    # h halo
        ],
        compiler_params=pltpu.CompilerParams(vmem_limit_bytes=32 * 1024 * 1024),
    )(emb, params['wk'], params['bk'], params['wv'], params['bv'],
      x_cols, params['enc_w'], params['enc_b'], noise,
      params['conv_in_w'], params['conv_in_b'],
      params['wq'], params['bq'], params['wo'], params['bo'],
      params['conv_out_w'], params['conv_out_b'],
      params['dec_wT'], params['dec_bT'])


# ------------------------- forward -------------------------

def prompt_to_codes(prompt):
    # TODO(synk): CLIP tokenizer has no Pallas equivalent; deterministic char-code
    # tokenization stand-in.
    codes = np.frombuffer(prompt.encode('utf-8'), dtype=np.uint8)
    return jnp.asarray(np.resize(codes, SEQ).astype(np.int32) % VOCAB)


@jax.jit
def osediff_forward(params, codes, lq, key):
    B = lq.shape[0]

    # token embedding lookup (tiny gather, XLA)
    emb = params['token_emb'][codes]                                  # (SEQ, HIDDEN) bf16

    # VAE-encoder im2col at the input boundary (stride-2 taps -> one K=27 matmul in-kernel)
    x = jnp.transpose(lq, (0, 2, 3, 1)).astype(jnp.float32)           # NCHW -> NHWC
    xp = jnp.pad(x, ((0, 0), (1, 1), (1, 1), (0, 0)))                 # (B,18,18,3)
    cols = [xp[:, di:di + 2 * LH:2, dj:dj + 2 * LH:2, :]
            for di in range(3) for dj in range(3)]
    x_cols = (jnp.concatenate(cols, axis=-1)
                .reshape(B * LH * LH, 9 * IN_CH).astype(jnp.bfloat16))  # (128, 27)

    noise = jax.random.normal(key, (B * LH * LH, LATENT_C), dtype=jnp.float32)

    # fully fused encode -> UNet -> DDPM -> decode kernel; output (4*IN_CH, B*LH*LH)
    img_t = _osediff_pallas(params, emb, x_cols, noise, B)

    # lane-dense kernel output -> NCHW image (layout plumbing in the wrapper)
    img = (img_t.reshape(2, 2, IN_CH, B, LH, LH)       # (rh, rw, ch, b, i, j)
                .transpose(3, 2, 4, 0, 5, 1)           # (b, ch, i, rh, j, rw)
                .reshape(B, IN_CH, IMG, IMG))
    return img


# ------------------------- deterministic parameter init -------------------------

def init_params(key):
    ks = jax.random.split(key, 12)
    std = 0.05
    n = lambda k, s: jax.random.normal(k, s, dtype=jnp.float32) * std
    bf = lambda a: jnp.asarray(a, jnp.float32).astype(jnp.bfloat16)
    zb = lambda c: jnp.zeros((1, c), jnp.float32)                     # hoisted (1,N) bias

    token_emb = n(ks[0], (VOCAB, HIDDEN))
    text_proj_w = n(ks[1], (HIDDEN, HIDDEN)); text_proj_b = jnp.zeros((1, HIDDEN))
    time_w = n(ks[2], (HIDDEN, HIDDEN));      time_b = jnp.zeros((1, HIDDEN))
    wq = n(ks[3], (HIDDEN, HIDDEN))
    wk = n(ks[4], (HIDDEN, HIDDEN)); bk = jnp.zeros((1, HIDDEN))
    wv = n(ks[5], (HIDDEN, HIDDEN)); bv = jnp.zeros((1, HIDDEN))
    wo = n(ks[6], (HIDDEN, HIDDEN))
    enc_w = n(ks[7], (3, 3, IN_CH, 2 * LATENT_C))                     # moments conv, stride 2
    conv_in_w = n(ks[8], (3, 3, LATENT_C, HIDDEN))
    conv_out_w = n(ks[9], (3, 3, HIDDEN, LATENT_C))
    dec_w = n(ks[10], (3, 3, LATENT_C, IN_CH))
    conv_in_b = jnp.zeros((1, HIDDEN))

    # Fold text projection into the K/V weights (wk' = Wt @ Wk, bk' = bt @ Wk + bk).
    wk_eff = text_proj_w @ wk; bk_eff = text_proj_b @ wk + bk
    wv_eff = text_proj_w @ wv; bv_eff = text_proj_b @ wv + bv

    # Fold the (constant t=999) timestep-embedding projection into the conv_in bias.
    half = HIDDEN // 2
    freqs = np.exp(-np.log(10000.0) * np.arange(half, dtype=np.float64) / half)
    targ = float(T_FINAL) * freqs
    temb = jnp.asarray(np.concatenate([np.sin(targ), np.cos(targ)])[None, :], jnp.float32)
    cb_eff = conv_in_b + (temb @ time_w + time_b)                     # (1, HIDDEN)

    # Decoder: fold 2x nearest upsample into the conv -> single (36, 12) im2col weight
    # (all 4 output parities stacked along N), stored transposed as (12, 36).
    W = np.asarray(dec_w)                                             # (u, v, cin, cout)
    dec_full = np.zeros((9 * LATENT_C, 4 * IN_CH), np.float32)
    for rh in range(2):
        vsets = [(0, W[0]), (1, W[1] + W[2])] if rh == 0 else [(0, W[0] + W[1]), (1, W[2])]
        for rw in range(2):
            for a, Wa in vsets:                                       # Wa: (3, cin, cout)
                hsets = ([(0, Wa[0]), (1, Wa[1] + Wa[2])] if rw == 0
                         else [(0, Wa[0] + Wa[1]), (1, Wa[2])])
                for c, Wac in hsets:                                  # Wac: (cin, cout)
                    t = (rh + a) * 3 + (rw + c)
                    p = rh * 2 + rw
                    dec_full[t * LATENT_C:(t + 1) * LATENT_C,
                             p * IN_CH:(p + 1) * IN_CH] += Wac
    dec_wT = jnp.asarray(dec_full.T)                                  # (12, 36)
    dec_bT = jnp.zeros((4 * IN_CH, 1), jnp.float32)

    inv_sqrt_d = 1.0 / float(np.sqrt(HIDDEN))
    return {
        'token_emb': bf(token_emb),
        # attention (1/sqrt(D) pre-folded into wq; text proj pre-folded into wk/wv)
        'wq': bf(wq * inv_sqrt_d), 'bq': zb(HIDDEN),
        'wk': bf(wk_eff), 'bk': bk_eff,
        'wv': bf(wv_eff), 'bv': bv_eff,
        'wo': bf(wo), 'bo': zb(HIDDEN),
        # encoder conv: mean|logvar stacked along N, im2col (tap-major, then cin) layout
        'enc_w': bf(jnp.asarray(enc_w).reshape(9 * IN_CH, 2 * LATENT_C)),
        'enc_b': zb(2 * LATENT_C),
        'conv_in_w': bf(jnp.asarray(conv_in_w).reshape(9 * LATENT_C, HIDDEN)),
        'conv_in_b': cb_eff,                                          # + timestep proj
        'conv_out_w': bf(jnp.asarray(conv_out_w).reshape(9 * HIDDEN, LATENT_C)),
        'conv_out_b': zb(LATENT_C),
        'dec_wT': bf(dec_wT), 'dec_bT': dec_bT,
    }


if __name__ == "__main__":
    root = jax.random.PRNGKey(0)
    k_params, k_input, k_noise = jax.random.split(root, 3)

    params = init_params(k_params)
    lq = jax.random.uniform(k_input, (2, IN_CH, IMG, IMG),
                            minval=-1.0, maxval=1.0, dtype=jnp.float32)  # NCHW
    codes = prompt_to_codes("a photo of a cat")

    out = osediff_forward(params, codes, lq, k_noise)
    out = jax.block_until_ready(out)

    assert out.shape == (2, IN_CH, IMG, IMG), out.shape
    assert out.dtype == jnp.float32
    assert bool(jnp.all(out >= -1.0)) and bool(jnp.all(out <= 1.0))
    print("KERNEL_OK")
</pallas_src>

<mosaic_0001>
module attributes {stable_mosaic.version = 11 : i64} {
  func.func @_osediff_kernel(%arg0: memref<8x32xbf16, #tpu.memory_space<vmem>>, %arg1: memref<32x32xbf16, #tpu.memory_space<vmem>>, %arg2: memref<1x32xf32, #tpu.memory_space<vmem>>, %arg3: memref<32x32xbf16, #tpu.memory_space<vmem>>, %arg4: memref<1x32xf32, #tpu.memory_space<vmem>>, %arg5: memref<128x27xbf16, #tpu.memory_space<vmem>>, %arg6: memref<27x8xbf16, #tpu.memory_space<vmem>>, %arg7: memref<1x8xf32, #tpu.memory_space<vmem>>, %arg8: memref<128x4xf32, #tpu.memory_space<vmem>>, %arg9: memref<36x32xbf16, #tpu.memory_space<vmem>>, %arg10: memref<1x32xf32, #tpu.memory_space<vmem>>, %arg11: memref<32x32xbf16, #tpu.memory_space<vmem>>, %arg12: memref<1x32xf32, #tpu.memory_space<vmem>>, %arg13: memref<32x32xbf16, #tpu.memory_space<vmem>>, %arg14: memref<1x32xf32, #tpu.memory_space<vmem>>, %arg15: memref<288x4xbf16, #tpu.memory_space<vmem>>, %arg16: memref<1x4xf32, #tpu.memory_space<vmem>>, %arg17: memref<12x36xbf16, #tpu.memory_space<vmem>>, %arg18: memref<12x1xf32, #tpu.memory_space<vmem>>, %arg19: memref<12x128xf32, #tpu.memory_space<vmem>>, %arg20: memref<2x10x10x4xf32, #tpu.memory_space<vmem>>, %arg21: memref<2x10x10x32xf32, #tpu.memory_space<vmem>>) attributes {dimension_semantics = [], scalar_prefetch = 0 : i64, scratch_operands = 2 : i64, tpu.core_type = #tpu.core_type<tc>} {
    %c0 = arith.constant 0 : index
    %c0_0 = arith.constant 0 : index
    %0 = vector.load %arg0[%c0, %c0_0] : memref<8x32xbf16, #tpu.memory_space<vmem>>, vector<8x32xbf16>
    %c0_1 = arith.constant 0 : index
    %c0_2 = arith.constant 0 : index
    %1 = vector.load %arg1[%c0_1, %c0_2] : memref<32x32xbf16, #tpu.memory_space<vmem>>, vector<32x32xbf16>
    %cst = arith.constant dense<0.000000e+00> : vector<8x32xf32>
    %2 = tpu.matmul %0, %1, %cst {dimension_numbers = #tpu.dot_dimension_numbers<[1], [0], [0], [1], [0, 0, 1, 1], [], []>} : vector<8x32xbf16>, vector<32x32xbf16>, vector<8x32xf32> -> vector<8x32xf32>
    %c0_3 = arith.constant 0 : index
    %c0_4 = arith.constant 0 : index
    %3 = vector.load %arg2[%c0_3, %c0_4] : memref<1x32xf32, #tpu.memory_space<vmem>>, vector<1x32xf32>
    %4 = vector.broadcast %3 : vector<1x32xf32> to vector<8x32xf32>
    %5 = arith.addf %2, %4 : vector<8x32xf32>
    %6 = arith.truncf %5 : vector<8x32xf32> to vector<8x32xbf16>
    %c0_5 = arith.constant 0 : index
    %c0_6 = arith.constant 0 : index
    %7 = vector.load %arg3[%c0_5, %c0_6] : memref<32x32xbf16, #tpu.memory_space<vmem>>, vector<32x32xbf16>
    %cst_7 = arith.constant dense<0.000000e+00> : vector<8x32xf32>
    %8 = tpu.matmul %0, %7, %cst_7 {dimension_numbers = #tpu.dot_dimension_numbers<[1], [0], [0], [1], [0, 0, 1, 1], [], []>} : vector<8x32xbf16>, vector<32x32xbf16>, vector<8x32xf32> -> vector<8x32xf32>
    %c0_8 = arith.constant 0 : index
    %c0_9 = arith.constant 0 : index
    %9 = vector.load %arg4[%c0_8, %c0_9] : memref<1x32xf32, #tpu.memory_space<vmem>>, vector<1x32xf32>
    %10 = vector.broadcast %9 : vector<1x32xf32> to vector<8x32xf32>
    %11 = arith.addf %8, %10 : vector<8x32xf32>
    %12 = arith.truncf %11 : vector<8x32xf32> to vector<8x32xbf16>
    %c0_10 = arith.constant 0 : index
    %c0_11 = arith.constant 0 : index
    %13 = vector.load %arg5[%c0_10, %c0_11] : memref<128x27xbf16, #tpu.memory_space<vmem>>, vector<128x27xbf16>
    %c0_12 = arith.constant 0 : index
    %c0_13 = arith.constant 0 : index
    %14 = vector.load %arg6[%c0_12, %c0_13] : memref<27x8xbf16, #tpu.memory_space<vmem>>, vector<27x8xbf16>
    %cst_14 = arith.constant dense<0.000000e+00> : vector<128x8xf32>
    %15 = tpu.matmul %13, %14, %cst_14 {dimension_numbers = #tpu.dot_dimension_numbers<[1], [0], [0], [1], [0, 0, 1, 1], [], []>} : vector<128x27xbf16>, vector<27x8xbf16>, vector<128x8xf32> -> vector<128x8xf32>
    %c0_15 = arith.constant 0 : index
    %c0_16 = arith.constant 0 : index
    %16 = vector.load %arg7[%c0_15, %c0_16] : memref<1x8xf32, #tpu.memory_space<vmem>>, vector<1x8xf32>
    %17 = vector.broadcast %16 : vector<1x8xf32> to vector<128x8xf32>
    %18 = arith.addf %15, %17 : vector<128x8xf32>
    %19 = vector.extract_strided_slice %18 {offsets = [0, 0], sizes = [128, 4], strides = [1, 1]} : vector<128x8xf32> to vector<128x4xf32>
    %20 = vector.extract_strided_slice %18 {offsets = [0, 4], sizes = [128, 4], strides = [1, 1]} : vector<128x8xf32> to vector<128x4xf32>
    %cst_17 = arith.constant 5.000000e-01 : f32
    %21 = vector.broadcast %cst_17 : f32 to vector<128x4xf32>
    %22 = arith.mulf %21, %20 : vector<128x4xf32>
    %23 = math.exp %22 : vector<128x4xf32>
    %c0_18 = arith.constant 0 : index
    %c0_19 = arith.constant 0 : index
    %24 = vector.load %arg8[%c0_18, %c0_19] : memref<128x4xf32, #tpu.memory_space<vmem>>, vector<128x4xf32>
    %25 = arith.mulf %23, %24 : vector<128x4xf32>
    %26 = arith.addf %19, %25 : vector<128x4xf32>
    %cst_20 = arith.constant 1.821500e-01 : f32
    %27 = vector.broadcast %cst_20 : f32 to vector<128x4xf32>
    %28 = arith.mulf %26, %27 : vector<128x4xf32>
    %cst_21 = arith.constant 0.000000e+00 : f32
    %29 = vector.broadcast %cst_21 : f32 to vector<2x10x10x4xf32>
    %c0_22 = arith.constant 0 : index
    %c0_23 = arith.constant 0 : index
    %c0_24 = arith.constant 0 : index
    %c0_25 = arith.constant 0 : index
    %30 = vector.load %arg20[%c0_22, %c0_23, %c0_24, %c0_25] : memref<2x10x10x4xf32, #tpu.memory_space<vmem>>, vector<2x10x10x4xf32>
    tpu.vector_store %arg20[%c0_22, %c0_23, %c0_24, %c0_25], %29 {strides = array<i32>} : memref<2x10x10x4xf32, #tpu.memory_space<vmem>>, vector<2x10x10x4xf32>,
    %cst_26 = arith.constant 0.000000e+00 : f32
    %31 = vector.broadcast %cst_26 : f32 to vector<2x10x10x32xf32>
    %c0_27 = arith.constant 0 : index
    %c0_28 = arith.constant 0 : index
    %c0_29 = arith.constant 0 : index
    %c0_30 = arith.constant 0 : index
    %32 = vector.load %arg21[%c0_27, %c0_28, %c0_29, %c0_30] : memref<2x10x10x32xf32, #tpu.memory_space<vmem>>, vector<2x10x10x32xf32>
    tpu.vector_store %arg21[%c0_27, %c0_28, %c0_29, %c0_30], %31 {strides = array<i32>} : memref<2x10x10x32xf32, #tpu.memory_space<vmem>>, vector<2x10x10x32xf32>,
    %33 = vector.shape_cast %28 : vector<128x4xf32> to vector<2x8x8x4xf32>
    %c0_31 = arith.constant 0 : index
    %c1 = arith.constant 1 : index
    %c1_32 = arith.constant 1 : index
    %c0_33 = arith.constant 0 : index
    %34 = vector.load %arg20[%c0_31, %c1, %c1_32, %c0_33] : memref<2x10x10x4xf32, #tpu.memory_space<vmem>>, vector<2x8x8x4xf32>
    tpu.vector_store %arg20[%c0_31, %c1, %c1_32, %c0_33], %33 {strides = array<i32>} : memref<2x10x10x4xf32, #tpu.memory_space<vmem>>, vector<2x8x8x4xf32>,
    %c0_34 = arith.constant 0 : index
    %c0_35 = arith.constant 0 : index
    %c0_36 = arith.constant 0 : index
    %c0_37 = arith.constant 0 : index
    %35 = vector.load %arg20[%c0_34, %c0_35, %c0_36, %c0_37] : memref<2x10x10x4xf32, #tpu.memory_space<vmem>>, vector<2x8x8x4xf32>
    %36 = vector.shape_cast %35 : vector<2x8x8x4xf32> to vector<128x4xf32>
    %c0_38 = arith.constant 0 : index
    %c0_39 = arith.constant 0 : index
    %c1_40 = arith.constant 1 : index
    %c0_41 = arith.constant 0 : index
    %37 = vector.load %arg20[%c0_38, %c0_39, %c1_40, %c0_41] : memref<2x10x10x4xf32, #tpu.memory_space<vmem>>, vector<2x8x8x4xf32>
    %38 = vector.shape_cast %37 : vector<2x8x8x4xf32> to vector<128x4xf32>
    %c0_42 = arith.constant 0 : index
    %c0_43 = arith.constant 0 : index
    %c2 = arith.constant 2 : index
    %c0_44 = arith.constant 0 : index
    %39 = vector.load %arg20[%c0_42, %c0_43, %c2, %c0_44] : memref<2x10x10x4xf32, #tpu.memory_space<vmem>>, vector<2x8x8x4xf32>
    %40 = vector.shape_cast %39 : vector<2x8x8x4xf32> to vector<128x4xf32>
    %c0_45 = arith.constant 0 : index
    %c1_46 = arith.constant 1 : index
    %c0_47 = arith.constant 0 : index
    %c0_48 = arith.constant 0 : index
    %41 = vector.load %arg20[%c0_45, %c1_46, %c0_47, %c0_48] : memref<2x10x10x4xf32, #tpu.memory_space<vmem>>, vector<2x8x8x4xf32>
    %42 = vector.shape_cast %41 : vector<2x8x8x4xf32> to vector<128x4xf32>
    %c0_49 = arith.constant 0 : index
    %c1_50 = arith.constant 1 : index
    %c1_51 = arith.constant 1 : index
    %c0_52 = arith.constant 0 : index
    %43 = vector.load %arg20[%c0_49, %c1_50, %c1_51, %c0_52] : memref<2x10x10x4xf32, #tpu.memory_space<vmem>>, vector<2x8x8x4xf32>
    %44 = vector.shape_cast %43 : vector<2x8x8x4xf32> to vector<128x4xf32>
    %c0_53 = arith.constant 0 : index
    %c1_54 = arith.constant 1 : index
    %c2_55 = arith.constant 2 : index
    %c0_56 = arith.constant 0 : index
    %45 = vector.load %arg20[%c0_53, %c1_54, %c2_55, %c0_56] : memref<2x10x10x4xf32, #tpu.memory_space<vmem>>, vector<2x8x8x4xf32>
    %46 = vector.shape_cast %45 : vector<2x8x8x4xf32> to vector<128x4xf32>
    %c0_57 = arith.constant 0 : index
    %c2_58 = arith.constant 2 : index
    %c0_59 = arith.constant 0 : index
    %c0_60 = arith.constant 0 : index
    %47 = vector.load %arg20[%c0_57, %c2_58, %c0_59, %c0_60] : memref<2x10x10x4xf32, #tpu.memory_space<vmem>>, vector<2x8x8x4xf32>
    %48 = vector.shape_cast %47 : vector<2x8x8x4xf32> to vector<128x4xf32>
    %c0_61 = arith.constant 0 : index
    %c2_62 = arith.constant 2 : index
    %c1_63 = arith.constant 1 : index
    %c0_64 = arith.constant 0 : index
    %49 = vector.load %arg20[%c0_61, %c2_62, %c1_63, %c0_64] : memref<2x10x10x4xf32, #tpu.memory_space<vmem>>, vector<2x8x8x4xf32>
    %50 = vector.shape_cast %49 : vector<2x8x8x4xf32> to vector<128x4xf32>
    %c0_65 = arith.constant 0 : index
    %c2_66 = arith.constant 2 : index
    %c2_67 = arith.constant 2 : index
    %c0_68 = arith.constant 0 : index
    %51 = vector.load %arg20[%c0_65, %c2_66, %c2_67, %c0_68] : memref<2x10x10x4xf32, #tpu.memory_space<vmem>>, vector<2x8x8x4xf32>
    %52 = vector.shape_cast %51 : vector<2x8x8x4xf32> to vector<128x4xf32>
    %53 = tpu.concatenate %36, %38, %40, %42, %44, %46, %48, %50, %52 in 1 : vector<128x4xf32>, vector<128x4xf32>, vector<128x4xf32>, vector<128x4xf32>, vector<128x4xf32>, vector<128x4xf32>, vector<128x4xf32>, vector<128x4xf32>, vector<128x4xf32> -> vector<128x36xf32>
    %54 = arith.truncf %53 : vector<128x36xf32> to vector<128x36xbf16>
    %c0_69 = arith.constant 0 : index
    %c0_70 = arith.constant 0 : index
    %55 = vector.load %arg9[%c0_69, %c0_70] : memref<36x32xbf16, #tpu.memory_space<vmem>>, vector<36x32xbf16>
    %cst_71 = arith.constant dense<0.000000e+00> : vector<128x32xf32>
    %56 = tpu.matmul %54, %55, %cst_71 {dimension_numbers = #tpu.dot_dimension_numbers<[1], [0], [0], [1], [0, 0, 1, 1], [], []>} : vector<128x36xbf16>, vector<36x32xbf16>, vector<128x32xf32> -> vector<128x32xf32>
    %c0_72 = arith.constant 0 : index
    %c0_73 = arith.constant 0 : index
    %57 = vector.load %arg10[%c0_72, %c0_73] : memref<1x32xf32, #tpu.memory_space<vmem>>, vector<1x32xf32>
    %58 = vector.broadcast %57 : vector<1x32xf32> to vector<128x32xf32>
    %59 = arith.addf %56, %58 : vector<128x32xf32>
    %60 = arith.truncf %59 : vector<128x32xf32> to vector<128x32xbf16>
    %c0_74 = arith.constant 0 : index
    %c0_75 = arith.constant 0 : index
    %61 = vector.load %arg11[%c0_74, %c0_75] : memref<32x32xbf16, #tpu.memory_space<vmem>>, vector<32x32xbf16>
    %cst_76 = arith.constant dense<0.000000e+00> : vector<128x32xf32>
    %62 = tpu.matmul %60, %61, %cst_76 {dimension_numbers = #tpu.dot_dimension_numbers<[1], [0], [0], [1], [0, 0, 1, 1], [], []>} : vector<128x32xbf16>, vector<32x32xbf16>, vector<128x32xf32> -> vector<128x32xf32>
    %c0_77 = arith.constant 0 : index
    %c0_78 = arith.constant 0 : index
    %63 = vector.load %arg12[%c0_77, %c0_78] : memref<1x32xf32, #tpu.memory_space<vmem>>, vector<1x32xf32>
    %64 = vector.broadcast %63 : vector<1x32xf32> to vector<128x32xf32>
    %65 = arith.addf %62, %64 : vector<128x32xf32>
    %66 = arith.truncf %65 : vector<128x32xf32> to vector<128x32xbf16>
    %cst_79 = arith.constant dense<0.000000e+00> : vector<128x8xf32>
    %67 = tpu.matmul %66, %6, %cst_79 {dimension_numbers = #tpu.dot_dimension_numbers<[1], [1], [0], [0], [0, 0, 1, 0], [], []>} : vector<128x32xbf16>, vector<8x32xbf16>, vector<128x8xf32> -> vector<128x8xf32>
    %cst_80 = arith.constant dense<0xFF800000> : vector<128xf32>
    %68 = vector.multi_reduction <maximumf>, %67, %cst_80 [1] : vector<128x8xf32> to vector<128xf32>
    %69 = vector.shape_cast %68 : vector<128xf32> to vector<128x1xf32>
    %70 = vector.broadcast %69 : vector<128x1xf32> to vector<128x8xf32>
    %71 = arith.subf %67, %70 : vector<128x8xf32>
    %72 = math.exp %71 : vector<128x8xf32>
    %cst_81 = arith.constant dense<0.000000e+00> : vector<128xf32>
    %73 = vector.multi_reduction <add>, %72, %cst_81 [1] : vector<128x8xf32> to vector<128xf32>
    %74 = vector.shape_cast %73 : vector<128xf32> to vector<128x1xf32>
    %75 = tpu.reciprocal %74 {approx = true} : vector<128x1xf32> -> vector<128x1xf32>
    %76 = vector.broadcast %75 : vector<128x1xf32> to vector<128x8xf32>
    %77 = arith.mulf %72, %76 : vector<128x8xf32>
    %78 = arith.truncf %77 : vector<128x8xf32> to vector<128x8xbf16>
    %cst_82 = arith.constant dense<0.000000e+00> : vector<128x32xf32>
    %79 = tpu.matmul %78, %12, %cst_82 {dimension_numbers = #tpu.dot_dimension_numbers<[1], [0], [0], [1], [0, 0, 1, 1], [], []>} : vector<128x8xbf16>, vector<8x32xbf16>, vector<128x32xf32> -> vector<128x32xf32>
    %80 = arith.truncf %79 : vector<128x32xf32> to vector<128x32xbf16>
    %c0_83 = arith.constant 0 : index
    %c0_84 = arith.constant 0 : index
    %81 = vector.load %arg13[%c0_83, %c0_84] : memref<32x32xbf16, #tpu.memory_space<vmem>>, vector<32x32xbf16>
    %cst_85 = arith.constant dense<0.000000e+00> : vector<128x32xf32>
    %82 = tpu.matmul %80, %81, %cst_85 {dimension_numbers = #tpu.dot_dimension_numbers<[1], [0], [0], [1], [0, 0, 1, 1], [], []>} : vector<128x32xbf16>, vector<32x32xbf16>, vector<128x32xf32> -> vector<128x32xf32>
    %c0_86 = arith.constant 0 : index
    %c0_87 = arith.constant 0 : index
    %83 = vector.load %arg14[%c0_86, %c0_87] : memref<1x32xf32, #tpu.memory_space<vmem>>, vector<1x32xf32>
    %84 = vector.broadcast %83 : vector<1x32xf32> to vector<128x32xf32>
    %85 = arith.addf %82, %84 : vector<128x32xf32>
    %86 = arith.addf %59, %85 : vector<128x32xf32>
    %87 = vector.shape_cast %86 : vector<128x32xf32> to vector<2x8x8x32xf32>
    %c0_88 = arith.constant 0 : index
    %c1_89 = arith.constant 1 : index
    %c1_90 = arith.constant 1 : index
    %c0_91 = arith.constant 0 : index
    %88 = vector.load %arg21[%c0_88, %c1_89, %c1_90, %c0_91] : memref<2x10x10x32xf32, #tpu.memory_space<vmem>>, vector<2x8x8x32xf32>
    tpu.vector_store %arg21[%c0_88, %c1_89, %c1_90, %c0_91], %87 {strides = array<i32>} : memref<2x10x10x32xf32, #tpu.memory_space<vmem>>, vector<2x8x8x32xf32>,
    %c0_92 = arith.constant 0 : index
    %c0_93 = arith.constant 0 : index
    %c0_94 = arith.constant 0 : index
    %c0_95 = arith.constant 0 : index
    %89 = vector.load %arg21[%c0_92, %c0_93, %c0_94, %c0_95] : memref<2x10x10x32xf32, #tpu.memory_space<vmem>>, vector<2x8x8x32xf32>
    %90 = vector.shape_cast %89 : vector<2x8x8x32xf32> to vector<128x32xf32>
    %c0_96 = arith.constant 0 : index
    %c0_97 = arith.constant 0 : index
    %c1_98 = arith.constant 1 : index
    %c0_99 = arith.constant 0 : index
    %91 = vector.load %arg21[%c0_96, %c0_97, %c1_98, %c0_99] : memref<2x10x10x32xf32, #tpu.memory_space<vmem>>, vector<2x8x8x32xf32>
    %92 = vector.shape_cast %91 : vector<2x8x8x32xf32> to vector<128x32xf32>
    %c0_100 = arith.constant 0 : index
    %c0_101 = arith.constant 0 : index
    %c2_102 = arith.constant 2 : index
    %c0_103 = arith.constant 0 : index
    %93 = vector.load %arg21[%c0_100, %c0_101, %c2_102, %c0_103] : memref<2x10x10x32xf32, #tpu.memory_space<vmem>>, vector<2x8x8x32xf32>
    %94 = vector.shape_cast %93 : vector<2x8x8x32xf32> to vector<128x32xf32>
    %c0_104 = arith.constant 0 : index
    %c1_105 = arith.constant 1 : index
    %c0_106 = arith.constant 0 : index
    %c0_107 = arith.constant 0 : index
    %95 = vector.load %arg21[%c0_104, %c1_105, %c0_106, %c0_107] : memref<2x10x10x32xf32, #tpu.memory_space<vmem>>, vector<2x8x8x32xf32>
    %96 = vector.shape_cast %95 : vector<2x8x8x32xf32> to vector<128x32xf32>
    %c0_108 = arith.constant 0 : index
    %c1_109 = arith.constant 1 : index
    %c1_110 = arith.constant 1 : index
    %c0_111 = arith.constant 0 : index
    %97 = vector.load %arg21[%c0_108, %c1_109, %c1_110, %c0_111] : memref<2x10x10x32xf32, #tpu.memory_space<vmem>>, vector<2x8x8x32xf32>
    %98 = vector.shape_cast %97 : vector<2x8x8x32xf32> to vector<128x32xf32>
    %c0_112 = arith.constant 0 : index
    %c1_113 = arith.constant 1 : index
    %c2_114 = arith.constant 2 : index
    %c0_115 = arith.constant 0 : index
    %99 = vector.load %arg21[%c0_112, %c1_113, %c2_114, %c0_115] : memref<2x10x10x32xf32, #tpu.memory_space<vmem>>, vector<2x8x8x32xf32>
    %100 = vector.shape_cast %99 : vector<2x8x8x32xf32> to vector<128x32xf32>
    %c0_116 = arith.constant 0 : index
    %c2_117 = arith.constant 2 : index
    %c0_118 = arith.constant 0 : index
    %c0_119 = arith.constant 0 : index
    %101 = vector.load %arg21[%c0_116, %c2_117, %c0_118, %c0_119] : memref<2x10x10x32xf32, #tpu.memory_space<vmem>>, vector<2x8x8x32xf32>
    %102 = vector.shape_cast %101 : vector<2x8x8x32xf32> to vector<128x32xf32>
    %c0_120 = arith.constant 0 : index
    %c2_121 = arith.constant 2 : index
    %c1_122 = arith.constant 1 : index
    %c0_123 = arith.constant 0 : index
    %103 = vector.load %arg21[%c0_120, %c2_121, %c1_122, %c0_123] : memref<2x10x10x32xf32, #tpu.memory_space<vmem>>, vector<2x8x8x32xf32>
    %104 = vector.shape_cast %103 : vector<2x8x8x32xf32> to vector<128x32xf32>
    %c0_124 = arith.constant 0 : index
    %c2_125 = arith.constant 2 : index
    %c2_126 = arith.constant 2 : index
    %c0_127 = arith.constant 0 : index
    %105 = vector.load %arg21[%c0_124, %c2_125, %c2_126, %c0_127] : memref<2x10x10x32xf32, #tpu.memory_space<vmem>>, vector<2x8x8x32xf32>
    %106 = vector.shape_cast %105 : vector<2x8x8x32xf32> to vector<128x32xf32>
    %107 = tpu.concatenate %90, %92, %94, %96, %98, %100, %102, %104, %106 in 1 : vector<128x32xf32>, vector<128x32xf32>, vector<128x32xf32>, vector<128x32xf32>, vector<128x32xf32>, vector<128x32xf32>, vector<128x32xf32>, vector<128x32xf32>, vector<128x32xf32> -> vector<128x288xf32>
    %108 = arith.truncf %107 : vector<128x288xf32> to vector<128x288xbf16>
    %c0_128 = arith.constant 0 : index
    %c0_129 = arith.constant 0 : index
    %109 = vector.load %arg15[%c0_128, %c0_129] : memref<288x4xbf16, #tpu.memory_space<vmem>>, vector<288x4xbf16>
    %cst_130 = arith.constant dense<0.000000e+00> : vector<128x4xf32>
    %110 = tpu.matmul %108, %109, %cst_130 {dimension_numbers = #tpu.dot_dimension_numbers<[1], [0], [0], [1], [0, 0, 1, 1], [], []>} : vector<128x288xbf16>, vector<288x4xbf16>, vector<128x4xf32> -> vector<128x4xf32>
    %c0_131 = arith.constant 0 : index
    %c0_132 = arith.constant 0 : index
    %111 = vector.load %arg16[%c0_131, %c0_132] : memref<1x4xf32, #tpu.memory_space<vmem>>, vector<1x4xf32>
    %112 = vector.broadcast %111 : vector<1x4xf32> to vector<128x4xf32>
    %113 = arith.addf %110, %112 : vector<128x4xf32>
    %c0_133 = arith.constant 0 : index
    %c1_134 = arith.constant 1 : index
    %c1_135 = arith.constant 1 : index
    %c0_136 = arith.constant 0 : index
    %114 = vector.load %arg20[%c0_133, %c1_134, %c1_135, %c0_136] : memref<2x10x10x4xf32, #tpu.memory_space<vmem>>, vector<2x8x8x4xf32>
    %115 = vector.shape_cast %114 : vector<2x8x8x4xf32> to vector<128x4xf32>
    %cst_137 = arith.constant 0.997667253 : f32
    %116 = vector.broadcast %cst_137 : f32 to vector<128x4xf32>
    %117 = arith.mulf %116, %113 : vector<128x4xf32>
    %118 = arith.subf %115, %117 : vector<128x4xf32>
    %cst_138 = arith.constant 80.4217071 : f32
    %119 = vector.broadcast %cst_138 : f32 to vector<128x4xf32>
    %120 = arith.mulf %118, %119 : vector<128x4xf32>
    %121 = vector.shape_cast %120 : vector<128x4xf32> to vector<2x8x8x4xf32>
    %c0_139 = arith.constant 0 : index
    %c1_140 = arith.constant 1 : index
    %c1_141 = arith.constant 1 : index
    %c0_142 = arith.constant 0 : index
    %122 = vector.load %arg20[%c0_139, %c1_140, %c1_141, %c0_142] : memref<2x10x10x4xf32, #tpu.memory_space<vmem>>, vector<2x8x8x4xf32>
    tpu.vector_store %arg20[%c0_139, %c1_140, %c1_141, %c0_142], %121 {strides = array<i32>} : memref<2x10x10x4xf32, #tpu.memory_space<vmem>>, vector<2x8x8x4xf32>,
    %c0_143 = arith.constant 0 : index
    %c0_144 = arith.constant 0 : index
    %c0_145 = arith.constant 0 : index
    %c0_146 = arith.constant 0 : index
    %123 = vector.load %arg20[%c0_143, %c0_144, %c0_145, %c0_146] : memref<2x10x10x4xf32, #tpu.memory_space<vmem>>, vector<2x8x8x4xf32>
    %124 = vector.shape_cast %123 : vector<2x8x8x4xf32> to vector<128x4xf32>
    %c0_147 = arith.constant 0 : index
    %c0_148 = arith.constant 0 : index
    %c1_149 = arith.constant 1 : index
    %c0_150 = arith.constant 0 : index
    %125 = vector.load %arg20[%c0_147, %c0_148, %c1_149, %c0_150] : memref<2x10x10x4xf32, #tpu.memory_space<vmem>>, vector<2x8x8x4xf32>
    %126 = vector.shape_cast %125 : vector<2x8x8x4xf32> to vector<128x4xf32>
    %c0_151 = arith.constant 0 : index
    %c0_152 = arith.constant 0 : index
    %c2_153 = arith.constant 2 : index
    %c0_154 = arith.constant 0 : index
    %127 = vector.load %arg20[%c0_151, %c0_152, %c2_153, %c0_154] : memref<2x10x10x4xf32, #tpu.memory_space<vmem>>, vector<2x8x8x4xf32>
    %128 = vector.shape_cast %127 : vector<2x8x8x4xf32> to vector<128x4xf32>
    %c0_155 = arith.constant 0 : index
    %c1_156 = arith.constant 1 : index
    %c0_157 = arith.constant 0 : index
    %c0_158 = arith.constant 0 : index
    %129 = vector.load %arg20[%c0_155, %c1_156, %c0_157, %c0_158] : memref<2x10x10x4xf32, #tpu.memory_space<vmem>>, vector<2x8x8x4xf32>
    %130 = vector.shape_cast %129 : vector<2x8x8x4xf32> to vector<128x4xf32>
    %c0_159 = arith.constant 0 : index
    %c1_160 = arith.constant 1 : index
    %c1_161 = arith.constant 1 : index
    %c0_162 = arith.constant 0 : index
    %131 = vector.load %arg20[%c0_159, %c1_160, %c1_161, %c0_162] : memref<2x10x10x4xf32, #tpu.memory_space<vmem>>, vector<2x8x8x4xf32>
    %132 = vector.shape_cast %131 : vector<2x8x8x4xf32> to vector<128x4xf32>
    %c0_163 = arith.constant 0 : index
    %c1_164 = arith.constant 1 : index
    %c2_165 = arith.constant 2 : index
    %c0_166 = arith.constant 0 : index
    %133 = vector.load %arg20[%c0_163, %c1_164, %c2_165, %c0_166] : memref<2x10x10x4xf32, #tpu.memory_space<vmem>>, vector<2x8x8x4xf32>
    %134 = vector.shape_cast %133 : vector<2x8x8x4xf32> to vector<128x4xf32>
    %c0_167 = arith.constant 0 : index
    %c2_168 = arith.constant 2 : index
    %c0_169 = arith.constant 0 : index
    %c0_170 = arith.constant 0 : index
    %135 = vector.load %arg20[%c0_167, %c2_168, %c0_169, %c0_170] : memref<2x10x10x4xf32, #tpu.memory_space<vmem>>, vector<2x8x8x4xf32>
    %136 = vector.shape_cast %135 : vector<2x8x8x4xf32> to vector<128x4xf32>
    %c0_171 = arith.constant 0 : index
    %c2_172 = arith.constant 2 : index
    %c1_173 = arith.constant 1 : index
    %c0_174 = arith.constant 0 : index
    %137 = vector.load %arg20[%c0_171, %c2_172, %c1_173, %c0_174] : memref<2x10x10x4xf32, #tpu.memory_space<vmem>>, vector<2x8x8x4xf32>
    %138 = vector.shape_cast %137 : vector<2x8x8x4xf32> to vector<128x4xf32>
    %c0_175 = arith.constant 0 : index
    %c2_176 = arith.constant 2 : index
    %c2_177 = arith.constant 2 : index
    %c0_178 = arith.constant 0 : index
    %139 = vector.load %arg20[%c0_175, %c2_176, %c2_177, %c0_178] : memref<2x10x10x4xf32, #tpu.memory_space<vmem>>, vector<2x8x8x4xf32>
    %140 = vector.shape_cast %139 : vector<2x8x8x4xf32> to vector<128x4xf32>
    %141 = tpu.concatenate %124, %126, %128, %130, %132, %134, %136, %138, %140 in 1 : vector<128x4xf32>, vector<128x4xf32>, vector<128x4xf32>, vector<128x4xf32>, vector<128x4xf32>, vector<128x4xf32>, vector<128x4xf32>, vector<128x4xf32>, vector<128x4xf32> -> vector<128x36xf32>
    %142 = arith.truncf %141 : vector<128x36xf32> to vector<128x36xbf16>
    %c0_179 = arith.constant 0 : index
    %c0_180 = arith.constant 0 : index
    %143 = vector.load %arg17[%c0_179, %c0_180] : memref<12x36xbf16, #tpu.memory_space<vmem>>, vector<12x36xbf16>
    %cst_181 = arith.constant dense<0.000000e+00> : vector<12x128xf32>
    %144 = tpu.matmul %143, %142, %cst_181 {dimension_numbers = #tpu.dot_dimension_numbers<[1], [1], [0], [0], [0, 0, 1, 0], [], []>} : vector<12x36xbf16>, vector<128x36xbf16>, vector<12x128xf32> -> vector<12x128xf32>
    %c0_182 = arith.constant 0 : index
    %c0_183 = arith.constant 0 : index
    %145 = vector.load %arg18[%c0_182, %c0_183] : memref<12x1xf32, #tpu.memory_space<vmem>>, vector<12x1xf32>
    %146 = vector.broadcast %145 : vector<12x1xf32> to vector<12x128xf32>
    %147 = arith.addf %144, %146 : vector<12x128xf32>
    %cst_184 = arith.constant -1.000000e+00 : f32
    %cst_185 = arith.constant 1.000000e+00 : f32
    %148 = vector.broadcast %cst_184 : f32 to vector<12x128xf32>
    %149 = arith.maximumf %148, %147 : vector<12x128xf32>
    %150 = vector.broadcast %cst_185 : f32 to vector<12x128xf32>
    %151 = arith.minimumf %150, %149 : vector<12x128xf32>
    %c0_186 = arith.constant 0 : index
    %c0_187 = arith.constant 0 : index
    %152 = vector.load %arg19[%c0_186, %c0_187] : memref<12x128xf32, #tpu.memory_space<vmem>>, vector<12x128xf32>
    tpu.vector_store %arg19[%c0_186, %c0_187], %151 {strides = array<i32>} : memref<12x128xf32, #tpu.memory_space<vmem>>, vector<12x128xf32>,
    return
  }
}

</mosaic_0001>

<bundles_post_ra>
// kernel: osediff_forward.1
= control target key start
LH: loop header
LB: loop body
LE: loop exit
PB: predicated region body
PF: predicated region fallthrough
CT: control target
= control target key end

     0   :  { %vm236_vm0 = vcmask 1044480   ;;  %vm237_vm1 = vcmask 1045504   ;;  %v5284_v3 = vmov 65535   ;;  %s5285_s28 = smov 4   ;;  %vm84_vm2 = vcmask 261120   ;;  %s5290_s30 = smov 20   ;;  %s7408_s1 = inlined_call_operand.vmem [shape: bf16[32,32], index: 1, kind: input, shape index: {}]   ;;  %s7409_s6 = inlined_call_operand.vmem [shape: bf16[27,8], index: 6, kind: input, shape index: {}]   ;;  %s7410_s8 = inlined_call_operand.vmem [shape: f32[128,4], index: 8, kind: input, shape index: {}]   ;;  %s7411_s0 = inlined_call_operand.vmem [shape: bf16[8,32], index: 0, kind: input, shape index: {}]   ;;  %s7412_s2 = inlined_call_operand.vmem [shape: f32[1,32], index: 2, kind: input, shape index: {}]   ;;  %s7413_s5 = inlined_call_operand.vmem [shape: bf16[128,27], index: 5, kind: input, shape index: {}]   ;;  %s7414_s7 = inlined_call_operand.vmem [shape: f32[1,8], index: 7, kind: input, shape index: {}]   ;;  %s7415_s3 = inlined_call_operand.vmem [shape: bf16[32,32], index: 3, kind: input, shape index: {}]   ;;  %s7416_s9 = inlined_call_operand.vmem [shape: bf16[36,32], index: 9, kind: input, shape index: {}]   ;;  %s7417_s4 = inlined_call_operand.vmem [shape: f32[1,32], index: 4, kind: input, shape index: {}]   ;;  %s7418_s10 = inlined_call_operand.vmem [shape: f32[1,32], index: 10, kind: input, shape index: {}]   ;;  %s7419_s11 = inlined_call_operand.vmem [shape: bf16[32,32], index: 11, kind: input, shape index: {}]   ;;  %s7420_s12 = inlined_call_operand.vmem [shape: f32[1,32], index: 12, kind: input, shape index: {}]   ;;  %s7421_s13 = inlined_call_operand.vmem [shape: bf16[32,32], index: 13, kind: input, shape index: {}]   ;;  %s7422_s14 = inlined_call_operand.vmem [shape: f32[1,32], index: 14, kind: input, shape index: {}]   ;;  %s7423_s15 = inlined_call_operand.vmem [shape: bf16[288,4], index: 15, kind: input, shape index: {}]   ;;  %s7424_s16 = inlined_call_operand.vmem [shape: f32[1,4], index: 16, kind: input, shape index: {}]   ;;  %s7425_s18 = inlined_call_operand.vmem [shape: f32[12,1], index: 18, kind: input, shape index: {}]   ;;  %s7426_s17 = inlined_call_operand.vmem [shape: bf16[12,36], index: 17, kind: input, shape index: {}]   ;;  %s7427_s19 = inlined_call_operand.vmem [shape: f32[12,128], index: 19, kind: output, shape index: {}]  }
   0x1   :  { %7431 = sst [smem:[#allocation4_spill]] %s7408_s1  ;;  %v238_v4 = vsel %vm236_vm0, 4294967295, %v5284_v3  ;;  %v4248_v13 = vld [vmem:[%s7413_s5 + $0x10] sm:$0xff]  ;;  %v4251_v14 = vld [vmem:[%s7413_s5 + $0x28] sm:$0xff]  ;;  %vm211_vm3 = vcmask 220160   ;;  %v4246_v21 = vld [vmem:[%s7413_s5] sm:$0xff] }
   0x2   :  { %7432 = sst [smem:[#allocation5_spill]] %s7409_s6  ;;  %v239_v6 = vsel %vm237_vm1, %v238_v4, 0  ;;  %v4249_v22 = vld [vmem:[%s7413_s5 + $0x18] sm:$0xff]  ;;  %v4252_v23 = vld [vmem:[%s7413_s5 + $0x30] sm:$0xff]  ;;  %v4247_v29 = vld [vmem:[%s7413_s5 + $0x8] sm:$0xff]  ;;  %vm532_vm4 = vcmask 31744  }
   0x3   :  { %7433 = sst [smem:[#allocation6_spill]] %s7410_s8  ;;  %v4250_v30 = vld [vmem:[%s7413_s5 + $0x20] sm:$0xff]  ;;  %v4253_v31 = vld [vmem:[%s7413_s5 + $0x38] sm:$0xff]  ;;  %vm534_vm5 = vcmask 25600   ;;  %s5291_s21 = smov 24   ;;  %vm1480_vm6 = vcmask 1041408  }
   0x4   :  { %7434 = sst [smem:[#allocation7_spill]] %s7411_s0  ;;  %v5181_v36 = vld [vmem:[%s7412_s2] ss:$0 sm:$0xff]  ;;  %s5286_s2 = smov 124   ;;  %vm1305_vm7 = vcmask 64512   ;;  %vm1322_vm8 = vcmask 97280  }
   0x5   :  { %s7435_s20 = sld [smem:[#allocation4_spill]]  ;;  %v5524_v37 = vld [vmem:[%s7414_s7] ss:$0 sm:$0xff]  ;;  %s5288_s7 = smov 16   ;;  %vm1339_vm9 = vcmask 130048   ;;  %vm1356_vm10 = vcmask 162816  }
   0x6   :  { %s7436_s22 = sld [smem:[#allocation5_spill]]  ;;  %s5293_s6 = smov 32   ;;  %vm1373_vm11 = vcmask 195584   ;;  %vm1390_vm12 = vcmask 228352   ;;  %vm1455_vm13 = vcmask 293888   ;;  %vm1926_vm14 = vcmask 1043456  }
   0x7   :  { %s7437_s27 = sld [smem:[#allocation6_spill]]  ;;  %vm575_vm15 = vcmask 254976   ;;  %s5296_s23 = smov 96   ;;  %vm2658_vm0 = vcmask 523264   ;;  %vm2675_vm1 = vcmask 785408  }
   0x8   :  { %s7438_s8 = sld [smem:[#allocation7_spill]] }
   0xb   :  { %v4243_v0 = vld [vmem:[%s7435_s20 + $0x8] sm:$0xff]  ;;  %v4242_v7 = vld [vmem:[%s7435_s20] sm:$0xff]  ;;  %s5292_s20 = smov 8  }
   0xc   :  { %v4081_v1 = vld [vmem:[%s7436_s22 + $0x8] sm:$0xf]  ;;  %v4255_v2 = vld [vmem:[%s7436_s22 + $0x8] sm:$0x30]  ;;  %94 = vmatpush.bf16.msra.mxu0 %v4243_v0  ;;  %v4254_v11 = vld [vmem:[%s7436_s22] sm:$0xff] }
   0xd   :  { %v4082_v5 = vor.u32 %v4255_v2, %v4081_v1  ;;  %v340_v8 = vld [vmem:[%s7437_s27] sm:$0xff]  ;;  %v342_v10 = vld [vmem:[%s7437_s27 + $0x10] sm:$0xff]  ;;  %v341_v15 = vld [vmem:[%s7437_s27 + $0x8] sm:$0xff] }
   0xe   :  { %372 = vrot.lane.b32.xlu0 %v340_v8, %s5285_s28  ;;  %376 = vrot.lane.b32.xlu1 %v342_v10, %s5285_s28  ;;  %v5424_v12 = vld [vmem:[%s7438_s8] sm:$0xf]  ;;  %v343_v16 = vld [vmem:[%s7437_s27 + $0x18] sm:$0xff]  ;;  %s5294_s8 = smov 28  }
   0xf   :  { %v241_v9 = vand.u32 %v4082_v5, %v239_v6  ;;  %v344_v17 = vld [vmem:[%s7437_s27 + $0x20] sm:$0xff]  ;;  %v346_v18 = vld [vmem:[%s7437_s27 + $0x30] sm:$0xff]  ;;  %v345_v19 = vld [vmem:[%s7437_s27 + $0x28] sm:$0xff] }
  0x10   :  { %95 = vmatpush.bf16.msra.mxu0 %v4242_v7  ;;  %380 = vrot.lane.b32.xlu2 %v344_v17, %s5285_s28  ;;  %v347_v20 = vld [vmem:[%s7437_s27 + $0x38] sm:$0xff]  ;;  %v350_v24 = vld [vmem:[%s7437_s27 + $0x50] sm:$0xff]  ;;  %v349_v25 = vld [vmem:[%s7437_s27 + $0x48] sm:$0xff] }
  0x11   :  { %4281 = vmatpush.bf16.msra.mxu1 %v241_v9  ;;  %4282 = vmatpush.bf16.msra.mxu2 %v241_v9  ;;  %v348_v26 = vld [vmem:[%s7437_s27 + $0x40] sm:$0xff]  ;;  %v351_v27 = vld [vmem:[%s7437_s27 + $0x58] sm:$0xff]  ;;  %v353_v32 = vld [vmem:[%s7437_s27 + $0x68] sm:$0xff] }
  0x12   :  { %v352_v28 = vld [vmem:[%s7437_s27 + $0x60] sm:$0xff]  ;;  %v354_v33 = vld [vmem:[%s7437_s27 + $0x70] sm:$0xff]  ;;  %v355_v34 = vld [vmem:[%s7437_s27 + $0x78] sm:$0xff]  ;;  %s5289_s27 = smov 12  }
  0x13   :  { %4033 = vmatmul.msk.bf16.vlgmr.msra.gmra.mxu0 %vm84_vm2, %v5424_v12 }
  0x14   :  { %249 = vmatpush.bf16.msrb.mxu0 %v241_v9 }
  0x15   :  { %4283 = vmatpush.bf16.msra.mxu1 %v4254_v11  ;;  %4284 = vmatpush.bf16.msra.mxu2 %v4254_v11 }
  0x16   :  { %374 = vrot.lane.b32.xlu0 %v341_v15, %s5285_s28  ;;  %378 = vrot.lane.b32.xlu1 %v343_v16, %s5285_s28 }
  0x18   :  { %250 = vmatpush.bf16.msrb.mxu0 %v4254_v11  ;;  %4085 = vmatmul.msk.bf16.vlgmr.msra.gmra.mxu1 %vm211_vm3, %v4248_v13 }
  0x19   :  { %4088 = vmatmul.msk.bf16.vlgmr.msra.gmra.mxu2 %vm211_vm3, %v4251_v14  ;;  %382 = vrot.lane.b32.xlu2 %v345_v19, %s5285_s28 }
  0x1e   :  { %384 = vrot.lane.b32.xlu0 %v346_v18, %s5285_s28  ;;  %386 = vrot.lane.b32.xlu1 %v347_v20, %s5285_s28 }
  0x21   :  { %390 = vrot.lane.b32.xlu2 %v349_v25, %s5285_s28 }
  0x23   :  { %4083 = vmatmul.msk.bf16.vlgmr.msrb.gmra.mxu0 %vm211_vm3, %v4246_v21 }
  0x26   :  { %392 = vrot.lane.b32.xlu0 %v350_v24, %s5285_s28  ;;  %388 = vrot.lane.b32.xlu1 %v348_v26, %s5285_s28 }
  0x28   :  { %4086 = vmatmul.msk.bf16.gmra.mxu1 %vm211_vm3, %v4249_v22 }
  0x29   :  { %4089 = vmatmul.msk.bf16.gmra.mxu2 %vm211_vm3, %v4252_v23 }
  0x2e   :  { %394 = vrot.lane.b32.xlu0 %v351_v27, %s5285_s28  ;;  %396 = vrot.lane.b32.xlu1 %v352_v28, %s5285_s28 }
  0x33   :  { %4084 = vmatmul.msk.bf16.gmra.mxu0 %vm211_vm3, %v4247_v29 }
  0x36   :  { %398 = vrot.lane.b32.xlu0 %v353_v32, %s5285_s28  ;;  %402 = vrot.lane.b32.xlu1 %v355_v34, %s5285_s28 }
  0x38   :  { %4087 = vmatmul.msk.bf16.gmra.mxu1 %vm211_vm3, %v4250_v30 }
  0x39   :  { %4090 = vmatmul.msk.bf16.gmra.mxu2 %vm211_vm3, %v4253_v31 }
  0x3e   :  { %400 = vrot.lane.b32.xlu0 %v354_v33, %s5285_s28 }
  0x6a   :  { %v381_v55 = vpop.permute.xlu2 %380 }
  0x73   :  { %v383_v9 = vpop.permute.xlu2 %382 }
  0x80   :  { %v5516_v35 = vpop.permute.xlu0 %372  ;;  %v5531_v44 = vpop.permute.xlu1 %376 }
  0x88   :  { %v5526_v38 = vpop.permute.xlu0 %374  ;;  %v5543_v58 = vpop.permute.xlu1 %378 }
  0x90   :  { %v97_v39 = vpop.f32.mrf.mxu0  ;;  %v385_v51 = vpop.permute.xlu0 %384 }
  0x91   :  { %v98_v40 = vadd.f32 %v5181_v36, %v97_v39  ;;  %v387_v15 = vpop.permute.xlu1 %386 }
  0x93   :  { %v101_v42 = vpack.c.bf16 %v98_v40, %v98_v40 }
  0x95   :  { %v262_v41 = vpop.f32.mrf.mxu1  ;;  %v1667_v46 = vsel %vm84_vm2, %v101_v42, 0 }
  0x96   :  { %v5529_v43 = vadd.f32 %v5524_v37, %v262_v41  ;;  %1676 = vmatpush.bf16.xpose.msrb.mxu1 %v1667_v46 }
  0x98   :  { %v296_v45 = vmul.f32 0.5, %v5529_v43  ;;  %v99_v48 = vpop.f32.mrf.mxu0  ;;  %v393_v5 = vpop.permute.xlu0 %392 }
  0x99   :  { %v389_v40 = vpop.permute.xlu1 %388 }
  0x9a   :  { %v316_v47 = vmul.f32 1.442695, %v296_v45 }
  0x9c   :  { %v277_v49 = vpop.f32.mrf.mxu2  ;;  %5188 = vpow2.f32 %v316_v47 }
  0x9d   :  { %v5536_v50 = vadd.f32 %v5524_v37, %v277_v49  ;;  %v264_v52 = vpop.f32.mrf.mxu1 }
  0x9e   :  { %v5540_v54 = vadd.f32 %v5524_v37, %v264_v52 }
  0x9f   :  { %v302_v53 = vmul.f32 0.5, %v5536_v50 }
  0xa0   :  { %v297_v57 = vmul.f32 0.5, %v5540_v54  ;;  %v252_v62 = vpop.f32.mrf.mxu0  ;;  %v395_v46 = vpop.permute.xlu0 %394 }
  0xa1   :  { %v328_v56 = vmul.f32 1.442695, %v302_v53  ;;  %v5546_v0 = vadd.f32 %v5524_v37, %v252_v62 }
  0xa2   :  { %v5189_v59 = vpop.eup %5188  ;;  %v318_v60 = vmul.f32 1.442695, %v297_v57 }
  0xa3   :  { %5190 = vpow2.f32 %v328_v56  ;;  %v424_v61 = vmul.f32 %v5189_v59, %v381_v55  ;;  %v292_v3 = vmul.f32 0.5, %v5546_v0 }
  0xa4   :  { %v279_v63 = vpop.f32.mrf.mxu2  ;;  %5192 = vpow2.f32 %v318_v60 }
  0xa5   :  { %v5549_v1 = vadd.f32 %v5524_v37, %v279_v63  ;;  %v267_v2 = vpop.f32.mrf.mxu1  ;;  %460 = vrot.lane.b32.xlu0 %v424_v61, %s5286_s2  ;;  %v308_v7 = vmul.f32 1.442695, %v292_v3  ;;  %v397_v63 = vpop.permute.xlu1 %396 }
  0xa6   :  { %v5554_v4 = vadd.f32 %v5524_v37, %v267_v2 }
  0xa7   :  { %v303_v10 = vmul.f32 0.5, %v5549_v1  ;;  %5194 = vpow2.f32 %v308_v7 }
  0xa8   :  { %v298_v8 = vmul.f32 0.5, %v5554_v4  ;;  %v254_v17 = vpop.f32.mrf.mxu0 }
  0xa9   :  { %v5191_v6 = vpop.eup %5190  ;;  %v5560_v19 = vadd.f32 %v5524_v37, %v254_v17  ;;  %v330_v20 = vmul.f32 1.442695, %v303_v10 }
  0xaa   :  { %v430_v11 = vmul.f32 %v5191_v6, %v393_v5  ;;  %v5193_v13 = vpop.eup %5192  ;;  %v320_v14 = vmul.f32 1.442695, %v298_v8 }
  0xab   :  { %v425_v16 = vmul.f32 %v5193_v13, %v383_v9  ;;  %v293_v23 = vmul.f32 0.5, %v5560_v19  ;;  %v399_v13 = vpop.permute.xlu0 %398 }
  0xac   :  { %472 = vrot.lane.b32.xlu2 %v430_v11, %s5286_s2  ;;  %v282_v18 = vpop.f32.mrf.mxu2  ;;  %5196 = vpow2.f32 %v320_v14  ;;  %v5287_v14 = vmov 0.0  }
  0xad   :  { %v5563_v21 = vadd.f32 %v5524_v37, %v282_v18  ;;  %462 = vrot.lane.b32.xlu1 %v425_v16, %s5286_s2  ;;  %v269_v22 = vpop.f32.mrf.mxu1  ;;  %v5195_v26 = vpop.eup %5194  ;;  %v310_v27 = vmul.f32 1.442695, %v293_v23  ;;  %5198 = vpow2.f32 %v330_v20  ;;  %560 = vst.msk [vmem:[#allocation2 + $0xd0] sm:$0xff] %vm532_vm4, %v5287_v14 }
  0xae   :  { %v5568_v24 = vadd.f32 %v5524_v37, %v269_v22  ;;  %v420_v29 = vmul.f32 %v5195_v26, %v5516_v35  ;;  %561 = vst.msk [vmem:[#allocation2 + $0xd8] sm:$0x3] %vm534_vm5, %v5287_v14 }
  0xaf   :  { %v304_v25 = vmul.f32 0.5, %v5563_v21  ;;  %5200 = vpow2.f32 %v310_v27  ;;  %533 = vst.msk [vmem:[#allocation2] sm:$0xff] %vm532_vm4, %v5287_v14 }
  0xb0   :  { %v299_v28 = vmul.f32 0.5, %v5568_v24  ;;  %v257_v31 = vpop.f32.mrf.mxu0  ;;  %535 = vst.msk [vmem:[#allocation2 + $0x8] sm:$0x3] %vm534_vm5, %v5287_v14 }
  0xb1   :  { %v332_v32 = vmul.f32 1.442695, %v304_v25  ;;  %v5574_v36 = vadd.f32 %v5524_v37, %v257_v31  ;;  %536 = vst.msk [vmem:[#allocation2 + $0x10] sm:$0xff] %vm532_vm4, %v5287_v14 }
  0xb2   :  { %v5197_v30 = vpop.eup %5196  ;;  %v322_v39 = vmul.f32 1.442695, %v299_v28  ;;  %537 = vst.msk [vmem:[#allocation2 + $0x18] sm:$0x3] %vm534_vm5, %v5287_v14 }
  0xb3   :  { %v426_v33 = vmul.f32 %v5197_v30, %v385_v51  ;;  %v5199_v35 = vpop.eup %5198  ;;  %v294_v45 = vmul.f32 0.5, %v5574_v36  ;;  %5202 = vpow2.f32 %v332_v32  ;;  %538 = vst.msk [vmem:[#allocation2 + $0x20] sm:$0xff] %vm532_vm4, %v5287_v14  ;;  %v391_v30 = vpop.permute.xlu2 %390 }
  0xb4   :  { %v284_v34 = vpop.f32.mrf.mxu2  ;;  %5204 = vpow2.f32 %v322_v39  ;;  %v431_v53 = vmul.f32 %v5199_v35, %v395_v46  ;;  %539 = vst.msk [vmem:[#allocation2 + $0x28] sm:$0x3] %vm534_vm5, %v5287_v14  ;;  %v5736_v35 = vpop.permute.xlu1 %402 }
  0xb5   :  { %v5577_v41 = vadd.f32 %v5524_v37, %v284_v34  ;;  %464 = vrot.lane.b32.xlu2 %v426_v33, %s5286_s2  ;;  %452 = vrot.lane.b32.xlu1 %v420_v29, %s5286_s2  ;;  %v272_v42 = vpop.f32.mrf.mxu1  ;;  %v5201_v49 = vpop.eup %5200  ;;  %v312_v51 = vmul.f32 1.442695, %v294_v45  ;;  %540 = vst.msk [vmem:[#allocation2 + $0x30] sm:$0xff] %vm532_vm4, %v5287_v14 }
  0xb6   :  { %v5583_v47 = vadd.f32 %v5524_v37, %v272_v42  ;;  %v421_v56 = vmul.f32 %v5201_v49, %v5526_v38  ;;  %541 = vst.msk [vmem:[#allocation2 + $0x38] sm:$0x3] %vm534_vm5, %v5287_v14 }
  0xb7   :  { %v305_v48 = vmul.f32 0.5, %v5577_v41  ;;  %5206 = vpow2.f32 %v312_v51  ;;  %542 = vst.msk [vmem:[#allocation2 + $0x40] sm:$0xff] %vm532_vm4, %v5287_v14 }
  0xb8   :  { %v300_v52 = vmul.f32 0.5, %v5583_v47  ;;  %v259_v57 = vpop.f32.mrf.mxu0  ;;  %543 = vst.msk [vmem:[#allocation2 + $0x48] sm:$0x3] %vm534_vm5, %v5287_v14 }
  0xb9   :  { %v334_v55 = vmul.f32 1.442695, %v305_v48  ;;  %v5589_v60 = vadd.f32 %v5524_v37, %v259_v57  ;;  %v5203_v61 = vpop.eup %5202  ;;  %544 = vst.msk [vmem:[#allocation2 + $0x50] sm:$0xff] %vm532_vm4, %v5287_v14 }
  0xba   :  { %v324_v59 = vmul.f32 1.442695, %v300_v52  ;;  %v5205_v62 = vpop.eup %5204  ;;  %v432_v5 = vmul.f32 %v5203_v61, %v397_v63  ;;  %545 = vst.msk [vmem:[#allocation2 + $0x58] sm:$0x3] %vm534_vm5, %v5287_v14 }
  0xbb   :  { %5208 = vpow2.f32 %v334_v55  ;;  %v295_v3 = vmul.f32 0.5, %v5589_v60  ;;  %v427_v6 = vmul.f32 %v5205_v62, %v387_v15  ;;  %546 = vst.msk [vmem:[#allocation2 + $0x60] sm:$0xff] %vm532_vm4, %v5287_v14 }
  0xbc   :  { %5210 = vpow2.f32 %v324_v59  ;;  %v287_v7 = vpop.f32.mrf.mxu2  ;;  %547 = vst.msk [vmem:[#allocation2 + $0x68] sm:$0x3] %vm534_vm5, %v5287_v14 }
  0xbd   :  { %454 = vrot.lane.b32.xlu2 %v421_v56, %s5286_s2  ;;  %474 = vrot.lane.b32.xlu1 %v431_v53, %s5286_s2  ;;  %v5207_v2 = vpop.eup %5206  ;;  %v314_v8 = vmul.f32 1.442695, %v295_v3  ;;  %v5597_v9 = vadd.f32 %v5524_v37, %v287_v7  ;;  %v274_v17 = vpop.f32.mrf.mxu1  ;;  %548 = vst.msk [vmem:[#allocation2 + $0x70] sm:$0xff] %vm532_vm4, %v5287_v14 }
  0xbe   :  { %v422_v38 = vmul.f32 %v5207_v2, %v5531_v44  ;;  %v5615_v20 = vadd.f32 %v5524_v37, %v274_v17  ;;  %549 = vst.msk [vmem:[#allocation2 + $0x78] sm:$0x3] %vm534_vm5, %v5287_v14 }
  0xbf   :  { %5212 = vpow2.f32 %v314_v8  ;;  %v306_v44 = vmul.f32 0.5, %v5597_v9  ;;  %550 = vst.msk [vmem:[#allocation2 + $0x80] sm:$0xff] %vm532_vm4, %v5287_v14 }
  0xc0   :  { %456 = vrot.lane.b32.xlu0 %v422_v38, %s5286_s2  ;;  %v301_v23 = vmul.f32 0.5, %v5615_v20  ;;  %551 = vst.msk [vmem:[#allocation2 + $0x88] sm:$0x3] %vm534_vm5, %v5287_v14 }
  0xc1   :  { %v5209_v10 = vpop.eup %5208  ;;  %v336_v18 = vmul.f32 1.442695, %v306_v44  ;;  %552 = vst.msk [vmem:[#allocation2 + $0x90] sm:$0xff] %vm532_vm4, %v5287_v14 }
  0xc2   :  { %v5211_v11 = vpop.eup %5210  ;;  %v433_v15 = vmul.f32 %v5209_v10, %v399_v13  ;;  %v326_v26 = vmul.f32 1.442695, %v301_v23  ;;  %553 = vst.msk [vmem:[#allocation2 + $0x98] sm:$0x3] %vm534_vm5, %v5287_v14 }
  0xc3   :  { %v428_v16 = vmul.f32 %v5211_v11, %v389_v40  ;;  %5214 = vpow2.f32 %v336_v18  ;;  %554 = vst.msk [vmem:[#allocation2 + $0xa0] sm:$0xff] %vm532_vm4, %v5287_v14 }
  0xc4   :  { %5216 = vpow2.f32 %v326_v26  ;;  %555 = vst.msk [vmem:[#allocation2 + $0xa8] sm:$0x3] %vm534_vm5, %v5287_v14 }
  0xc5   :  { %466 = vrot.lane.b32.xlu2 %v427_v6, %s5286_s2  ;;  %476 = vrot.lane.b32.xlu1 %v432_v5, %s5286_s2  ;;  %v5213_v22 = vpop.eup %5212  ;;  %556 = vst.msk [vmem:[#allocation2 + $0xb0] sm:$0xff] %vm532_vm4, %v5287_v14 }
  0xc6   :  { %v423_v25 = vmul.f32 %v5213_v22, %v5543_v58  ;;  %v401_v58 = vpop.permute.xlu0 %400  ;;  %557 = vst.msk [vmem:[#allocation2 + $0xb8] sm:$0x3] %vm534_vm5, %v5287_v14 }
  0xc7   :  { %558 = vst.msk [vmem:[#allocation2 + $0xc0] sm:$0xff] %vm532_vm4, %v5287_v14 }
  0xc8   :  { %559 = vst.msk [vmem:[#allocation2 + $0xc8] sm:$0x3] %vm534_vm5, %v5287_v14 }
  0xc9   :  { %v5215_v27 = vpop.eup %5214  ;;  %562 = vst.msk [vmem:[#allocation2 + $0xe0] sm:$0xff] %vm532_vm4, %v5287_v14 }
  0xca   :  { %v434_v28 = vmul.f32 %v5215_v27, %v401_v58  ;;  %v5217_v29 = vpop.eup %5216  ;;  %563 = vst.msk [vmem:[#allocation2 + $0xe8] sm:$0x3] %vm534_vm5, %v5287_v14 }
  0xcb   :  { %v429_v31 = vmul.f32 %v5217_v29, %v391_v30  ;;  %564 = vst.msk [vmem:[#allocation2 + $0xf0] sm:$0xff] %vm532_vm4, %v5287_v14 }
  0xcc   :  { %565 = vst.msk [vmem:[#allocation2 + $0xf8] sm:$0x3] %vm534_vm5, %v5287_v14 }
  0xcd   :  { %478 = vrot.lane.b32.xlu2 %v433_v15, %s5286_s2  ;;  %468 = vrot.lane.b32.xlu1 %v428_v16, %s5286_s2  ;;  %566 = vst.msk [vmem:[#allocation2 + $0x100] sm:$0xff] %vm532_vm4, %v5287_v14  ;;  %v664_v15 = vld [vmem:[#allocation2 + $0x2] sm:$0xff] }
  0xce   :  { %567 = vst.msk [vmem:[#allocation2 + $0x108] sm:$0x3] %vm534_vm5, %v5287_v14  ;;  %v648_v16 = vld [vmem:[#allocation2 + $0x1] sm:$0xff] }
  0xcf   :  { %568 = vst.msk [vmem:[#allocation2 + $0x110] sm:$0xff] %vm532_vm4, %v5287_v14 }
  0xd0   :  { %569 = vst.msk [vmem:[#allocation2 + $0x118] sm:$0x3] %vm534_vm5, %v5287_v14 }
  0xd1   :  { %570 = vst.msk [vmem:[#allocation2 + $0x120] sm:$0xff] %vm532_vm4, %v5287_v14 }
  0xd2   :  { %571 = vst.msk [vmem:[#allocation2 + $0x128] sm:$0x3] %vm534_vm5, %v5287_v14 }
  0xd3   :  { %572 = vst.msk [vmem:[#allocation2 + $0x130] sm:$0xff] %vm532_vm4, %v5287_v14 }
  0xd4   :  { %573 = vst.msk [vmem:[#allocation2 + $0x138] sm:$0x3] %vm534_vm5, %v5287_v14 }
  0xd5   :  { %458 = vrot.lane.b32.xlu2 %v423_v25, %s5286_s2  ;;  %574 = vst.msk [vmem:[#allocation3] sm:$0xff] %vm84_vm2, %v5287_v14 }
  0xd6   :  { %577 = vst.msk [vmem:[#allocation3 + $0x10] sm:$0xff] %vm84_vm2, %v5287_v14 }
  0xd7   :  { %579 = vst.msk [vmem:[#allocation3 + $0x20] sm:$0xff] %vm84_vm2, %v5287_v14 }
  0xd8   :  { %581 = vst.msk [vmem:[#allocation3 + $0x30] sm:$0xff] %vm84_vm2, %v5287_v14 }
  0xd9   :  { %583 = vst.msk [vmem:[#allocation3 + $0x40] sm:$0xff] %vm84_vm2, %v5287_v14 }
  0xda   :  { %585 = vst.msk [vmem:[#allocation3 + $0x50] sm:$0xff] %vm84_vm2, %v5287_v14 }
  0xdb   :  { %587 = vst.msk [vmem:[#allocation3 + $0x60] sm:$0xff] %vm84_vm2, %v5287_v14 }
  0xdc   :  { %589 = vst.msk [vmem:[#allocation3 + $0x70] sm:$0xff] %vm84_vm2, %v5287_v14 }
  0xdd   :  { %480 = vrot.lane.b32.xlu2 %v434_v28, %s5286_s2  ;;  %591 = vst.msk [vmem:[#allocation3 + $0x80] sm:$0xff] %vm84_vm2, %v5287_v14 }
  0xde   :  { %593 = vst.msk [vmem:[#allocation3 + $0x90] sm:$0xff] %vm84_vm2, %v5287_v14 }
  0xdf   :  { %595 = vst.msk [vmem:[#allocation3 + $0xa0] sm:$0xff] %vm84_vm2, %v5287_v14 }
  0xe0   :  { %597 = vst.msk [vmem:[#allocation3 + $0xb0] sm:$0xff] %vm84_vm2, %v5287_v14 }
  0xe1   :  { %599 = vst.msk [vmem:[#allocation3 + $0xc0] sm:$0xff] %vm84_vm2, %v5287_v14 }
  0xe2   :  { %601 = vst.msk [vmem:[#allocation3 + $0xd0] sm:$0xff] %vm84_vm2, %v5287_v14 }
  0xe3   :  { %603 = vst.msk [vmem:[#allocation3 + $0xe0] sm:$0xff] %vm84_vm2, %v5287_v14 }
  0xe4   :  { %605 = vst.msk [vmem:[#allocation3 + $0xf0] sm:$0xff] %vm84_vm2, %v5287_v14 }
  0xe5   :  { %470 = vrot.lane.b32.xlu2 %v429_v31, %s5286_s2  ;;  %607 = vst.msk [vmem:[#allocation3 + $0x100] sm:$0xff] %vm84_vm2, %v5287_v14 }
  0xe6   :  { %609 = vst.msk [vmem:[#allocation3 + $0x110] sm:$0xff] %vm84_vm2, %v5287_v14 }
  0xe7   :  { %611 = vst.msk [vmem:[#allocation3 + $0x120] sm:$0xff] %vm84_vm2, %v5287_v14 }
  0xe8   :  { %613 = vst.msk [vmem:[#allocation3 + $0x130] sm:$0xff] %vm84_vm2, %v5287_v14 }
  0xe9   :  { %578 = vst.msk [vmem:[#allocation3 + $0x18] sm:$0x3] %vm575_vm15, %v5287_v14 }
  0xea   :  { %576 = vst.msk [vmem:[#allocation3 + $0x8] sm:$0x3] %vm575_vm15, %v5287_v14 }
  0xeb   :  { %580 = vst.msk [vmem:[#allocation3 + $0x28] sm:$0x3] %vm575_vm15, %v5287_v14 }
  0xec   :  { %582 = vst.msk [vmem:[#allocation3 + $0x38] sm:$0x3] %vm575_vm15, %v5287_v14 }
  0xed   :  { %584 = vst.msk [vmem:[#allocation3 + $0x48] sm:$0x3] %vm575_vm15, %v5287_v14 }
  0xee   :  { %586 = vst.msk [vmem:[#allocation3 + $0x58] sm:$0x3] %vm575_vm15, %v5287_v14 }
  0xef   :  { %588 = vst.msk [vmem:[#allocation3 + $0x68] sm:$0x3] %vm575_vm15, %v5287_v14 }
  0xf0   :  { %590 = vst.msk [vmem:[#allocation3 + $0x78] sm:$0x3] %vm575_vm15, %v5287_v14 }
  0xf1   :  { %592 = vst.msk [vmem:[#allocation3 + $0x88] sm:$0x3] %vm575_vm15, %v5287_v14 }
  0xf2   :  { %594 = vst.msk [vmem:[#allocation3 + $0x98] sm:$0x3] %vm575_vm15, %v5287_v14 }
  0xf3   :  { %596 = vst.msk [vmem:[#allocation3 + $0xa8] sm:$0x3] %vm575_vm15, %v5287_v14 }
  0xf4   :  { %598 = vst.msk [vmem:[#allocation3 + $0xb8] sm:$0x3] %vm575_vm15, %v5287_v14 }
  0xf5   :  { %600 = vst.msk [vmem:[#allocation3 + $0xc8] sm:$0x3] %vm575_vm15, %v5287_v14 }
  0xf6   :  { %602 = vst.msk [vmem:[#allocation3 + $0xd8] sm:$0x3] %vm575_vm15, %v5287_v14 }
  0xf7   :  { %604 = vst.msk [vmem:[#allocation3 + $0xe8] sm:$0x3] %vm575_vm15, %v5287_v14 }
  0xf8   :  { %606 = vst.msk [vmem:[#allocation3 + $0xf8] sm:$0x3] %vm575_vm15, %v5287_v14 }
  0xf9   :  { %608 = vst.msk [vmem:[#allocation3 + $0x108] sm:$0x3] %vm575_vm15, %v5287_v14 }
  0xfa   :  { %610 = vst.msk [vmem:[#allocation3 + $0x118] sm:$0x3] %vm575_vm15, %v5287_v14 }
  0xfb   :  { %612 = vst.msk [vmem:[#allocation3 + $0x128] sm:$0x3] %vm575_vm15, %v5287_v14 }
  0xfc   :  { %614 = vst.msk [vmem:[#allocation3 + $0x138] sm:$0x3] %vm575_vm15, %v5287_v14 }
 0x106   :  { %v473_v32 = vpop.permute.xlu2 %472 }
 0x107   :  { %v510_v33 = vadd.f32 %v473_v32, %v5536_v50 }
 0x109   :  { %v526_v34 = vmul.f32 0.18215, %v510_v33 }
 0x10b   :  { %626 = vst.msk [vmem:[#allocation2 + $0xd1] sm:$0xff] %vm532_vm4, %v526_v34 }
 0x10f   :  { %v465_v39 = vpop.permute.xlu2 %464 }
 0x110   :  { %v506_v40 = vadd.f32 %v465_v39, %v5554_v4 }
 0x112   :  { %v522_v42 = vmul.f32 0.18215, %v506_v40 }
 0x114   :  { %622 = vst.msk [vmem:[#allocation2 + $0x71] sm:$0xff] %vm532_vm4, %v522_v42 }
 0x117   :  { %v461_v45 = vpop.permute.xlu0 %460  ;;  %v455_v46 = vpop.permute.xlu2 %454 }
 0x118   :  { %v504_v48 = vadd.f32 %v461_v45, %v5529_v43  ;;  %v501_v49 = vadd.f32 %v455_v46, %v5560_v19 }
 0x11a   :  { %v520_v51 = vmul.f32 0.18215, %v504_v48  ;;  %v517_v52 = vmul.f32 0.18215, %v501_v49 }
 0x11b   :  { %v5767_v17 = vld [vmem:[#allocation2 + $0x70] sm:$0xff] }
 0x11c   :  { %620 = vst.msk [vmem:[#allocation2 + $0x51] sm:$0xff] %vm532_vm4, %v520_v51  ;;  %v766_v39 = vld [vmem:[#allocation2 + $0x72] sm:$0xff] }
 0x11d   :  { %617 = vst.msk [vmem:[#allocation2 + $0x21] sm:$0xff] %vm532_vm4, %v517_v52  ;;  %v750_v40 = vld [vmem:[#allocation2 + $0x71] sm:$0xff] }
 0x11f   :  { %v463_v50 = vpop.permute.xlu1 %462  ;;  %v467_v53 = vpop.permute.xlu2 %466 }
 0x120   :  { %v505_v4 = vadd.f32 %v463_v50, %v5540_v54  ;;  %v507_v55 = vadd.f32 %v467_v53, %v5568_v24 }
 0x122   :  { %v521_v56 = vmul.f32 0.18215, %v505_v4  ;;  %v523_v57 = vmul.f32 0.18215, %v507_v55 }
 0x123   :  { %v5748_v62 = vld [vmem:[#allocation2 + $0x51] sm:$0xff] }
 0x124   :  { %621 = vst.msk [vmem:[#allocation2 + $0x61] sm:$0xff] %vm532_vm4, %v521_v56  ;;  %v5750_v3 = vld [vmem:[#allocation2 + $0x50] sm:$0xff]  ;;  %v5782_v33 = vld [vmem:[#allocation2 + $0x20] sm:$0xff] }
 0x125   :  { %623 = vst.msk [vmem:[#allocation2 + $0x81] sm:$0xff] %vm532_vm4, %v523_v57  ;;  %v5752_v54 = vld [vmem:[#allocation2 + $0x52] sm:$0xff]  ;;  %v761_v53 = vld [vmem:[#allocation2 + $0x22] sm:$0xff] }
 0x126   :  { %v697_v4 = vld [vmem:[#allocation2 + $0x21] sm:$0xff] }
 0x127   :  { %v479_v43 = vpop.permute.xlu2 %478  ;;  %v453_v19 = vpop.permute.xlu1 %452 }
 0x128   :  { %v513_v59 = vadd.f32 %v479_v43, %v5577_v41  ;;  %v500_v61 = vadd.f32 %v453_v19, %v5546_v0 }
 0x12a   :  { %v529_v63 = vmul.f32 0.18215, %v513_v59  ;;  %v516_v2 = vmul.f32 0.18215, %v500_v61 }
 0x12b   :  { %v701_v24 = vld [vmem:[#allocation2 + $0x61] sm:$0xff] }
 0x12c   :  { %v5754_v5 = vld [vmem:[#allocation2 + $0x60] sm:$0xff]  ;;  %629 = vst.msk [vmem:[#allocation2 + $0x101] sm:$0xff] %vm532_vm4, %v529_v63  ;;  %v4304_v6 = vpack.i.bf16 %v701_v24, %v5748_v62  ;;  %v4329_v42 = vpack.i.bf16 %v750_v40, %v701_v24 }
 0x12d   :  { %v717_v38 = vld [vmem:[#allocation2 + $0x62] sm:$0xff]  ;;  %v4299_v41 = vpack.i.bf16 %v5754_v5, %v5750_v3  ;;  %616 = vst.msk [vmem:[#allocation2 + $0x11] sm:$0xff] %vm532_vm4, %v516_v2  ;;  %v4324_v18 = vpack.i.bf16 %v5767_v17, %v5754_v5 }
 0x12e   :  { %v4309_v0 = vpack.i.bf16 %v717_v38, %v5752_v54  ;;  %4305 = vrot.lane.b32.xlu0 %v4304_v6, %s5288_s7  ;;  %v719_v57 = vld [vmem:[#allocation2 + $0x82] sm:$0xff] }
 0x12f   :  { %4300 = vrot.lane.b32.xlu2 %v4299_v41, %s5289_s27  ;;  %v459_v7 = vpop.permute.xlu2 %458  ;;  %v475_v8 = vpop.permute.xlu1 %474  ;;  %v687_v19 = vld [vmem:[#allocation2 + $0x80] sm:$0xff]  ;;  %v4409_v59 = vpack.i.bf16 %v719_v57, %v766_v39 }
 0x130   :  { %4310 = vrot.lane.b32.xlu1 %v4309_v0, %s5290_s30  ;;  %v503_v10 = vadd.f32 %v459_v7, %v5589_v60  ;;  %v511_v11 = vadd.f32 %v475_v8, %v5549_v1  ;;  %v4364_v63 = vpack.i.bf16 %v687_v19, %v5767_v17  ;;  %v768_v8 = vld [vmem:[#allocation2 + $0x92] sm:$0xff] }
 0x132   :  { %v519_v13 = vmul.f32 0.18215, %v503_v10  ;;  %v527_v44 = vmul.f32 0.18215, %v511_v11  ;;  %v457_v25 = vpop.permute.xlu0 %456  ;;  %v703_v10 = vld [vmem:[#allocation2 + $0x81] sm:$0xff]  ;;  %v736_v11 = vld [vmem:[#allocation2 + $0x90] sm:$0xff] }
 0x133   :  { %v502_v1 = vadd.f32 %v457_v25, %v5574_v36  ;;  %v672_v25 = vld [vmem:[#allocation2 + $0xa2] sm:$0xff] }
 0x134   :  { %619 = vst.msk [vmem:[#allocation2 + $0x41] sm:$0xff] %vm532_vm4, %v519_v13  ;;  %v665_v22 = vld [vmem:[#allocation2 + $0x12] sm:$0xff]  ;;  %v4439_v13 = vpack.i.bf16 %v768_v8, %v719_v57 }
 0x135   :  { %v649_v23 = vld [vmem:[#allocation2 + $0x11] sm:$0xff]  ;;  %627 = vst.msk [vmem:[#allocation2 + $0xe1] sm:$0xff] %vm532_vm4, %v527_v44  ;;  %v4319_v26 = vpack.i.bf16 %v665_v22, %v664_v15  ;;  %v518_v28 = vmul.f32 0.18215, %v502_v1  ;;  %v4359_v55 = vpack.i.bf16 %v761_v53, %v665_v22  ;;  %v4404_v44 = vpack.i.bf16 %v703_v10, %v750_v40 }
 0x136   :  { %v4314_v60 = vpack.i.bf16 %v649_v23, %v648_v16  ;;  %v5779_v31 = vld [vmem:[#allocation2 + $0x10] sm:$0xff]  ;;  %v4354_v56 = vpack.i.bf16 %v697_v4, %v649_v23  ;;  %v4414_v15 = vpack.i.bf16 %v736_v11, %v687_v19  ;;  %v289_v16 = vpop.f32.mrf.mxu2  ;;  %v4244_v19 = vld [vmem:[%s7415_s3] sm:$0xff]  ;;  %v4257_v11 = vld [vmem:[%s7416_s9 + $0x8] sm:$0xff] }
 0x137   :  { %4325 = vrot.lane.b32.xlu2 %v4324_v18, %s5291_s21  ;;  %v481_v27 = vpop.permute.xlu2 %480  ;;  %v477_v58 = vpop.permute.xlu1 %476  ;;  %618 = vst.msk [vmem:[#allocation2 + $0x31] sm:$0xff] %vm532_vm4, %v518_v28  ;;  %v4349_v34 = vpack.i.bf16 %v5782_v33, %v5779_v31  ;;  %v5829_v23 = vadd.f32 %v5524_v37, %v289_v16  ;;  %v4256_v16 = vld [vmem:[%s7416_s9] sm:$0xff] }
 0x138   :  { %4320 = vrot.lane.b32.xlu1 %v4319_v26, %s5292_s20  ;;  %4315 = vrot.lane.b32.xlu0 %v4314_v60, %s5285_s28  ;;  %v514_v29 = vadd.f32 %v481_v27, %v5597_v9  ;;  %v512_v30 = vadd.f32 %v477_v58, %v5563_v21  ;;  %v4334_v9 = vpack.i.bf16 %v766_v39, %v717_v38  ;;  %v656_v60 = vld [vmem:[#allocation2 + $0xa1] sm:$0xff]  ;;  %v722_v39 = vld [vmem:[#allocation2 + $0xd2] sm:$0xff] }
 0x139   :  { %v307_v27 = vmul.f32 0.5, %v5829_v23 }
 0x13a   :  { %v530_v36 = vmul.f32 0.18215, %v514_v29  ;;  %v528_v32 = vmul.f32 0.18215, %v512_v30 }
 0x13b   :  { %v715_v2 = vld [vmem:[#allocation2 + $0x42] sm:$0xff]  ;;  %v338_v30 = vmul.f32 1.442695, %v307_v27 }
 0x13c   :  { %630 = vst.msk [vmem:[#allocation2 + $0x111] sm:$0xff] %vm532_vm4, %v530_v36  ;;  %v747_v38 = vld [vmem:[#allocation2 + $0x41] sm:$0xff]  ;;  %v4444_v28 = vpack.i.bf16 %v5752_v54, %v715_v2 }
 0x13d   :  { %628 = vst.msk [vmem:[#allocation2 + $0xf1] sm:$0xff] %vm532_vm4, %v528_v32  ;;  %v4434_v6 = vpack.i.bf16 %v5748_v62, %v747_v38  ;;  %v5813_v41 = vld [vmem:[#allocation2 + $0x40] sm:$0xff]  ;;  %v752_v62 = vld [vmem:[#allocation2 + $0x91] sm:$0xff]  ;;  %5218 = vpow2.f32 %v338_v30 }
 0x13e   :  { %v5793_v49 = vld [vmem:[#allocation2 + $0x30] sm:$0xff]  ;;  %v4419_v18 = vpack.i.bf16 %v752_v62, %v703_v10  ;;  %v4429_v22 = vpack.i.bf16 %v5750_v3, %v5813_v41  ;;  %v5836_v36 = vld [vmem:[#allocation2 + $0xe0] sm:$0xff] }
 0x13f   :  { %4350 = vrot.lane.b32.xlu2 %v4349_v34, %s5289_s27  ;;  %v471_v21 = vpop.permute.xlu2 %470  ;;  %v469_v45 = vpop.permute.xlu1 %468  ;;  %v4369_v50 = vpack.i.bf16 %v5793_v49, %v5782_v33  ;;  %v746_v43 = vld [vmem:[#allocation2 + $0x31] sm:$0xff]  ;;  %v4394_v7 = vpack.i.bf16 %v5813_v41, %v5793_v49  ;;  %v723_v37 = vld [vmem:[#allocation2 + $0xe2] sm:$0xff] }
 0x140   :  { %4335 = vrot.lane.b32.xlu1 %v4334_v9, %s5293_s6  ;;  %4330 = vrot.lane.b32.xlu0 %v4329_v42, %s5294_s8  ;;  %v509_v46 = vadd.f32 %v471_v21, %v5615_v20  ;;  %v508_v48 = vadd.f32 %v469_v45, %v5583_v47  ;;  %v762_v20 = vld [vmem:[#allocation2 + $0x32] sm:$0xff]  ;;  %v4374_v61 = vpack.i.bf16 %v746_v43, %v697_v4  ;;  %v5896_v62 = vld [vmem:[#allocation2 + $0x100] sm:$0xff] }
 0x141   :  { %v4379_v47 = vpack.i.bf16 %v762_v20, %v761_v53  ;;  %v4424_v24 = vpack.i.bf16 %v715_v2, %v762_v20  ;;  %v4399_v0 = vpack.i.bf16 %v747_v38, %v746_v43  ;;  %v5838_v32 = vld [vmem:[#allocation2 + $0xd0] sm:$0xff]  ;;  %v4479_v40 = vpack.i.bf16 %v723_v37, %v722_v39 }
 0x142   :  { %v525_v51 = vmul.f32 0.18215, %v509_v46  ;;  %v524_v52 = vmul.f32 0.18215, %v508_v48  ;;  %v4469_v34 = vpack.i.bf16 %v5836_v36, %v5838_v32  ;;  %v706_v20 = vld [vmem:[#allocation2 + $0xd1] sm:$0xff] }
 0x143   :  { %v1435_v2 = vld [vmem:[%s7416_s9 + $0x10] sm:$0x3] }
 0x144   :  { %625 = vst.msk [vmem:[#allocation2 + $0xc1] sm:$0xff] %vm532_vm4, %v525_v51  ;;  %v5845_v54 = vld [vmem:[#allocation2 + $0xf0] sm:$0xff]  ;;  %v707_v51 = vld [vmem:[#allocation2 + $0xe1] sm:$0xff] }
 0x145   :  { %624 = vst.msk [vmem:[#allocation2 + $0xb1] sm:$0xff] %vm532_vm4, %v524_v52  ;;  %v4484_v21 = vpack.i.bf16 %v5845_v54, %v5836_v36  ;;  %v5914_v27 = vld [vmem:[#allocation2 + $0x110] sm:$0xff] }
 0x147   :  { %4370 = vrot.lane.b32.xlu2 %v4369_v50, %s5291_s21 }
 0x148   :  { %4345 = vrot.lane.b32.xlu1 %v4334_v9, %s5292_s20  ;;  %4340 = vrot.lane.b32.xlu0 %v4329_v42, %s5285_s28  ;;  %v5219_v9 = vpop.eup %5218  ;;  %v5847_v42 = vld [vmem:[#allocation2 + $0xf2] sm:$0xff] }
 0x149   :  { %v435_v45 = vmul.f32 %v5219_v9, %v5736_v35  ;;  %v5853_v46 = vpack.i.bf16 %v5847_v42, %v723_v37  ;;  %v4245_v35 = vld [vmem:[%s7415_s3 + $0x8] sm:$0xff]  ;;  %v5926_v37 = vld [vmem:[#allocation2 + $0x112] sm:$0xff] }
 0x14a   :  { %128 = vmatpush.bf16.msra.mxu3 %v4245_v35  ;;  %v678_v9 = vld [vmem:[#allocation2 + $0x102] sm:$0xff] }
 0x14b   :  { %v721_v48 = vld [vmem:[#allocation2 + $0xc2] sm:$0xff] }
 0x14c   :  { %v673_v26 = vld [vmem:[#allocation2 + $0xb2] sm:$0xff]  ;;  %v705_v52 = vld [vmem:[#allocation2 + $0xc1] sm:$0xff] }
 0x14d   :  { %v657_v1 = vld [vmem:[#allocation2 + $0xb1] sm:$0xff]  ;;  %v4464_v58 = vpack.i.bf16 %v673_v26, %v672_v25  ;;  %v4509_v53 = vpack.i.bf16 %v721_v48, %v673_v26  ;;  %v4519_v43 = vpack.i.bf16 %v706_v20, %v705_v52  ;;  %v5884_v38 = vld [vmem:[#allocation2 + $0xc0] sm:$0xff] }
 0x14e   :  { %v4459_v29 = vpack.i.bf16 %v657_v1, %v656_v60  ;;  %v4504_v4 = vpack.i.bf16 %v705_v52, %v657_v1  ;;  %129 = vmatpush.bf16.msra.mxu3 %v4244_v19  ;;  %v5912_v60 = vld [vmem:[#allocation2 + $0x111] sm:$0xff] }
 0x14f   :  { %4380 = vrot.lane.b32.xlu2 %v4379_v47, %s5293_s6 }
 0x150   :  { %4360 = vrot.lane.b32.xlu1 %v4359_v55, %s5290_s30  ;;  %4355 = vrot.lane.b32.xlu0 %v4354_v56, %s5288_s7  ;;  %v756_v55 = vld [vmem:[#allocation2 + $0xf1] sm:$0xff]  ;;  %v4524_v56 = vpack.i.bf16 %v722_v39, %v721_v48 }
 0x151   :  { %v4489_v57 = vpack.i.bf16 %v756_v55, %v707_v51  ;;  %4042 = vmatmul.msk.bf16.vlgmr.msra.gmra.mxu3 %vm84_vm2, %v5424_v12 }
 0x157   :  { %4410 = vrot.lane.b32.xlu2 %v4409_v59, %s5290_s30 }
 0x158   :  { %4375 = vrot.lane.b32.xlu1 %v4374_v61, %s5294_s8  ;;  %4365 = vrot.lane.b32.xlu0 %v4364_v63, %s5289_s27 }
 0x15f   :  { %4425 = vrot.lane.b32.xlu2 %v4424_v24, %s5290_s30  ;;  %v5882_v24 = vld [vmem:[#allocation2 + $0xb0] sm:$0xff] }
 0x160   :  { %4390 = vrot.lane.b32.xlu1 %v4379_v47, %s5292_s20  ;;  %4385 = vrot.lane.b32.xlu0 %v4374_v61, %s5285_s28  ;;  %v4474_v47 = vpack.i.bf16 %v707_v51, %v706_v20 }
 0x167   :  { %4435 = vrot.lane.b32.xlu2 %v4434_v6, %s5294_s8 }
 0x168   :  { %4400 = vrot.lane.b32.xlu1 %v4399_v0, %s5288_s7  ;;  %4395 = vrot.lane.b32.xlu0 %v4394_v7, %s5289_s27  ;;  %v4499_v7 = vpack.i.bf16 %v5884_v38, %v5882_v24 }
 0x16f   :  { %4440 = vrot.lane.b32.xlu2 %v4439_v13, %s5293_s6 }
 0x170   :  { %4405 = vrot.lane.b32.xlu1 %v4404_v44, %s5288_s7  ;;  %4415 = vrot.lane.b32.xlu0 %v4414_v15, %s5291_s21  ;;  %v709_v44 = vld [vmem:[#allocation2 + $0x101] sm:$0xff] }
 0x171   :  { %v4554_v15 = vpack.i.bf16 %v709_v44, %v756_v55 }
 0x177   :  { %4450 = vrot.lane.b32.xlu2 %v4434_v6, %s5285_s28  ;;  %v1449_v6 = vunpack.c.l.b16 %v1435_v2 }
 0x178   :  { %4420 = vrot.lane.b32.xlu1 %v4419_v18, %s5294_s8  ;;  %4430 = vrot.lane.b32.xlu0 %v4429_v22, %s5291_s21  ;;  %v4514_v18 = vpack.i.bf16 %v5838_v32, %v5884_v38  ;;  %v4549_v22 = vpack.i.bf16 %v5896_v62, %v5845_v54 }
 0x179   :  { %v1452_v0 = vpack.c.b16 %v1449_v6, %v1449_v6 }
 0x17b   :  { %v1482_v8 = vsel %vm1480_vm6, %v1452_v0, 0 }
 0x17c   :  { %1489 = vmatpush.bf16.msrb.mxu3 %v1482_v8 }
 0x17f   :  { %4465 = vrot.lane.b32.xlu2 %v4464_v58, %s5292_s20  ;;  %v4569_v58 = vpack.i.bf16 %v5912_v60, %v709_v44 }
 0x180   :  { %4445 = vrot.lane.b32.xlu0 %v4444_v28, %s5293_s6  ;;  %4460 = vrot.lane.b32.xlu1 %v4459_v29, %s5285_s28 }
 0x181   :  { %1490 = vmatpush.bf16.msrb.mxu3 %v4257_v11 }
 0x185   :  { %1491 = vmatpush.bf16.msrb.mxu3 %v4256_v16 }
 0x187   :  { %4470 = vrot.lane.b32.xlu2 %v4469_v34, %s5289_s27 }
 0x188   :  { %4455 = vrot.lane.b32.xlu0 %v4444_v28, %s5292_s20  ;;  %4480 = vrot.lane.b32.xlu1 %v4479_v40, %s5290_s30  ;;  %v4564_v28 = vpack.i.bf16 %v5914_v27, %v5896_v62  ;;  %v632_v40 = vld [vmem:[#allocation2] sm:$0xff] }
 0x189   :  { %v5859_v50 = vpop.permute.xlu2 %4300 }
 0x18f   :  { %4485 = vrot.lane.b32.xlu2 %v4484_v21, %s5291_s21 }
 0x190   :  { %482 = vrot.lane.b32.xlu0 %v435_v45, %s5286_s2  ;;  %4495 = vrot.lane.b32.xlu1 %v5853_v46, %s5293_s6  ;;  %v4584_v45 = vpack.i.bf16 %v5926_v37, %v678_v9 }
 0x191   :  { %v5870_v59 = vpop.permute.xlu2 %4325 }
 0x197   :  { %4510 = vrot.lane.b32.xlu2 %v4509_v53, %s5290_s30 }
 0x198   :  { %4475 = vrot.lane.b32.xlu0 %v4474_v47, %s5288_s7  ;;  %4505 = vrot.lane.b32.xlu1 %v4504_v4, %s5288_s7 }
 0x199   :  { %v4351_v10 = vpop.permute.xlu2 %4350 }
 0x19a   :  { %v4353_v53 = vunpack.i.h.bf16 %v4351_v10 }
 0x19f   :  { %4525 = vrot.lane.b32.xlu2 %v4524_v56, %s5293_s6 }
 0x1a0   :  { %4490 = vrot.lane.b32.xlu0 %v4489_v57, %s5294_s8  ;;  %4520 = vrot.lane.b32.xlu1 %v4519_v43, %s5294_s8  ;;  %v5875_v61 = vpop.permute.xlu0 %4305 }
 0x1a1   :  { %v4371_v1 = vpop.permute.xlu2 %4370 }
 0x1a2   :  { %v5877_v63 = vpop.permute.xlu1 %4310 }
 0x1a7   :  { %4530 = vrot.lane.b32.xlu2 %v4489_v57, %s5285_s28 }
 0x1a8   :  { %4500 = vrot.lane.b32.xlu0 %v4499_v7, %s5289_s27  ;;  %4545 = vrot.lane.b32.xlu1 %v4524_v56, %s5292_s20  ;;  %v4352_v56 = vunpack.i.l.bf16 %v4351_v10  ;;  %v4559_v7 = vpack.i.bf16 %v678_v9, %v5847_v42 }
 0x1a9   :  { %v4381_v21 = vpop.permute.xlu2 %4380 }
 0x1aa   :  { %v4316_v13 = vpop.permute.xlu0 %4315  ;;  %v4321_v12 = vpop.permute.xlu1 %4320 }
 0x1ab   :  { %v4318_v34 = vunpack.i.h.bf16 %v4316_v13  ;;  %v4317_v39 = vunpack.i.l.bf16 %v4316_v13  ;;  %v4323_v48 = vunpack.i.h.bf16 %v4321_v12  ;;  %v4322_v51 = vunpack.i.l.bf16 %v4321_v12 }
 0x1ac   :  { %v4373_v13 = vunpack.i.h.bf16 %v4371_v1  ;;  %v4372_v12 = vunpack.i.l.bf16 %v4371_v1 }
 0x1ad   :  { %v1289_v52 = vsel %vm532_vm4, %v632_v40, %v4317_v39  ;;  %v1290_v20 = vsel %vm532_vm4, %v5779_v31, %v4318_v34 }
 0x1ae   :  { %v1307_v47 = vsel %vm1305_vm7, %v1290_v20, %v4323_v48  ;;  %v1306_v4 = vsel %vm1305_vm7, %v1289_v52, %v4322_v51 }
 0x1af   :  { %4555 = vrot.lane.b32.xlu2 %v4554_v15, %s5288_s7  ;;  %v1324_v19 = vsel %vm1322_vm8, %v1307_v47, %v4353_v53 }
 0x1b0   :  { %4515 = vrot.lane.b32.xlu0 %v4514_v18, %s5291_s21  ;;  %4550 = vrot.lane.b32.xlu1 %v4549_v22, %s5289_s27  ;;  %v4383_v22 = vunpack.i.h.bf16 %v4381_v21 }
 0x1b1   :  { %v5943_v8 = vpop.permute.xlu2 %4410 }
 0x1b2   :  { %v5908_v25 = vpop.permute.xlu0 %4330  ;;  %v5910_v26 = vpop.permute.xlu1 %4335 }
 0x1b7   :  { %4570 = vrot.lane.b32.xlu2 %v4569_v58, %s5294_s8 }
 0x1b8   :  { %4535 = vrot.lane.b32.xlu0 %v4519_v43, %s5285_s28  ;;  %4565 = vrot.lane.b32.xlu1 %v4564_v28, %s5291_s21  ;;  %v1323_v43 = vsel %vm1322_vm8, %v1306_v4, %v4352_v56 }
 0x1b9   :  { %v4426_v48 = vpop.permute.xlu2 %4425 }
 0x1ba   :  { %v5922_v29 = vpop.permute.xlu0 %4340  ;;  %v5924_v30 = vpop.permute.xlu1 %4345 }
 0x1bf   :  { %4585 = vrot.lane.b32.xlu2 %v4584_v45, %s5292_s20 }
 0x1c0   :  { %4540 = vrot.lane.b32.xlu0 %v5853_v46, %s5292_s20  ;;  %4580 = vrot.lane.b32.xlu1 %v4569_v58, %s5285_s28  ;;  %v4382_v58 = vunpack.i.l.bf16 %v4381_v21 }
 0x1c1   :  { %v4436_v53 = vpop.permute.xlu2 %4435 }
 0x1c2   :  { %v4356_v35 = vpop.permute.xlu0 %4355  ;;  %v4361_v55 = vpop.permute.xlu1 %4360 }
 0x1c3   :  { %v4358_v57 = vunpack.i.h.bf16 %v4356_v35  ;;  %v4357_v31 = vunpack.i.l.bf16 %v4356_v35  ;;  %v4363_v2 = vunpack.i.h.bf16 %v4361_v55  ;;  %v4362_v46 = vunpack.i.l.bf16 %v4361_v55 }
 0x1c5   :  { %v1340_v6 = vsel %vm1339_vm9, %v1323_v43, %v4357_v31  ;;  %v1341_v0 = vsel %vm1339_vm9, %v1324_v19, %v4358_v57 }
 0x1c6   :  { %v1357_v10 = vsel %vm1356_vm10, %v1340_v6, %v4362_v46  ;;  %v1358_v11 = vsel %vm1356_vm10, %v1341_v0, %v4363_v2 }
 0x1c7   :  { %v1374_v42 = vsel %vm1373_vm11, %v1357_v10, %v4372_v12  ;;  %v1375_v28 = vsel %vm1373_vm11, %v1358_v11, %v4373_v13 }
 0x1c8   :  { %4560 = vrot.lane.b32.xlu0 %v4559_v7, %s5290_s30 }
 0x1c9   :  { %v5962_v56 = vpop.permute.xlu2 %4440 }
 0x1ca   :  { %v5948_v44 = vpop.permute.xlu0 %4365  ;;  %v4376_v15 = vpop.permute.xlu1 %4375 }
 0x1cb   :  { %v4378_v16 = vunpack.i.h.bf16 %v4376_v15  ;;  %v4377_v18 = vunpack.i.l.bf16 %v4376_v15 }
 0x1cd   :  { %v1391_v34 = vsel %vm1390_vm12, %v1374_v42, %v4377_v18  ;;  %v1392_v39 = vsel %vm1390_vm12, %v1375_v28, %v4378_v16  ;;  %v4428_v18 = vunpack.i.h.bf16 %v4426_v48 }
 0x1ce   :  { %v1407_v40 = vsel %vm84_vm2, %v1391_v34, %v4382_v58  ;;  %v1408_v1 = vsel %vm84_vm2, %v1392_v39, %v4383_v22  ;;  %v4427_v22 = vunpack.i.l.bf16 %v4426_v48 }
 0x1cf   :  { %v1423_v9 = vpack.c.bf16 %v1408_v1, %v1407_v40  ;;  %v4438_v40 = vunpack.i.h.bf16 %v4436_v53  ;;  %v4437_v1 = vunpack.i.l.bf16 %v4436_v53 }
 0x1d0   :  { %4575 = vrot.lane.b32.xlu0 %v4584_v45, %s5293_s6 }
 0x1d1   :  { %4099 = vmatmul.msk.bf16.vlgmr.msrb.gmra.mxu3 %vm1455_vm13, %v1423_v9  ;;  %v4451_v58 = vpop.permute.xlu2 %4450 }
 0x1d2   :  { %v4386_v21 = vpop.permute.xlu0 %4385  ;;  %v4391_v51 = vpop.permute.xlu1 %4390 }
 0x1d3   :  { %v4388_v47 = vunpack.i.h.bf16 %v4386_v21  ;;  %v4387_v4 = vunpack.i.l.bf16 %v4386_v21  ;;  %v4393_v57 = vunpack.i.h.bf16 %v4391_v51  ;;  %v4392_v31 = vunpack.i.l.bf16 %v4391_v51 }
 0x1d5   :  { %v1292_v45 = vsel %vm532_vm4, %v5793_v49, %v4388_v47  ;;  %v1291_v43 = vsel %vm532_vm4, %v5782_v33, %v4387_v4 }
 0x1d6   :  { %v1309_v46 = vsel %vm1305_vm7, %v1292_v45, %v4393_v57  ;;  %v1308_v6 = vsel %vm1305_vm7, %v1291_v43, %v4392_v31  ;;  %v4453_v31 = vunpack.i.h.bf16 %v4451_v58  ;;  %v4452_v45 = vunpack.i.l.bf16 %v4451_v58 }
 0x1d7   :  { %v4332_v58 = vunpack.i.l.bf16 %v5908_v25 }
 0x1d9   :  { %v5987_v43 = vpop.permute.xlu2 %4465 }
 0x1da   :  { %v4396_v52 = vpop.permute.xlu0 %4395  ;;  %v4401_v20 = vpop.permute.xlu1 %4400 }
 0x1db   :  { %v4398_v19 = vunpack.i.h.bf16 %v4396_v52  ;;  %v4397_v2 = vunpack.i.l.bf16 %v4396_v52  ;;  %v4403_v0 = vunpack.i.h.bf16 %v4401_v20  ;;  %v4402_v7 = vunpack.i.l.bf16 %v4401_v20 }
 0x1dd   :  { %v1325_v10 = vsel %vm1322_vm8, %v1308_v6, %v4397_v2  ;;  %v1326_v11 = vsel %vm1322_vm8, %v1309_v46, %v4398_v19  ;;  %v4303_v19 = vunpack.i.h.bf16 %v5859_v50  ;;  %v4302_v2 = vunpack.i.l.bf16 %v5859_v50 }
 0x1de   :  { %v1342_v49 = vsel %vm1339_vm9, %v1325_v10, %v4402_v7  ;;  %v1343_v15 = vsel %vm1339_vm9, %v1326_v11, %v4403_v0  ;;  %v4328_v0 = vunpack.i.h.bf16 %v5870_v59  ;;  %v4327_v7 = vunpack.i.l.bf16 %v5870_v59 }
 0x1df   :  { %v1359_v42 = vsel %vm1356_vm10, %v1342_v49, %v4427_v22  ;;  %v1360_v28 = vsel %vm1356_vm10, %v1343_v15, %v4428_v18  ;;  %v1294_v10 = vsel %vm532_vm4, %v5750_v3, %v4453_v31  ;;  %v1293_v11 = vsel %vm532_vm4, %v5813_v41, %v4452_v45 }
 0x1e0   :  { %v4307_v49 = vunpack.i.l.bf16 %v5875_v61  ;;  %v4333_v3 = vunpack.i.h.bf16 %v5908_v25  ;;  %v4342_v41 = vunpack.i.l.bf16 %v5922_v29  ;;  %v4347_v25 = vunpack.i.l.bf16 %v5924_v30 }
 0x1e2   :  { %v5958_v35 = vpop.permute.xlu0 %4415  ;;  %v5960_v55 = vpop.permute.xlu1 %4405 }
 0x1e3   :  { %v4407_v45 = vunpack.i.l.bf16 %v5960_v55 }
 0x1ea   :  { %v4431_v13 = vpop.permute.xlu0 %4430  ;;  %v5972_v12 = vpop.permute.xlu1 %4420 }
 0x1eb   :  { %v4433_v33 = vunpack.i.h.bf16 %v4431_v13  ;;  %v4432_v16 = vunpack.i.l.bf16 %v4431_v13  ;;  %v4308_v13 = vunpack.i.h.bf16 %v5875_v61 }
 0x1ed   :  { %v1376_v34 = vsel %vm1373_vm11, %v1359_v42, %v4432_v16  ;;  %v1377_v39 = vsel %vm1373_vm11, %v1360_v28, %v4433_v33  ;;  %v4313_v33 = vunpack.i.h.bf16 %v5877_v63  ;;  %v4312_v16 = vunpack.i.l.bf16 %v5877_v63 }
 0x1ee   :  { %v1393_v52 = vsel %vm1390_vm12, %v1376_v34, %v4437_v1  ;;  %v1394_v20 = vsel %vm1390_vm12, %v1377_v39, %v4438_v40  ;;  %v4343_v42 = vunpack.i.h.bf16 %v5922_v29  ;;  %v4338_v39 = vunpack.i.h.bf16 %v5910_v26 }
 0x1ef   :  { %v4337_v40 = vunpack.i.l.bf16 %v5910_v26 }
 0x1f0   :  { %v1296_v31 = vsel %vm532_vm4, %v5767_v17, %v4343_v42 }
 0x1f2   :  { %v4446_v9 = vpop.permute.xlu0 %4445  ;;  %v5984_v4 = vpop.permute.xlu1 %4460 }
 0x1f3   :  { %v4448_v21 = vunpack.i.h.bf16 %v4446_v9  ;;  %v4447_v51 = vunpack.i.l.bf16 %v4446_v9 }
 0x1f5   :  { %v1409_v48 = vsel %vm84_vm2, %v1393_v52, %v4447_v51  ;;  %v1410_v47 = vsel %vm84_vm2, %v1394_v20, %v4448_v21  ;;  %v4348_v21 = vunpack.i.h.bf16 %v5924_v30  ;;  %v1295_v20 = vsel %vm532_vm4, %v5754_v5, %v4342_v41 }
 0x1f6   :  { %v1424_v57 = vpack.c.bf16 %v1410_v47, %v1409_v48  ;;  %v4367_v48 = vunpack.i.l.bf16 %v5948_v44  ;;  %v6026_v47 = vpop.permute.xlu2 %4470  ;;  %v4368_v30 = vunpack.i.h.bf16 %v5948_v44 }
 0x1f8   :  { %4100 = vmatmul.msk.bf16.gmra.mxu3 %vm1455_vm13, %v1424_v57 }
 0x1fa   :  { %v4456_v53 = vpop.permute.xlu0 %4455  ;;  %v6011_v28 = vpop.permute.xlu1 %4480 }
 0x1fb   :  { %v4458_v46 = vunpack.i.h.bf16 %v4456_v53  ;;  %v4457_v6 = vunpack.i.l.bf16 %v4456_v53 }
 0x1fd   :  { %v1311_v15 = vsel %vm1305_vm7, %v1294_v10, %v4458_v46  ;;  %v1310_v50 = vsel %vm1305_vm7, %v1293_v11, %v4457_v6  ;;  %v1313_v6 = vsel %vm1305_vm7, %v1296_v31, %v4348_v21  ;;  %v760_v21 = vld [vmem:[#allocation2 + $0x131] sm:$0xff] }
 0x1fe   :  { %v1328_v59 = vsel %vm1322_vm8, %v1311_v15, %v4303_v19  ;;  %v1327_v18 = vsel %vm1322_vm8, %v1310_v50, %v4302_v2  ;;  %v4408_v19 = vunpack.i.h.bf16 %v5960_v55  ;;  %v1312_v2 = vsel %vm1305_vm7, %v1295_v20, %v4347_v25 }
 0x1ff   :  { %v1345_v22 = vsel %vm1339_vm9, %v1328_v59, %v4308_v13  ;;  %v1344_v61 = vsel %vm1339_vm9, %v1327_v18, %v4307_v49  ;;  %v1330_v17 = vsel %vm1322_vm8, %v1313_v6, %v4368_v30  ;;  %v4417_v49 = vunpack.i.l.bf16 %v5958_v35  ;;  %v6056_v59 = vpop.permute.xlu2 %4485 }
 0x200   :  { %v1361_v63 = vsel %vm1356_vm10, %v1344_v61, %v4312_v16  ;;  %v1362_v34 = vsel %vm1356_vm10, %v1345_v22, %v4313_v33  ;;  %v1347_v55 = vsel %vm1339_vm9, %v1330_v17, %v4408_v19  ;;  %v4423_v50 = vunpack.i.h.bf16 %v5972_v12 }
 0x201   :  { %v1378_v1 = vsel %vm1373_vm11, %v1361_v63, %v4327_v7  ;;  %v1379_v9 = vsel %vm1373_vm11, %v1362_v34, %v4328_v0  ;;  %v4412_v0 = vunpack.i.l.bf16 %v5943_v8  ;;  %v4413_v7 = vunpack.i.h.bf16 %v5943_v8 }
 0x202   :  { %v483_v51 = vpop.permute.xlu0 %482  ;;  %v1395_v29 = vsel %vm1390_vm12, %v1378_v1, %v4332_v58  ;;  %v1396_v52 = vsel %vm1390_vm12, %v1379_v9, %v4333_v3  ;;  %v6046_v10 = vpop.permute.xlu1 %4495  ;;  %v4422_v33 = vunpack.i.l.bf16 %v5972_v12  ;;  %v4418_v16 = vunpack.i.h.bf16 %v5958_v35  ;;  %v744_v1 = vld [vmem:[#allocation2 + $0x130] sm:$0xff] }
 0x203   :  { %v515_v26 = vadd.f32 %v483_v51, %v5829_v23  ;;  %v1411_v57 = vsel %vm84_vm2, %v1395_v29, %v4337_v40  ;;  %v1412_v53 = vsel %vm84_vm2, %v1396_v52, %v4338_v39  ;;  %v1329_v23 = vsel %vm1322_vm8, %v1312_v2, %v4367_v48  ;;  %v776_v9 = vld [vmem:[#allocation2 + $0x132] sm:$0xff]  ;;  %v640_v52 = vld [vmem:[#allocation2 + $0xa0] sm:$0xff] }
 0x204   :  { %v1425_v46 = vpack.c.bf16 %v1412_v53, %v1411_v57  ;;  %v1346_v44 = vsel %vm1339_vm9, %v1329_v23, %v4407_v45  ;;  %v1364_v15 = vsel %vm1356_vm10, %v1347_v55, %v4413_v7  ;;  %v4443_v35 = vunpack.i.h.bf16 %v5962_v56 }
 0x205   :  { %v531_v5 = vmul.f32 0.18215, %v515_v26  ;;  %v1363_v13 = vsel %vm1356_vm10, %v1346_v44, %v4412_v0  ;;  %v1381_v42 = vsel %vm1373_vm11, %v1364_v15, %v4418_v16  ;;  %v4442_v34 = vunpack.i.l.bf16 %v5962_v56 }
 0x206   :  { %v1380_v41 = vsel %vm1373_vm11, %v1363_v13, %v4417_v49  ;;  %v1398_v12 = vsel %vm1390_vm12, %v1381_v42, %v4423_v50  ;;  %v4463_v25 = vunpack.i.h.bf16 %v5984_v4  ;;  %v4462_v56 = vunpack.i.l.bf16 %v5984_v4 }
 0x207   :  { %631 = vst.msk [vmem:[#allocation2 + $0x121] sm:$0xff] %vm532_vm4, %v531_v5  ;;  %v1397_v63 = vsel %vm1390_vm12, %v1380_v41, %v4422_v33  ;;  %v4511_v29 = vpop.permute.xlu2 %4510  ;;  %v4468_v30 = vunpack.i.h.bf16 %v5987_v43  ;;  %v4467_v45 = vunpack.i.l.bf16 %v5987_v43 }
 0x208   :  { %4101 = vmatmul.msk.bf16.gmra.mxu3 %vm1455_vm13, %v1425_v46  ;;  %v1298_v57 = vsel %vm532_vm4, %v5882_v24, %v4463_v25  ;;  %v1297_v31 = vsel %vm532_vm4, %v640_v52, %v4462_v56  ;;  %v4513_v7 = vunpack.i.h.bf16 %v4511_v29  ;;  %v4512_v43 = vunpack.i.l.bf16 %v4511_v29 }
 0x209   :  { %v1314_v5 = vsel %vm1305_vm7, %v1297_v31, %v4467_v45  ;;  %v1315_v2 = vsel %vm1305_vm7, %v1298_v57, %v4468_v30  ;;  %v4473_v52 = vunpack.i.h.bf16 %v6026_v47  ;;  %v4483_v45 = vunpack.i.h.bf16 %v6011_v28 }
 0x20a   :  { %v6048_v11 = vpop.permute.xlu0 %4475  ;;  %v4506_v40 = vpop.permute.xlu1 %4505 }
 0x20b   :  { %v4508_v23 = vunpack.i.h.bf16 %v4506_v40  ;;  %v4507_v17 = vunpack.i.l.bf16 %v4506_v40  ;;  %v4478_v57 = vunpack.i.h.bf16 %v6048_v11  ;;  %v4477_v31 = vunpack.i.l.bf16 %v6048_v11 }
 0x20e   :  { %v695_v18 = vld [vmem:[#allocation2 + $0x120] sm:$0xff] }
 0x20f   :  { %v727_v8 = vld [vmem:[#allocation2 + $0x122] sm:$0xff]  ;;  %v4589_v22 = vpack.i.bf16 %v695_v18, %v5914_v27  ;;  %v4604_v20 = vpack.i.bf16 %v744_v1, %v695_v18  ;;  %v4526_v44 = vpop.permute.xlu2 %4525 }
 0x210   :  { %v711_v3 = vld [vmem:[#allocation2 + $0x121] sm:$0xff]  ;;  %v4599_v61 = vpack.i.bf16 %v727_v8, %v5926_v37  ;;  %v1414_v37 = vsel %vm84_vm2, %v1398_v12, %v4443_v35  ;;  %v4614_v48 = vpack.i.bf16 %v776_v9, %v727_v8  ;;  %v5183_v8 = vld [vmem:[%s7417_s4] ss:$0 sm:$0xff]  ;;  %v4527_v41 = vunpack.i.l.bf16 %v4526_v44  ;;  %v131_v35 = vpop.f32.mrf.mxu3 }
 0x211   :  { %v4594_v58 = vpack.i.bf16 %v711_v3, %v5912_v60  ;;  %4590 = vrot.lane.b32.xlu0 %v4589_v22, %s5289_s27  ;;  %v1413_v60 = vsel %vm84_vm2, %v1397_v63, %v4442_v34  ;;  %v4609_v26 = vpack.i.bf16 %v760_v21, %v711_v3  ;;  %v4528_v3 = vunpack.i.h.bf16 %v4526_v44 }
 0x212   :  { %4600 = vrot.lane.b32.xlu2 %v4599_v61, %s5290_s30  ;;  %v6070_v39 = vpop.permute.xlu0 %4490  ;;  %v1426_v51 = vpack.c.bf16 %v1414_v37, %v1413_v60  ;;  %v4521_v46 = vpop.permute.xlu1 %4520  ;;  %v132_v37 = vadd.f32 %v5183_v8, %v131_v35 }
 0x213   :  { %4595 = vrot.lane.b32.xlu1 %v4594_v58, %s5288_s7  ;;  %v4523_v50 = vunpack.i.h.bf16 %v4521_v46  ;;  %v4522_v33 = vunpack.i.l.bf16 %v4521_v46 }
 0x214   :  { %v135_v1 = vpack.c.bf16 %v132_v37, %v132_v37 }
 0x216   :  { %v1928_v29 = vsel %vm1926_vm14, %v135_v1, 0 }
 0x217   :  { %v4531_v9 = vpop.permute.xlu2 %4530  ;;  %1937 = vmatpush.bf16.msrb.mxu2 %v1928_v29 }
 0x218   :  { %4102 = vmatmul.msk.bf16.gmra.mxu3 %vm1455_vm13, %v1426_v51  ;;  %v4533_v46 = vunpack.i.h.bf16 %v4531_v9 }
 0x219   :  { %4605 = vrot.lane.b32.xlu0 %v4604_v20, %s5291_s21  ;;  %v4472_v20 = vunpack.i.l.bf16 %v6026_v47 }
 0x21a   :  { %4615 = vrot.lane.b32.xlu2 %v4614_v48, %s5293_s6  ;;  %v4501_v4 = vpop.permute.xlu0 %4500  ;;  %v4546_v34 = vpop.permute.xlu1 %4545 }
 0x21b   :  { %4610 = vrot.lane.b32.xlu1 %v4609_v26, %s5294_s8  ;;  %v4503_v53 = vunpack.i.h.bf16 %v4501_v4  ;;  %v4502_v19 = vunpack.i.l.bf16 %v4501_v4  ;;  %v4548_v56 = vunpack.i.h.bf16 %v4546_v34  ;;  %v4547_v51 = vunpack.i.l.bf16 %v4546_v34 }
 0x21d   :  { %v1331_v6 = vsel %vm1322_vm8, %v1314_v5, %v4502_v19  ;;  %v1332_v24 = vsel %vm1322_vm8, %v1315_v2, %v4503_v53  ;;  %v4482_v53 = vunpack.i.l.bf16 %v6011_v28  ;;  %v133_v19 = vpop.f32.mrf.mxu3  ;;  %v4487_v5 = vunpack.i.l.bf16 %v6056_v59 }
 0x21e   :  { %v1348_v0 = vsel %vm1339_vm9, %v1331_v6, %v4507_v17  ;;  %v1349_v55 = vsel %vm1339_vm9, %v1332_v24, %v4508_v23  ;;  %v4532_v6 = vunpack.i.l.bf16 %v4531_v9  ;;  %v4493_v28 = vunpack.i.h.bf16 %v6070_v39  ;;  %v6162_v19 = vld [vmem:[%s7418_s10] ss:$0 sm:$0xff] }
 0x21f   :  { %v1365_v16 = vsel %vm1356_vm10, %v1348_v0, %v4512_v43  ;;  %v1366_v18 = vsel %vm1356_vm10, %v1349_v55, %v4513_v7  ;;  %v4492_v17 = vunpack.i.l.bf16 %v6070_v39  ;;  %v4259_v39 = vld [vmem:[%s7419_s11 + $0x8] sm:$0xff] }
 0x220   :  { %1591 = vmatpush.bf16.msra.mxu0 %v4259_v39 }
 0x222   :  { %v4516_v13 = vpop.permute.xlu0 %4515  ;;  %v4551_v44 = vpop.permute.xlu1 %4550 }
 0x223   :  { %v4518_v49 = vunpack.i.h.bf16 %v4516_v13  ;;  %v4517_v15 = vunpack.i.l.bf16 %v4516_v13  ;;  %v4498_v13 = vunpack.i.h.bf16 %v6046_v10 }
 0x225   :  { %v1382_v22 = vsel %vm1373_vm11, %v1365_v16, %v4517_v15  ;;  %v1383_v61 = vsel %vm1373_vm11, %v1366_v18, %v4518_v49  ;;  %v4497_v49 = vunpack.i.l.bf16 %v6046_v10  ;;  %v1302_v16 = vsel %vm532_vm4, %v5845_v54, %v4533_v46 }
 0x226   :  { %v1399_v58 = vsel %vm1390_vm12, %v1382_v22, %v4522_v33  ;;  %v1400_v42 = vsel %vm1390_vm12, %v1383_v61, %v4523_v50  ;;  %v4556_v33 = vpop.permute.xlu2 %4555  ;;  %v1301_v18 = vsel %vm532_vm4, %v5836_v36, %v4532_v6  ;;  %v4553_v22 = vunpack.i.h.bf16 %v4551_v44 }
 0x227   :  { %v1415_v63 = vsel %vm84_vm2, %v1399_v58, %v4527_v41  ;;  %v1416_v12 = vsel %vm84_vm2, %v1400_v42, %v4528_v3  ;;  %v4552_v61 = vunpack.i.l.bf16 %v4551_v44  ;;  %v4558_v36 = vunpack.i.h.bf16 %v4556_v33 }
 0x228   :  { %v1427_v60 = vpack.c.bf16 %v1416_v12, %v1415_v63  ;;  %v4557_v12 = vunpack.i.l.bf16 %v4556_v33 }
 0x22a   :  { %v4536_v40 = vpop.permute.xlu0 %4535  ;;  %4103 = vmatmul.msk.bf16.gmra.mxu3 %vm1455_vm13, %v1427_v60  ;;  %v4566_v60 = vpop.permute.xlu1 %4565 }
 0x22b   :  { %v4538_v21 = vunpack.i.h.bf16 %v4536_v40  ;;  %v4537_v25 = vunpack.i.l.bf16 %v4536_v40 }
 0x22d   :  { %v1300_v48 = vsel %vm532_vm4, %v5838_v32, %v4538_v21  ;;  %v1299_v26 = vsel %vm532_vm4, %v5884_v38, %v4537_v25  ;;  %v4488_v38 = vunpack.i.h.bf16 %v6056_v59  ;;  %v4258_v21 = vld [vmem:[%s7419_s11] sm:$0xff] }
 0x22e   :  { %v1316_v4 = vsel %vm1305_vm7, %v1299_v26, %v4547_v51  ;;  %v1317_v30 = vsel %vm1305_vm7, %v1300_v48, %v4548_v56  ;;  %v4571_v25 = vpop.permute.xlu2 %4570  ;;  %v4568_v56 = vunpack.i.h.bf16 %v4566_v60  ;;  %v4567_v51 = vunpack.i.l.bf16 %v4566_v60  ;;  %1592 = vmatpush.bf16.msra.mxu0 %v4258_v21 }
 0x22f   :  { %v1333_v47 = vsel %vm1322_vm8, %v1316_v4, %v4472_v20  ;;  %v1334_v32 = vsel %vm1322_vm8, %v1317_v30, %v4473_v52  ;;  %v4573_v20 = vunpack.i.h.bf16 %v4571_v25  ;;  %v4572_v48 = vunpack.i.l.bf16 %v4571_v25 }
 0x230   :  { %v1350_v2 = vsel %vm1339_vm9, %v1333_v47, %v4477_v31  ;;  %v1351_v11 = vsel %vm1339_vm9, %v1334_v32, %v4478_v57 }
 0x231   :  { %v1367_v24 = vsel %vm1356_vm10, %v1350_v2, %v4482_v53  ;;  %v1368_v23 = vsel %vm1356_vm10, %v1351_v11, %v4483_v45 }
 0x232   :  { %v4541_v0 = vpop.permute.xlu0 %4540  ;;  %v1384_v55 = vsel %vm1373_vm11, %v1367_v24, %v4487_v5  ;;  %v1385_v59 = vsel %vm1373_vm11, %v1368_v23, %v4488_v38  ;;  %v4581_v6 = vpop.permute.xlu1 %4580 }
 0x233   :  { %v4543_v7 = vunpack.i.h.bf16 %v4541_v0  ;;  %v4542_v43 = vunpack.i.l.bf16 %v4541_v0  ;;  %v1401_v15 = vsel %vm1390_vm12, %v1384_v55, %v4492_v17  ;;  %v1402_v50 = vsel %vm1390_vm12, %v1385_v59, %v4493_v28 }
 0x234   :  { %v1417_v8 = vsel %vm84_vm2, %v1401_v15, %v4497_v49  ;;  %v1418_v3 = vsel %vm84_vm2, %v1402_v50, %v4498_v13  ;;  %v4582_v23 = vunpack.i.l.bf16 %v4581_v6  ;;  %v4583_v28 = vunpack.i.h.bf16 %v4581_v6 }
 0x235   :  { %v1318_v10 = vsel %vm1305_vm7, %v1301_v18, %v4542_v43  ;;  %v1319_v41 = vsel %vm1305_vm7, %v1302_v16, %v4543_v7  ;;  %v1428_v58 = vpack.c.bf16 %v1418_v3, %v1417_v8 }
 0x236   :  { %v1335_v42 = vsel %vm1322_vm8, %v1318_v10, %v4552_v61  ;;  %v1336_v63 = vsel %vm1322_vm8, %v1319_v41, %v4553_v22  ;;  %v4586_v46 = vpop.permute.xlu2 %4585  ;;  %v1303_v44 = vsel %vm532_vm4, %v5896_v62, %v4582_v23  ;;  %v1304_v59 = vsel %vm532_vm4, %v5914_v27, %v4583_v28 }
 0x237   :  { %v1352_v37 = vsel %vm1339_vm9, %v1335_v42, %v4557_v12  ;;  %v1353_v40 = vsel %vm1339_vm9, %v1336_v63, %v4558_v36  ;;  %v4588_v0 = vunpack.i.h.bf16 %v4586_v46  ;;  %v4587_v55 = vunpack.i.l.bf16 %v4586_v46 }
 0x239   :  { %v1320_v39 = vsel %vm1305_vm7, %v1303_v44, %v4587_v55  ;;  %v1321_v62 = vsel %vm1305_vm7, %v1304_v59, %v4588_v0 }
 0x23a   :  { %v4561_v54 = vpop.permute.xlu0 %4560  ;;  %4104 = vmatmul.msk.bf16.gmra.mxu3 %vm1455_vm13, %v1428_v58 }
 0x23b   :  { %v4563_v35 = vunpack.i.h.bf16 %v4561_v54  ;;  %v4562_v34 = vunpack.i.l.bf16 %v4561_v54 }
 0x23d   :  { %v1369_v1 = vsel %vm1356_vm10, %v1352_v37, %v4562_v34  ;;  %v1370_v9 = vsel %vm1356_vm10, %v1353_v40, %v4563_v35 }
 0x23e   :  { %v1386_v29 = vsel %vm1373_vm11, %v1369_v1, %v4567_v51  ;;  %v1387_v52 = vsel %vm1373_vm11, %v1370_v9, %v4568_v56 }
 0x23f   :  { %v1403_v4 = vsel %vm1390_vm12, %v1386_v29, %v4572_v48  ;;  %v1404_v30 = vsel %vm1390_vm12, %v1387_v52, %v4573_v20 }
 0x242   :  { %v4576_v26 = vpop.permute.xlu0 %4575 }
 0x243   :  { %v4578_v57 = vunpack.i.h.bf16 %v4576_v26  ;;  %v4577_v31 = vunpack.i.l.bf16 %v4576_v26 }
 0x245   :  { %v1419_v45 = vsel %vm84_vm2, %v1403_v4, %v4577_v31  ;;  %v1420_v53 = vsel %vm84_vm2, %v1404_v30, %v4578_v57 }
 0x246   :  { %v1429_v47 = vpack.c.bf16 %v1420_v53, %v1419_v45 }
 0x24a   :  { %4105 = vmatmul.msk.bf16.gmra.mxu3 %vm1455_vm13, %v1429_v47 }
 0x254   :  { %v1493_v32 = vpop.f32.mrf.mxu3 }
 0x255   :  { %v6165_v5 = vadd.f32 %v6162_v19, %v1493_v32 }
 0x25c   :  { %v1495_v38 = vpop.f32.mrf.mxu3 }
 0x25d   :  { %v6168_v2 = vadd.f32 %v6162_v19, %v1495_v38 }
 0x25f   :  { %v1533_v11 = vpack.c.bf16 %v6168_v2, %v6165_v5 }
 0x261   :  { %4115 = vmatmul.msk.bf16.vlgmr.msra.gmra.mxu0 %vm84_vm2, %v1533_v11 }
 0x26c   :  { %v4601_v17 = vpop.permute.xlu2 %4600 }
 0x26d   :  { %v4603_v61 = vunpack.i.h.bf16 %v4601_v17  ;;  %v4602_v58 = vunpack.i.l.bf16 %v4601_v17 }
 0x274   :  { %v4616_v10 = vpop.permute.xlu2 %4615 }
 0x275   :  { %v4618_v40 = vunpack.i.h.bf16 %v4616_v10  ;;  %v4617_v1 = vunpack.i.l.bf16 %v4616_v10 }
 0x27b   :  { %v1498_v24 = vpop.f32.mrf.mxu3 }
 0x27c   :  { %v6178_v13 = vadd.f32 %v6162_v19, %v1498_v24 }
 0x283   :  { %v4591_v7 = vpop.permute.xlu0 %4590  ;;  %v1500_v43 = vpop.f32.mrf.mxu3 }
 0x284   :  { %v4593_v49 = vunpack.i.h.bf16 %v4591_v7  ;;  %v4592_v15 = vunpack.i.l.bf16 %v4591_v7  ;;  %v6181_v33 = vadd.f32 %v6162_v19, %v1500_v43 }
 0x285   :  { %v4596_v50 = vpop.permute.xlu1 %4595 }
 0x286   :  { %v4598_v16 = vunpack.i.h.bf16 %v4596_v50  ;;  %v4597_v18 = vunpack.i.l.bf16 %v4596_v50  ;;  %v1534_v27 = vpack.c.bf16 %v6181_v33, %v6178_v13  ;;  %v1337_v8 = vsel %vm1322_vm8, %v1320_v39, %v4592_v15 }
 0x287   :  { %v1338_v3 = vsel %vm1322_vm8, %v1321_v62, %v4593_v49  ;;  %v6249_v49 = vld [vmem:[%s7420_s12] ss:$0 sm:$0xff] }
 0x288   :  { %4116 = vmatmul.msk.bf16.gmra.mxu0 %vm84_vm2, %v1534_v27  ;;  %v1354_v41 = vsel %vm1339_vm9, %v1337_v8, %v4597_v18  ;;  %v1355_v22 = vsel %vm1339_vm9, %v1338_v3, %v4598_v16 }
 0x289   :  { %v1371_v35 = vsel %vm1356_vm10, %v1354_v41, %v4602_v58  ;;  %v1372_v34 = vsel %vm1356_vm10, %v1355_v22, %v4603_v61 }
 0x28b   :  { %v4606_v42 = vpop.permute.xlu0 %4605  ;;  %v1503_v63 = vpop.f32.mrf.mxu3 }
 0x28c   :  { %v4608_v54 = vunpack.i.h.bf16 %v4606_v42  ;;  %v4607_v36 = vunpack.i.l.bf16 %v4606_v42  ;;  %v6202_v48 = vadd.f32 %v6162_v19, %v1503_v63 }
 0x28d   :  { %v4611_v12 = vpop.permute.xlu1 %4610 }
 0x28e   :  { %v4613_v60 = vunpack.i.h.bf16 %v4611_v12  ;;  %v4612_v37 = vunpack.i.l.bf16 %v4611_v12  ;;  %v1388_v9 = vsel %vm1373_vm11, %v1371_v35, %v4607_v36  ;;  %v1389_v21 = vsel %vm1373_vm11, %v1372_v34, %v4608_v54 }
 0x290   :  { %v1405_v25 = vsel %vm1390_vm12, %v1388_v9, %v4612_v37  ;;  %v1406_v56 = vsel %vm1390_vm12, %v1389_v21, %v4613_v60 }
 0x291   :  { %v1421_v51 = vsel %vm84_vm2, %v1405_v25, %v4617_v1  ;;  %v1422_v29 = vsel %vm84_vm2, %v1406_v56, %v4618_v40 }
 0x292   :  { %v1430_v52 = vpack.c.bf16 %v1422_v29, %v1421_v51 }
 0x293   :  { %v1505_v20 = vpop.f32.mrf.mxu3 }
 0x294   :  { %4106 = vmatmul.msk.bf16.gmra.mxu3 %vm1455_vm13, %v1430_v52  ;;  %v6205_v26 = vadd.f32 %v6162_v19, %v1505_v20 }
 0x296   :  { %v1535_v57 = vpack.c.bf16 %v6205_v26, %v6202_v48 }
 0x298   :  { %4117 = vmatmul.msk.bf16.gmra.mxu0 %vm84_vm2, %v1535_v57 }
 0x29b   :  { %v1508_v31 = vpop.f32.mrf.mxu3 }
 0x29c   :  { %v6211_v30 = vadd.f32 %v6162_v19, %v1508_v31 }
 0x2a3   :  { %v1510_v4 = vpop.f32.mrf.mxu3 }
 0x2a4   :  { %v6214_v45 = vadd.f32 %v6162_v19, %v1510_v4 }
 0x2a6   :  { %v1536_v53 = vpack.c.bf16 %v6214_v45, %v6211_v30 }
 0x2a8   :  { %4118 = vmatmul.msk.bf16.gmra.mxu0 %vm84_vm2, %v1536_v53 }
 0x2ad   :  { %v1513_v47 = vpop.f32.mrf.mxu3 }
 0x2ae   :  { %v6220_v38 = vadd.f32 %v6162_v19, %v1513_v47 }
 0x2b5   :  { %v1515_v32 = vpop.f32.mrf.mxu3 }
 0x2b6   :  { %v6223_v11 = vadd.f32 %v6162_v19, %v1515_v32 }
 0x2b8   :  { %v1537_v46 = vpack.c.bf16 %v6223_v11, %v6220_v38 }
 0x2ba   :  { %4119 = vmatmul.msk.bf16.gmra.mxu0 %vm84_vm2, %v1537_v46 }
 0x2bd   :  { %v1518_v6 = vpop.f32.mrf.mxu3 }
 0x2be   :  { %v6229_v23 = vadd.f32 %v6162_v19, %v1518_v6 }
 0x2c5   :  { %v1520_v24 = vpop.f32.mrf.mxu3 }
 0x2c6   :  { %v6232_v28 = vadd.f32 %v6162_v19, %v1520_v24 }
 0x2c8   :  { %v1538_v17 = vpack.c.bf16 %v6232_v28, %v6229_v23 }
 0x2ca   :  { %4120 = vmatmul.msk.bf16.gmra.mxu0 %vm84_vm2, %v1538_v17 }
 0x2cd   :  { %v1523_v44 = vpop.f32.mrf.mxu3 }
 0x2ce   :  { %v6238_v55 = vadd.f32 %v6162_v19, %v1523_v44 }
 0x2d5   :  { %v1525_v0 = vpop.f32.mrf.mxu3 }
 0x2d6   :  { %v6241_v59 = vadd.f32 %v6162_v19, %v1525_v0 }
 0x2d8   :  { %v1539_v7 = vpack.c.bf16 %v6241_v59, %v6238_v55 }
 0x2da   :  { %4121 = vmatmul.msk.bf16.gmra.mxu0 %vm84_vm2, %v1539_v7 }
 0x2de   :  { %v1594_v43 = vpop.f32.mrf.mxu0 }
 0x2df   :  { %v1595_v50 = vadd.f32 %v6249_v49, %v1594_v43 }
 0x2e6   :  { %v1596_v15 = vpop.f32.mrf.mxu0 }
 0x2e7   :  { %v1597_v39 = vadd.f32 %v6249_v49, %v1596_v15 }
 0x2e9   :  { %v1634_v62 = vpack.c.bf16 %v1597_v39, %v1595_v50 }
 0x2eb   :  { %4123 = vmatmul.msk.bf16.vlgmr.msrb.gmra.mxu1 %vm84_vm2, %v1634_v62 }
 0x305   :  { %v1599_v16 = vpop.f32.mrf.mxu0 }
 0x306   :  { %v1600_v27 = vadd.f32 %v6249_v49, %v1599_v16 }
 0x30d   :  { %v1601_v18 = vpop.f32.mrf.mxu0 }
 0x30e   :  { %v1602_v8 = vadd.f32 %v6249_v49, %v1601_v18 }
 0x310   :  { %v1635_v3 = vpack.c.bf16 %v1602_v8, %v1600_v27 }
 0x312   :  { %4124 = vmatmul.msk.bf16.gmra.mxu1 %vm84_vm2, %v1635_v3 }
 0x315   :  { %v1604_v10 = vpop.f32.mrf.mxu0 }
 0x316   :  { %v1605_v61 = vadd.f32 %v6249_v49, %v1604_v10 }
 0x317   :  { %v1528_v41 = vpop.f32.mrf.mxu3 }
 0x318   :  { %v6260_v63 = vadd.f32 %v6162_v19, %v1528_v41 }
 0x31d   :  { %v1606_v22 = vpop.f32.mrf.mxu0 }
 0x31e   :  { %v1607_v58 = vadd.f32 %v6249_v49, %v1606_v22 }
 0x31f   :  { %v1530_v42 = vpop.f32.mrf.mxu3 }
 0x320   :  { %v6263_v54 = vadd.f32 %v6162_v19, %v1530_v42  ;;  %v1636_v36 = vpack.c.bf16 %v1607_v58, %v1605_v61 }
 0x322   :  { %v1540_v12 = vpack.c.bf16 %v6263_v54, %v6260_v63  ;;  %4125 = vmatmul.msk.bf16.gmra.mxu1 %vm84_vm2, %v1636_v36 }
 0x324   :  { %4122 = vmatmul.msk.bf16.gmra.mxu0 %vm84_vm2, %v1540_v12 }
 0x325   :  { %v1609_v35 = vpop.f32.mrf.mxu0 }
 0x326   :  { %v1610_v60 = vadd.f32 %v6249_v49, %v1609_v35 }
 0x32d   :  { %v1611_v34 = vpop.f32.mrf.mxu0 }
 0x32e   :  { %v1612_v37 = vadd.f32 %v6249_v49, %v1611_v34 }
 0x330   :  { %v1637_v40 = vpack.c.bf16 %v1612_v37, %v1610_v60 }
 0x332   :  { %4126 = vmatmul.msk.bf16.gmra.mxu1 %vm84_vm2, %v1637_v40 }
 0x337   :  { %v1614_v1 = vpop.f32.mrf.mxu0 }
 0x338   :  { %v1615_v9 = vadd.f32 %v6249_v49, %v1614_v1 }
 0x33f   :  { %v1616_v19 = vpop.f32.mrf.mxu0 }
 0x340   :  { %v1617_v21 = vadd.f32 %v6249_v49, %v1616_v19 }
 0x342   :  { %v1638_v25 = vpack.c.bf16 %v1617_v21, %v1615_v9 }
 0x344   :  { %4127 = vmatmul.msk.bf16.gmra.mxu1 %vm84_vm2, %v1638_v25 }
 0x347   :  { %v1619_v56 = vpop.f32.mrf.mxu0 }
 0x348   :  { %v1620_v29 = vadd.f32 %v6249_v49, %v1619_v56 }
 0x34f   :  { %v1621_v51 = vpop.f32.mrf.mxu0 }
 0x350   :  { %v1622_v52 = vadd.f32 %v6249_v49, %v1621_v51 }
 0x352   :  { %v1639_v20 = vpack.c.bf16 %v1622_v52, %v1620_v29 }
 0x354   :  { %4128 = vmatmul.msk.bf16.gmra.mxu1 %vm84_vm2, %v1639_v20 }
 0x357   :  { %v1624_v57 = vpop.f32.mrf.mxu0 }
 0x358   :  { %v1625_v4 = vadd.f32 %v6249_v49, %v1624_v57 }
 0x35f   :  { %v1626_v31 = vpop.f32.mrf.mxu0 }
 0x360   :  { %v1627_v53 = vadd.f32 %v6249_v49, %v1626_v31 }
 0x362   :  { %v1640_v47 = vpack.c.bf16 %v1627_v53, %v1625_v4 }
 0x364   :  { %4129 = vmatmul.msk.bf16.gmra.mxu1 %vm84_vm2, %v1640_v47 }
 0x368   :  { %v1678_v32 = vpop.f32.mrf.mxu1 }
 0x369   :  { %v1718_v46 = vsel %vm1305_vm7, %v1678_v32, -inf }
 0x36a   :  { %1719 = vmax.xlane.f32.xlu0 %v1718_v46 }
 0x370   :  { %v1680_v6 = vpop.f32.mrf.mxu1 }
 0x371   :  { %v1721_v24 = vsel %vm1305_vm7, %v1680_v6, -inf }
 0x372   :  { %1722 = vmax.xlane.f32.xlu1 %v1721_v24 }
 0x38f   :  { %v1683_v17 = vpop.f32.mrf.mxu1 }
 0x390   :  { %v1724_v44 = vsel %vm1305_vm7, %v1683_v17, -inf }
 0x391   :  { %1725 = vmax.xlane.f32.xlu2 %v1724_v44 }
 0x397   :  { %v1685_v0 = vpop.f32.mrf.mxu1 }
 0x398   :  { %v1727_v7 = vsel %vm1305_vm7, %v1685_v0, -inf }
 0x399   :  { %1728 = vmax.xlane.f32.xlu2 %v1727_v7 }
 0x39f   :  { %v1688_v43 = vpop.f32.mrf.mxu1 }
 0x3a0   :  { %v1730_v50 = vsel %vm1305_vm7, %v1688_v43, -inf }
 0x3a1   :  { %v1629_v15 = vpop.f32.mrf.mxu0  ;;  %1731 = vmax.xlane.f32.xlu0 %v1730_v50 }
 0x3a2   :  { %v1630_v18 = vadd.f32 %v6249_v49, %v1629_v15 }
 0x3a7   :  { %v1690_v39 = vpop.f32.mrf.mxu1 }
 0x3a8   :  { %v1733_v16 = vsel %vm1305_vm7, %v1690_v39, -inf }
 0x3a9   :  { %v1631_v62 = vpop.f32.mrf.mxu0  ;;  %1734 = vmax.xlane.f32.xlu1 %v1733_v16 }
 0x3aa   :  { %v1632_v27 = vadd.f32 %v6249_v49, %v1631_v62 }
 0x3ac   :  { %v1641_v8 = vpack.c.bf16 %v1632_v27, %v1630_v18 }
 0x3ae   :  { %4130 = vmatmul.msk.bf16.gmra.mxu1 %vm84_vm2, %v1641_v8 }
 0x3af   :  { %v6290_v3 = vpop.f32.mrf.mxu1 }
 0x3b0   :  { %v1736_v10 = vsel %vm1305_vm7, %v6290_v3, -inf }
 0x3b1   :  { %1737 = vmax.xlane.f32.xlu2 %v1736_v10 }
 0x3b7   :  { %v6294_v41 = vpop.f32.mrf.mxu1 }
 0x3b8   :  { %v1739_v22 = vsel %vm1305_vm7, %v6294_v41, -inf }
 0x3b9   :  { %1740 = vmax.xlane.f32.xlu0 %v1739_v22 }
 0x3c1   :  { %v6298_v61 = vpop.f32.mrf.mxu1 }
 0x3c2   :  { %v1742_v49 = vsel %vm1305_vm7, %v6298_v61, -inf }
 0x3c3   :  { %1743 = vmax.xlane.f32.xlu0 %v1742_v49 }
 0x3c9   :  { %v6306_v40 = vpop.f32.mrf.mxu1 }
 0x3ca   :  { %v1745_v9 = vsel %vm1305_vm7, %v6306_v40, -inf }
 0x3d1   :  { %v6314_v21 = vpop.f32.mrf.mxu1 }
 0x3d2   :  { %v1748_v25 = vsel %vm1305_vm7, %v6314_v21, -inf }
 0x3d9   :  { %v6320_v31 = vpop.f32.mrf.mxu1 }
 0x3dd   :  { %v1720_v58 = vpop.xlane.xlu0 %1719 }
 0x3de   :  { %v1766_v42 = vsub.f32 %v1678_v32, %v1720_v58 }
 0x3e0   :  { %v1782_v36 = vmul.f32 1.442695, %v1766_v42 }
 0x3e1   :  { %v6330_v44 = vpop.f32.mrf.mxu1 }
 0x3e2   :  { %5220 = vpow2.f32 %v1782_v36  ;;  %v1754_v62 = vsel %vm1305_vm7, %v6330_v44, -inf }
 0x3e5   :  { %v1723_v12 = vpop.xlane.xlu1 %1722 }
 0x3e6   :  { %v1767_v35 = vsub.f32 %v1680_v6, %v1723_v12 }
 0x3e8   :  { %v6302_v34 = vpop.eup %5220  ;;  %v1784_v60 = vmul.f32 1.442695, %v1767_v35 }
 0x3e9   :  { %v1814_v37 = vsel %vm1305_vm7, %v6302_v34, 0.0  ;;  %v6338_v16 = vpop.f32.mrf.mxu1 }
 0x3ea   :  { %5222 = vpow2.f32 %v1784_v60  ;;  %1815 = vadd.xlane.f32.xlu1 %v1814_v37  ;;  %v1757_v22 = vsel %vm1305_vm7, %v6338_v16, -inf }
 0x3f0   :  { %v6308_v1 = vpop.eup %5222 }
 0x3f1   :  { %v1817_v19 = vsel %vm1305_vm7, %v6308_v1, 0.0 }
 0x3f2   :  { %1818 = vadd.xlane.f32.xlu2 %v1817_v19  ;;  %1746 = vmax.xlane.f32.xlu1 %v1745_v9 }
 0x3fa   :  { %1749 = vmax.xlane.f32.xlu1 %v1748_v25 }
 0x404   :  { %v1726_v56 = vpop.xlane.xlu2 %1725 }
 0x405   :  { %v1768_v51 = vsub.f32 %v1683_v17, %v1726_v56  ;;  %v1751_v17 = vsel %vm1305_vm7, %v6320_v31, -inf }
 0x407   :  { %v1786_v29 = vmul.f32 1.442695, %v1768_v51 }
 0x409   :  { %5224 = vpow2.f32 %v1786_v29 }
 0x40c   :  { %v1729_v52 = vpop.xlane.xlu2 %1728 }
 0x40d   :  { %v1769_v20 = vsub.f32 %v1685_v0, %v1729_v52 }
 0x40f   :  { %v6318_v57 = vpop.eup %5224  ;;  %v1788_v4 = vmul.f32 1.442695, %v1769_v20 }
 0x410   :  { %v1820_v53 = vsel %vm1305_vm7, %v6318_v57, 0.0 }
 0x411   :  { %5226 = vpow2.f32 %v1788_v4  ;;  %1821 = vadd.xlane.f32.xlu2 %v1820_v53 }
 0x414   :  { %v1732_v47 = vpop.xlane.xlu0 %1731 }
 0x415   :  { %v1770_v32 = vsub.f32 %v1688_v43, %v1732_v47 }
 0x417   :  { %v6324_v46 = vpop.eup %5226  ;;  %v1790_v6 = vmul.f32 1.442695, %v1770_v32 }
 0x418   :  { %v1823_v24 = vsel %vm1305_vm7, %v6324_v46, 0.0 }
 0x419   :  { %5228 = vpow2.f32 %v1790_v6  ;;  %1824 = vadd.xlane.f32.xlu0 %v1823_v24  ;;  %1752 = vmax.xlane.f32.xlu2 %v1751_v17 }
 0x41c   :  { %v1735_v0 = vpop.xlane.xlu1 %1734 }
 0x41d   :  { %v1771_v7 = vsub.f32 %v1690_v39, %v1735_v0 }
 0x41f   :  { %v6332_v15 = vpop.eup %5228  ;;  %v1792_v50 = vmul.f32 1.442695, %v1771_v7 }
 0x420   :  { %v1826_v43 = vsel %vm1305_vm7, %v6332_v15, 0.0 }
 0x421   :  { %5230 = vpow2.f32 %v1792_v50  ;;  %1827 = vadd.xlane.f32.xlu0 %v1826_v43  ;;  %1755 = vmax.xlane.f32.xlu2 %v1754_v62 }
 0x424   :  { %v1738_v18 = vpop.xlane.xlu2 %1737 }
 0x425   :  { %v1772_v27 = vsub.f32 %v6290_v3, %v1738_v18 }
 0x427   :  { %v6341_v8 = vpop.eup %5230  ;;  %v1794_v39 = vmul.f32 1.442695, %v1772_v27 }
 0x428   :  { %v1829_v10 = vsel %vm1305_vm7, %v6341_v8, 0.0 }
 0x429   :  { %5232 = vpow2.f32 %v1794_v39  ;;  %1830 = vadd.xlane.f32.xlu1 %v1829_v10  ;;  %1758 = vmax.xlane.f32.xlu0 %v1757_v22 }
 0x42b   :  { %v6347_v49 = vpop.f32.mrf.mxu1 }
 0x42c   :  { %v1741_v58 = vpop.xlane.xlu0 %1740  ;;  %v1760_v35 = vsel %vm1305_vm7, %v6347_v49, -inf }
 0x42d   :  { %v1773_v42 = vsub.f32 %v6294_v41, %v1741_v58 }
 0x42f   :  { %v6350_v36 = vpop.eup %5232  ;;  %v1796_v3 = vmul.f32 1.442695, %v1773_v42 }
 0x430   :  { %v1832_v12 = vsel %vm1305_vm7, %v6350_v36, 0.0 }
 0x431   :  { %5234 = vpow2.f32 %v1796_v3  ;;  %1833 = vadd.xlane.f32.xlu1 %v1832_v12  ;;  %1761 = vmax.xlane.f32.xlu0 %v1760_v35 }
 0x433   :  { %v6356_v60 = vpop.f32.mrf.mxu1 }
 0x434   :  { %v1763_v25 = vsel %vm1305_vm7, %v6356_v60, -inf }
 0x436   :  { %v1744_v37 = vpop.xlane.xlu0 %1743 }
 0x437   :  { %v6358_v19 = vpop.eup %5234  ;;  %v1774_v9 = vsub.f32 %v6298_v61, %v1744_v37 }
 0x438   :  { %v1835_v41 = vsel %vm1305_vm7, %v6358_v19, 0.0 }
 0x439   :  { %v1798_v56 = vmul.f32 1.442695, %v1774_v9  ;;  %1836 = vadd.xlane.f32.xlu2 %v1835_v41  ;;  %1764 = vmax.xlane.f32.xlu1 %v1763_v25 }
 0x43b   :  { %5236 = vpow2.f32 %v1798_v56 }
 0x441   :  { %v6365_v51 = vpop.eup %5236 }
 0x442   :  { %v1838_v29 = vsel %vm1305_vm7, %v6365_v51, 0.0 }
 0x443   :  { %1839 = vadd.xlane.f32.xlu2 %v1838_v29 }
 0x45d   :  { %v1816_v52 = vpop.xlane.xlu1 %1815 }
 0x45e   :  { %5238 = vrcp.f32 %v1816_v52 }
 0x464   :  { %v5239_v47 = vpop.eup %5238 }
 0x465   :  { %v1819_v20 = vpop.xlane.xlu2 %1818  ;;  %v1747_v61 = vpop.xlane.xlu1 %1746  ;;  %v1878_v6 = vmul.f32 %v5239_v47, %v6302_v34 }
 0x466   :  { %5240 = vrcp.f32 %v1819_v20  ;;  %v1775_v4 = vsub.f32 %v6306_v40, %v1747_v61 }
 0x468   :  { %v1800_v53 = vmul.f32 1.442695, %v1775_v4 }
 0x46a   :  { %5242 = vpow2.f32 %v1800_v53 }
 0x46c   :  { %v5241_v32 = vpop.eup %5240 }
 0x46d   :  { %v1879_v24 = vmul.f32 %v5241_v32, %v6308_v1  ;;  %v1750_v17 = vpop.xlane.xlu1 %1749 }
 0x46e   :  { %v1776_v0 = vsub.f32 %v6314_v21, %v1750_v17 }
 0x46f   :  { %v1894_v7 = vpack.c.bf16 %v1879_v24, %v1878_v6 }
 0x470   :  { %v6373_v50 = vpop.eup %5242  ;;  %v1802_v43 = vmul.f32 1.442695, %v1776_v0 }
 0x471   :  { %4131 = vmatmul.msk.bf16.vlgmr.msrb.gmra.mxu2 %vm1305_vm7, %v1894_v7  ;;  %v1841_v40 = vsel %vm1305_vm7, %v6373_v50, 0.0 }
 0x472   :  { %5244 = vpow2.f32 %v1802_v43  ;;  %1842 = vadd.xlane.f32.xlu0 %v1841_v40 }
 0x478   :  { %v6378_v62 = vpop.eup %5244 }
 0x479   :  { %v1844_v34 = vsel %vm1305_vm7, %v6378_v62, 0.0 }
 0x47a   :  { %1845 = vadd.xlane.f32.xlu1 %v1844_v34 }
 0x484   :  { %v1822_v1 = vpop.xlane.xlu2 %1821 }
 0x485   :  { %5246 = vrcp.f32 %v1822_v1 }
 0x48b   :  { %v5247_v10 = vpop.eup %5246 }
 0x48c   :  { %v1825_v21 = vpop.xlane.xlu0 %1824  ;;  %v1753_v18 = vpop.xlane.xlu2 %1752  ;;  %v1880_v3 = vmul.f32 %v5247_v10, %v6318_v57  ;;  %v4260_v10 = vld [vmem:[%s7421_s13] sm:$0xff] }
 0x48d   :  { %5248 = vrcp.f32 %v1825_v21  ;;  %v1777_v27 = vsub.f32 %v6320_v31, %v1753_v18 }
 0x48f   :  { %v1804_v39 = vmul.f32 1.442695, %v1777_v27 }
 0x491   :  { %5250 = vpow2.f32 %v1804_v39  ;;  %v4261_v39 = vld [vmem:[%s7421_s13 + $0x8] sm:$0xff] }
 0x492   :  { %2037 = vmatpush.bf16.msra.mxu3 %v4261_v39 }
 0x493   :  { %v5249_v22 = vpop.eup %5248 }
 0x494   :  { %v1828_v58 = vpop.xlane.xlu0 %1827  ;;  %v1756_v42 = vpop.xlane.xlu2 %1755  ;;  %v1881_v12 = vmul.f32 %v5249_v22, %v6324_v46 }
 0x495   :  { %v1778_v35 = vsub.f32 %v6330_v44, %v1756_v42 }
 0x496   :  { %v1895_v37 = vpack.c.bf16 %v1881_v12, %v1880_v3  ;;  %2038 = vmatpush.bf16.msra.mxu3 %v4260_v10 }
 0x497   :  { %v6386_v9 = vpop.eup %5250  ;;  %v1806_v41 = vmul.f32 1.442695, %v1778_v35 }
 0x498   :  { %4132 = vmatmul.msk.bf16.gmra.mxu2 %vm1305_vm7, %v1895_v37  ;;  %v1847_v31 = vsel %vm1305_vm7, %v6386_v9, 0.0 }
 0x499   :  { %5252 = vpow2.f32 %v1806_v41  ;;  %1848 = vadd.xlane.f32.xlu2 %v1847_v31 }
 0x49a   :  { %5254 = vrcp.f32 %v1828_v58 }
 0x49c   :  { %v1831_v25 = vpop.xlane.xlu1 %1830  ;;  %v1759_v56 = vpop.xlane.xlu0 %1758 }
 0x49d   :  { %5256 = vrcp.f32 %v1831_v25  ;;  %v1779_v57 = vsub.f32 %v6338_v16, %v1759_v56 }
 0x49f   :  { %v6392_v46 = vpop.eup %5252  ;;  %v1808_v44 = vmul.f32 1.442695, %v1779_v57 }
 0x4a0   :  { %v1850_v29 = vsel %vm1305_vm7, %v6392_v46, 0.0  ;;  %v5255_v52 = vpop.eup %5254 }
 0x4a1   :  { %5258 = vpow2.f32 %v1808_v44  ;;  %1851 = vadd.xlane.f32.xlu0 %v1850_v29  ;;  %v1882_v53 = vmul.f32 %v5255_v52, %v6332_v15 }
 0x4a3   :  { %v5257_v20 = vpop.eup %5256 }
 0x4a4   :  { %v1834_v61 = vpop.xlane.xlu1 %1833  ;;  %v1762_v4 = vpop.xlane.xlu0 %1761  ;;  %v1883_v47 = vmul.f32 %v5257_v20, %v6341_v8 }
 0x4a5   :  { %v1780_v32 = vsub.f32 %v6347_v49, %v1762_v4 }
 0x4a6   :  { %v1896_v6 = vpack.c.bf16 %v1883_v47, %v1882_v53 }
 0x4a7   :  { %v6399_v16 = vpop.eup %5258  ;;  %v1810_v24 = vmul.f32 1.442695, %v1780_v32 }
 0x4a8   :  { %4133 = vmatmul.msk.bf16.gmra.mxu2 %vm1305_vm7, %v1896_v6  ;;  %v1853_v17 = vsel %vm1305_vm7, %v6399_v16, 0.0 }
 0x4a9   :  { %5260 = vpow2.f32 %v1810_v24  ;;  %1854 = vadd.xlane.f32.xlu1 %v1853_v17 }
 0x4aa   :  { %5262 = vrcp.f32 %v1834_v61 }
 0x4ac   :  { %v1837_v0 = vpop.xlane.xlu2 %1836  ;;  %v1765_v7 = vpop.xlane.xlu1 %1764 }
 0x4ad   :  { %5264 = vrcp.f32 %v1837_v0  ;;  %v1781_v15 = vsub.f32 %v6356_v60, %v1765_v7 }
 0x4af   :  { %v6405_v8 = vpop.eup %5260  ;;  %v1812_v49 = vmul.f32 1.442695, %v1781_v15 }
 0x4b0   :  { %v1856_v43 = vsel %vm1305_vm7, %v6405_v8, 0.0  ;;  %v5263_v40 = vpop.eup %5262 }
 0x4b1   :  { %5266 = vpow2.f32 %v1812_v49  ;;  %1857 = vadd.xlane.f32.xlu2 %v1856_v43  ;;  %v1884_v1 = vmul.f32 %v5263_v40, %v6350_v36 }
 0x4b3   :  { %v5265_v34 = vpop.eup %5264 }
 0x4b4   :  { %v1885_v21 = vmul.f32 %v5265_v34, %v6358_v19 }
 0x4b6   :  { %v1897_v18 = vpack.c.bf16 %v1885_v21, %v1884_v1  ;;  %v1840_v36 = vpop.xlane.xlu2 %1839 }
 0x4b7   :  { %v5267_v27 = vpop.eup %5266  ;;  %5268 = vrcp.f32 %v1840_v36 }
 0x4b8   :  { %4134 = vmatmul.msk.bf16.gmra.mxu2 %vm1305_vm7, %v1897_v18  ;;  %v1859_v60 = vsel %vm1305_vm7, %v5267_v27, 0.0 }
 0x4b9   :  { %1860 = vadd.xlane.f32.xlu0 %v1859_v60 }
 0x4bd   :  { %v5269_v22 = vpop.eup %5268 }
 0x4be   :  { %v1886_v42 = vmul.f32 %v5269_v22, %v6365_v51  ;;  %v2129_v22 = vld [vmem:[#allocation3 + $0x1] sm:$0xff] }
 0x4e5   :  { %v1843_v19 = vpop.xlane.xlu0 %1842 }
 0x4e6   :  { %5270 = vrcp.f32 %v1843_v19  ;;  %v2145_v19 = vld [vmem:[#allocation3 + $0x2] sm:$0xff] }
 0x4ec   :  { %v5271_v58 = vpop.eup %5270 }
 0x4ed   :  { %v1887_v3 = vmul.f32 %v5271_v58, %v6373_v50  ;;  %v1846_v31 = vpop.xlane.xlu1 %1845 }
 0x4ee   :  { %5272 = vrcp.f32 %v1846_v31 }
 0x4ef   :  { %v1898_v12 = vpack.c.bf16 %v1887_v3, %v1886_v42 }
 0x4f1   :  { %4135 = vmatmul.msk.bf16.gmra.mxu2 %vm1305_vm7, %v1898_v12 }
 0x4f4   :  { %v1939_v35 = vpop.f32.mrf.mxu2  ;;  %v5273_v56 = vpop.eup %5272 }
 0x4f5   :  { %v1888_v44 = vmul.f32 %v5273_v56, %v6378_v62 }
 0x4fc   :  { %v1941_v37 = vpop.f32.mrf.mxu2 }
 0x4fd   :  { %v1979_v41 = vpack.c.bf16 %v1941_v37, %v1939_v35 }
 0x4ff   :  { %4147 = vmatmul.msk.bf16.vlgmr.msra.gmra.mxu3 %vm84_vm2, %v1979_v41 }
 0x50c   :  { %v1849_v25 = vpop.xlane.xlu2 %1848 }
 0x50d   :  { %5274 = vrcp.f32 %v1849_v25 }
 0x513   :  { %v5275_v57 = vpop.eup %5274 }
 0x514   :  { %v1889_v51 = vmul.f32 %v5275_v57, %v6386_v9  ;;  %v1852_v50 = vpop.xlane.xlu0 %1851 }
 0x515   :  { %5276 = vrcp.f32 %v1852_v50 }
 0x516   :  { %v1899_v29 = vpack.c.bf16 %v1889_v51, %v1888_v44 }
 0x518   :  { %4136 = vmatmul.msk.bf16.gmra.mxu2 %vm1305_vm7, %v1899_v29 }
 0x51b   :  { %v1944_v52 = vpop.f32.mrf.mxu2  ;;  %v5277_v61 = vpop.eup %5276 }
 0x51c   :  { %v1855_v20 = vpop.xlane.xlu1 %1854  ;;  %v1890_v32 = vmul.f32 %v5277_v61, %v6392_v46 }
 0x51d   :  { %5278 = vrcp.f32 %v1855_v20 }
 0x523   :  { %v5279_v4 = vpop.eup %5278  ;;  %v1946_v53 = vpop.f32.mrf.mxu2 }
 0x524   :  { %v1980_v47 = vpack.c.bf16 %v1946_v53, %v1944_v52  ;;  %v1891_v6 = vmul.f32 %v5279_v4, %v6399_v16  ;;  %v1858_v9 = vpop.xlane.xlu2 %1857 }
 0x525   :  { %5280 = vrcp.f32 %v1858_v9 }
 0x526   :  { %4148 = vmatmul.msk.bf16.gmra.mxu3 %vm84_vm2, %v1980_v47  ;;  %v1900_v62 = vpack.c.bf16 %v1891_v6, %v1890_v32 }
 0x528   :  { %4137 = vmatmul.msk.bf16.gmra.mxu2 %vm1305_vm7, %v1900_v62 }
 0x52b   :  { %v1949_v24 = vpop.f32.mrf.mxu2  ;;  %v5281_v0 = vpop.eup %5280 }
 0x52c   :  { %v1861_v17 = vpop.xlane.xlu0 %1860  ;;  %v1892_v43 = vmul.f32 %v5281_v0, %v6405_v8 }
 0x52d   :  { %5282 = vrcp.f32 %v1861_v17 }
 0x533   :  { %v5283_v7 = vpop.eup %5282  ;;  %v1951_v15 = vpop.f32.mrf.mxu2 }
 0x534   :  { %v1981_v49 = vpack.c.bf16 %v1951_v15, %v1949_v24  ;;  %v1893_v40 = vmul.f32 %v5283_v7, %v5267_v27  ;;  %v6478_v27 = vld [vmem:[%s7422_s14] ss:$0 sm:$0xff]  ;;  %s5295_s14 = smov 64  }
 0x536   :  { %4149 = vmatmul.msk.bf16.gmra.mxu3 %vm84_vm2, %v1981_v49  ;;  %v1901_v46 = vpack.c.bf16 %v1893_v40, %v1892_v43 }
 0x538   :  { %4138 = vmatmul.msk.bf16.gmra.mxu2 %vm1305_vm7, %v1901_v46 }
 0x53b   :  { %v1954_v16 = vpop.f32.mrf.mxu2 }
 0x543   :  { %v1956_v34 = vpop.f32.mrf.mxu2 }
 0x544   :  { %v1982_v1 = vpack.c.bf16 %v1956_v34, %v1954_v16 }
 0x546   :  { %4150 = vmatmul.msk.bf16.gmra.mxu3 %vm84_vm2, %v1982_v1 }
 0x574   :  { %v1959_v8 = vpop.f32.mrf.mxu2 }
 0x57c   :  { %v1961_v21 = vpop.f32.mrf.mxu2 }
 0x57d   :  { %v1983_v18 = vpack.c.bf16 %v1961_v21, %v1959_v8 }
 0x57f   :  { %4151 = vmatmul.msk.bf16.gmra.mxu3 %vm84_vm2, %v1983_v18 }
 0x582   :  { %v2040_v60 = vpop.f32.mrf.mxu3 }
 0x583   :  { %v2041_v39 = vadd.f32 %v6478_v27, %v2040_v60 }
 0x585   :  { %v2080_v10 = vadd.f32 %v2041_v39, %v6165_v5  ;;  %v4279_v5 = vld [vmem:[%s7423_s15 + $0x88] sm:$0xff] }
 0x586   :  { %3040 = vmatpush.bf16.msra.mxu2 %v4279_v5 }
 0x587   :  { %2097 = vst.msk [vmem:[#allocation3 + $0x11] sm:$0xff] %vm84_vm2, %v2080_v10 }
 0x58a   :  { %v2042_v36 = vpop.f32.mrf.mxu3 }
 0x58b   :  { %v2043_v14 = vadd.f32 %v6478_v27, %v2042_v36 }
 0x58d   :  { %v2081_v58 = vadd.f32 %v2043_v14, %v6168_v2  ;;  %v4278_v2 = vld [vmem:[%s7423_s15 + $0x80] sm:$0xff] }
 0x58e   :  { %v2146_v42 = vld [vmem:[#allocation3 + $0x12] sm:$0xff]  ;;  %3041 = vmatpush.bf16.msra.mxu2 %v4278_v2 }
 0x58f   :  { %v6485_v3 = vld [vmem:[#allocation3 + $0x11] sm:$0xff]  ;;  %2098 = vst.msk [vmem:[#allocation3 + $0x21] sm:$0xff] %vm84_vm2, %v2081_v58  ;;  %v4624_v12 = vpack.i.bf16 %v2146_v42, %v2145_v19 }
 0x590   :  { %v4619_v35 = vpack.i.bf16 %v6485_v3, %v2129_v22  ;;  %v6497_v41 = vld [vmem:[#allocation3 + $0x10] sm:$0xff] }
 0x591   :  { %4625 = vrot.lane.b32.xlu2 %v4624_v12, %s5295_s14 }
 0x592   :  { %4620 = vrot.lane.b32.xlu1 %v4619_v35, %s5293_s6 }
 0x596   :  { %v2194_v37 = vld [vmem:[#allocation3 + $0x22] sm:$0xff] }
 0x597   :  { %v6499_v31 = vld [vmem:[#allocation3 + $0x20] sm:$0xff]  ;;  %v4634_v25 = vpack.i.bf16 %v2194_v37, %v2146_v42 }
 0x598   :  { %v4629_v56 = vpack.i.bf16 %v6499_v31, %v6497_v41  ;;  %v6511_v6 = vld [vmem:[#allocation3 + $0x21] sm:$0xff] }
 0x59a   :  { %4635 = vrot.lane.b32.xlu1 %v4634_v25, %s5293_s6  ;;  %4630 = vrot.lane.b32.xlu0 %v4629_v56, %s5296_s23  ;;  %v4269_v25 = vld [vmem:[%s7423_s15 + $0x38] sm:$0xff] }
 0x59b   :  { %v1964_v57 = vpop.f32.mrf.mxu2  ;;  %2936 = vmatpush.bf16.msrb.mxu0 %v4269_v25 }
 0x5a3   :  { %v1966_v44 = vpop.f32.mrf.mxu2 }
 0x5a4   :  { %v1984_v51 = vpack.c.bf16 %v1966_v44, %v1964_v57  ;;  %v4268_v44 = vld [vmem:[%s7423_s15 + $0x30] sm:$0xff] }
 0x5a5   :  { %2937 = vmatpush.bf16.msrb.mxu0 %v4268_v44  ;;  %v2153_v44 = vld [vmem:[#allocation3 + $0xa2] sm:$0xff] }
 0x5a6   :  { %4152 = vmatmul.msk.bf16.gmra.mxu3 %vm84_vm2, %v1984_v51 }
 0x5a9   :  { %v2045_v29 = vpop.f32.mrf.mxu3 }
 0x5aa   :  { %v2046_v50 = vadd.f32 %v6478_v27, %v2045_v29 }
 0x5ab   :  { %v1969_v52 = vpop.f32.mrf.mxu2 }
 0x5ac   :  { %v2082_v20 = vadd.f32 %v2046_v50, %v6178_v13 }
 0x5ae   :  { %2099 = vst.msk [vmem:[#allocation3 + $0x31] sm:$0xff] %vm84_vm2, %v2082_v20 }
 0x5b1   :  { %v2047_v61 = vpop.f32.mrf.mxu3 }
 0x5b2   :  { %v2048_v4 = vadd.f32 %v6478_v27, %v2047_v61 }
 0x5b3   :  { %v1971_v53 = vpop.f32.mrf.mxu2 }
 0x5b4   :  { %v2083_v47 = vadd.f32 %v2048_v4, %v6181_v33  ;;  %v1985_v32 = vpack.c.bf16 %v1971_v53, %v1969_v52  ;;  %v4267_v4 = vld [vmem:[%s7423_s15 + $0x28] sm:$0xff]  ;;  %v4266_v53 = vld [vmem:[%s7423_s15 + $0x20] sm:$0xff] }
 0x5b5   :  { %v6513_v62 = vld [vmem:[#allocation3 + $0x31] sm:$0xff]  ;;  %2938 = vmatpush.bf16.msrb.mxu0 %v4267_v4 }
 0x5b6   :  { %v2148_v9 = vld [vmem:[#allocation3 + $0x32] sm:$0xff]  ;;  %2100 = vst.msk [vmem:[#allocation3 + $0x41] sm:$0xff] %vm84_vm2, %v2083_v47  ;;  %4153 = vmatmul.msk.bf16.gmra.mxu3 %vm84_vm2, %v1985_v32  ;;  %v4639_v13 = vpack.i.bf16 %v6513_v62, %v6511_v6 }
 0x5b7   :  { %v6515_v24 = vld [vmem:[#allocation3 + $0x30] sm:$0xff]  ;;  %v4644_v17 = vpack.i.bf16 %v2148_v9, %v2194_v37  ;;  %v2742_v33 = vpack.c.bf16 %v2148_v9, %v2194_v37 }
 0x5b8   :  { %v4649_v0 = vpack.i.bf16 %v6515_v24, %v6499_v31  ;;  %4640 = vrot.lane.b32.xlu2 %v4639_v13, %s5293_s6 }
 0x5b9   :  { %4645 = vrot.lane.b32.xlu1 %v4644_v17, %s5295_s14  ;;  %4227 = vmatmul.msk.bf16.vlgmr.msra.gmra.mxu2 %vm84_vm2, %v2742_v33  ;;  %v2050_v7 = vpop.f32.mrf.mxu3 }
 0x5ba   :  { %4650 = vrot.lane.b32.xlu0 %v4649_v0, %s5295_s14  ;;  %v2051_v15 = vadd.f32 %v6478_v27, %v2050_v7  ;;  %2939 = vmatpush.bf16.msrb.mxu0 %v4266_v53  ;;  %v4265_v0 = vld [vmem:[%s7423_s15 + $0x18] sm:$0xff] }
 0x5bb   :  { %v1974_v49 = vpop.f32.mrf.mxu2 }
 0x5bc   :  { %v2084_v43 = vadd.f32 %v2051_v15, %v6202_v48  ;;  %v2249_v15 = vld [vmem:[#allocation3 + $0x92] sm:$0xff] }
 0x5bd   :  { %v6529_v40 = vld [vmem:[#allocation3 + $0x40] sm:$0xff] }
 0x5be   :  { %v2196_v46 = vld [vmem:[#allocation3 + $0x42] sm:$0xff]  ;;  %2101 = vst.msk [vmem:[#allocation3 + $0x51] sm:$0xff] %vm84_vm2, %v2084_v43  ;;  %v4654_v16 = vpack.i.bf16 %v6529_v40, %v6515_v24  ;;  %2940 = vmatpush.bf16.msrb.mxu0 %v4265_v0  ;;  %v4264_v43 = vld [vmem:[%s7423_s15 + $0x10] sm:$0xff] }
 0x5bf   :  { %v4664_v34 = vpack.i.bf16 %v2196_v46, %v2148_v9  ;;  %v6537_v18 = vld [vmem:[#allocation3 + $0x41] sm:$0xff]  ;;  %v2233_v0 = vld [vmem:[#allocation3 + $0x91] sm:$0xff] }
 0x5c0   :  { %4655 = vrot.lane.b32.xlu2 %v4654_v16, %s5296_s23  ;;  %v4659_v36 = vpack.i.bf16 %v6537_v18, %v6513_v62 }
 0x5c1   :  { %4665 = vrot.lane.b32.xlu1 %v4664_v34, %s5293_s6  ;;  %v2052_v1 = vpop.f32.mrf.mxu3  ;;  %v4263_v34 = vld [vmem:[%s7423_s15 + $0x8] sm:$0xff] }
 0x5c2   :  { %v2053_v8 = vadd.f32 %v6478_v27, %v2052_v1  ;;  %2941 = vmatpush.bf16.msrb.mxu0 %v4264_v43  ;;  %v2217_v1 = vld [vmem:[#allocation3 + $0x90] sm:$0xff] }
 0x5c3   :  { %v1976_v21 = vpop.f32.mrf.mxu2 }
 0x5c4   :  { %v2085_v48 = vadd.f32 %v2053_v8, %v6205_v26  ;;  %v1986_v60 = vpack.c.bf16 %v1976_v21, %v1974_v49  ;;  %v4262_v8 = vld [vmem:[%s7423_s15] sm:$0xff] }
 0x5c5   :  { %v6540_v39 = vld [vmem:[#allocation3 + $0x51] sm:$0xff] }
 0x5c6   :  { %v2245_v10 = vld [vmem:[#allocation3 + $0x52] sm:$0xff]  ;;  %2102 = vst.msk [vmem:[#allocation3 + $0x61] sm:$0xff] %vm84_vm2, %v2085_v48  ;;  %4154 = vmatmul.msk.bf16.gmra.mxu3 %vm84_vm2, %v1986_v60  ;;  %v4669_v14 = vpack.i.bf16 %v6540_v39, %v6537_v18  ;;  %2942 = vmatpush.bf16.msrb.mxu0 %v4263_v34 }
 0x5c7   :  { %v2745_v19 = vpack.c.bf16 %v2245_v10, %v2196_v46  ;;  %v6555_v12 = vld [vmem:[#allocation3 + $0x50] sm:$0xff]  ;;  %v4674_v37 = vpack.i.bf16 %v2245_v10, %v2196_v46 }
 0x5c8   :  { %4660 = vrot.lane.b32.xlu2 %v4659_v36, %s5296_s23  ;;  %4670 = vrot.lane.b32.xlu0 %v4669_v14, %s5293_s6  ;;  %v4679_v61 = vpack.i.bf16 %v6555_v12, %v6529_v40  ;;  %v4276_v34 = vld [vmem:[%s7423_s15 + $0x70] sm:$0xff] }
 0x5c9   :  { %4228 = vmatmul.msk.bf16.gmra.mxu2 %vm84_vm2, %v2745_v19  ;;  %v2055_v26 = vpop.f32.mrf.mxu3 }
 0x5ca   :  { %v2056_v22 = vadd.f32 %v6478_v27, %v2055_v26  ;;  %2943 = vmatpush.bf16.msrb.mxu0 %v4262_v8  ;;  %v2113_v26 = vld [vmem:[#allocation3] sm:$0xff] }
 0x5cc   :  { %v2086_v58 = vadd.f32 %v2056_v22, %v6211_v30 }
 0x5cd   :  { %v6553_v42 = vld [vmem:[#allocation3 + $0x61] sm:$0xff] }
 0x5ce   :  { %v6557_v35 = vld [vmem:[#allocation3 + $0x60] sm:$0xff]  ;;  %2103 = vst.msk [vmem:[#allocation3 + $0x71] sm:$0xff] %vm84_vm2, %v2086_v58  ;;  %v4689_v5 = vpack.i.bf16 %v6553_v42, %v6540_v39 }
 0x5cf   :  { %v4684_v2 = vpack.i.bf16 %v6557_v35, %v6555_v12  ;;  %v2151_v57 = vld [vmem:[#allocation3 + $0x62] sm:$0xff] }
 0x5d0   :  { %4690 = vrot.lane.b32.xlu2 %v4689_v5, %s5296_s23  ;;  %4675 = vrot.lane.b32.xlu0 %v4674_v37, %s5295_s14  ;;  %v4694_v52 = vpack.i.bf16 %v2151_v57, %v2245_v10 }
 0x5d1   :  { %4685 = vrot.lane.b32.xlu1 %v4684_v2, %s5296_s23  ;;  %v2057_v30 = vpop.f32.mrf.mxu3 }
 0x5d2   :  { %v2058_v56 = vadd.f32 %v6478_v27, %v2057_v30 }
 0x5d4   :  { %v2087_v51 = vadd.f32 %v2058_v56, %v6214_v45 }
 0x5d5   :  { %v2152_v29 = vld [vmem:[#allocation3 + $0x72] sm:$0xff] }
 0x5d6   :  { %2104 = vst.msk [vmem:[#allocation3 + $0x81] sm:$0xff] %vm84_vm2, %v2087_v51  ;;  %v4704_v50 = vpack.i.bf16 %v2152_v29, %v2151_v57  ;;  %v2748_v20 = vpack.c.bf16 %v2152_v29, %v2151_v57  ;;  %v6585_v45 = vld [vmem:[#allocation3 + $0x71] sm:$0xff]  ;;  %v2137_v51 = vld [vmem:[#allocation3 + $0xa1] sm:$0xff] }
 0x5d7   :  { %v6590_v47 = vld [vmem:[#allocation3 + $0x70] sm:$0xff]  ;;  %v4699_v13 = vpack.i.bf16 %v6585_v45, %v6553_v42 }
 0x5d8   :  { %4705 = vrot.lane.b32.xlu2 %v4704_v50, %s5295_s14  ;;  %4680 = vrot.lane.b32.xlu0 %v4679_v61, %s5295_s14  ;;  %v4709_v17 = vpack.i.bf16 %v6590_v47, %v6557_v35 }
 0x5d9   :  { %4695 = vrot.lane.b32.xlu1 %v4694_v52, %s5293_s6  ;;  %4229 = vmatmul.msk.bf16.gmra.mxu2 %vm84_vm2, %v2748_v20 }
 0x5dd   :  { %v6592_v32 = vld [vmem:[#allocation3 + $0x81] sm:$0xff] }
 0x5de   :  { %v4719_v9 = vpack.i.bf16 %v6592_v32, %v6585_v45  ;;  %v2200_v33 = vld [vmem:[#allocation3 + $0x82] sm:$0xff] }
 0x5df   :  { %v2168_v7 = vld [vmem:[#allocation3 + $0x80] sm:$0xff]  ;;  %v4724_v49 = vpack.i.bf16 %v2200_v33, %v2152_v29  ;;  %v2751_v16 = vpack.c.bf16 %v2249_v15, %v2200_v33  ;;  %v4277_v15 = vld [vmem:[%s7423_s15 + $0x78] sm:$0xff] }
 0x5e0   :  { %4720 = vrot.lane.b32.xlu2 %v4719_v9, %s5296_s23  ;;  %4710 = vrot.lane.b32.xlu0 %v4709_v17, %s5295_s14  ;;  %v4714_v46 = vpack.i.bf16 %v2168_v7, %v6590_v47  ;;  %v4729_v21 = vpack.i.bf16 %v2217_v1, %v2168_v7 }
 0x5e1   :  { %4700 = vrot.lane.b32.xlu1 %v4699_v13, %s5293_s6  ;;  %2985 = vmatpush.bf16.msra.mxu1 %v4277_v15  ;;  %v4274_v15 = vld [vmem:[%s7423_s15 + $0x60] sm:$0xff] }
 0x5e5   :  { %2986 = vmatpush.bf16.msra.mxu1 %v4276_v34 }
 0x5e8   :  { %4715 = vrot.lane.b32.xlu0 %v4714_v46, %s5296_s23 }
 0x5e9   :  { %4725 = vrot.lane.b32.xlu1 %v4724_v49, %s5293_s6  ;;  %4230 = vmatmul.msk.bf16.gmra.mxu2 %vm84_vm2, %v2751_v16 }
 0x5eb   :  { %v4626_v22 = vpop.permute.xlu2 %4625 }
 0x5ec   :  { %v4628_v37 = vunpack.i.h.bf16 %v4626_v22  ;;  %v4627_v30 = vunpack.i.l.bf16 %v4626_v22 }
 0x5f0   :  { %4730 = vrot.lane.b32.xlu0 %v4729_v21, %s5295_s14 }
 0x602   :  { %v2060_v48 = vpop.f32.mrf.mxu3 }
 0x603   :  { %v2061_v60 = vadd.f32 %v6478_v27, %v2060_v48 }
 0x604   :  { %v4621_v10 = vpop.permute.xlu1 %4620 }
 0x605   :  { %v2088_v36 = vadd.f32 %v2061_v60, %v6220_v38  ;;  %v4623_v14 = vunpack.i.h.bf16 %v4621_v10  ;;  %v4622_v19 = vunpack.i.l.bf16 %v4621_v10 }
 0x607   :  { %2105 = vst.msk [vmem:[#allocation3 + $0xb1] sm:$0xff] %vm84_vm2, %v2088_v36  ;;  %v2643_v58 = vsel %vm84_vm2, %v6497_v41, %v4623_v14  ;;  %v2642_v5 = vsel %vm84_vm2, %v2113_v26, %v4622_v19 }
 0x608   :  { %v2659_v50 = vsel %vm2658_vm0, %v2642_v5, %v4627_v30  ;;  %v2660_v41 = vsel %vm2658_vm0, %v2643_v58, %v4628_v37 }
 0x60a   :  { %v2062_v2 = vpop.f32.mrf.mxu3 }
 0x60b   :  { %v2063_v25 = vadd.f32 %v6478_v27, %v2062_v2 }
 0x60c   :  { %v4631_v56 = vpop.permute.xlu0 %4630  ;;  %v6651_v16 = vpop.permute.xlu1 %4635 }
 0x60d   :  { %v4633_v38 = vunpack.i.h.bf16 %v4631_v56  ;;  %v4632_v57 = vunpack.i.l.bf16 %v4631_v56  ;;  %v2089_v29 = vadd.f32 %v2063_v25, %v6223_v11 }
 0x60e   :  { %v6632_v61 = vld [vmem:[#allocation3 + $0xb0] sm:$0xff] }
 0x60f   :  { %v2676_v52 = vsel %vm2675_vm1, %v2659_v50, %v4632_v57  ;;  %v2677_v20 = vsel %vm2675_vm1, %v2660_v41, %v4633_v38  ;;  %v2154_v4 = vld [vmem:[#allocation3 + $0xb2] sm:$0xff]  ;;  %2106 = vst.msk [vmem:[#allocation3 + $0xc1] sm:$0xff] %vm84_vm2, %v2089_v29  ;;  %v4744_v13 = vpack.i.bf16 %v6511_v6, %v6632_v61 }
 0x610   :  { %v6634_v53 = vld [vmem:[#allocation3 + $0xb1] sm:$0xff]  ;;  %v2740_v9 = vpack.c.bf16 %v2677_v20, %v2676_v52  ;;  %v4739_v11 = vpack.i.bf16 %v2154_v4, %v2153_v44  ;;  %v4275_v52 = vld [vmem:[%s7423_s15 + $0x68] sm:$0xff] }
 0x611   :  { %v4734_v17 = vpack.i.bf16 %v6634_v53, %v2137_v51  ;;  %4745 = vrot.lane.b32.xlu2 %v4744_v13, %s5296_s23  ;;  %2987 = vmatpush.bf16.msra.mxu1 %v4275_v52  ;;  %v4271_v52 = vld [vmem:[%s7423_s15 + $0x48] sm:$0xff] }
 0x612   :  { %4740 = vrot.lane.b32.xlu1 %v4739_v11, %s5295_s14  ;;  %2944 = vmatmul.bf16.vlgmr.msrb.gmra.mxu0 %v2740_v9  ;;  %v4641_v46 = vpop.permute.xlu2 %4640 }
 0x613   :  { %4735 = vrot.lane.b32.xlu0 %v4734_v17, %s5293_s6  ;;  %v4643_v1 = vunpack.i.h.bf16 %v4641_v46  ;;  %v4642_v8 = vunpack.i.l.bf16 %v4641_v46 }
 0x615   :  { %v2645_v36 = vsel %vm84_vm2, %v6515_v24, %v4643_v1  ;;  %v2644_v26 = vsel %vm84_vm2, %v6499_v31, %v4642_v8  ;;  %2988 = vmatpush.bf16.msra.mxu1 %v4274_v15  ;;  %v4273_v8 = vld [vmem:[%s7423_s15 + $0x58] sm:$0xff]  ;;  %v4270_v15 = vld [vmem:[%s7423_s15 + $0x40] sm:$0xff] }
 0x616   :  { %v6643_v33 = vld [vmem:[#allocation3 + $0xc0] sm:$0xff] }
 0x617   :  { %v2202_v7 = vld [vmem:[#allocation3 + $0xc2] sm:$0xff]  ;;  %v4749_v49 = vpack.i.bf16 %v6643_v33, %v2233_v0 }
 0x618   :  { %v4754_v43 = vpack.i.bf16 %v2202_v7, %v2154_v4  ;;  %v6671_v44 = vld [vmem:[#allocation3 + $0xc1] sm:$0xff] }
 0x619   :  { %4750 = vrot.lane.b32.xlu2 %v4749_v49, %s5296_s23  ;;  %2989 = vmatpush.bf16.msra.mxu1 %v4273_v8 }
 0x61a   :  { %4755 = vrot.lane.b32.xlu1 %v4754_v43, %s5293_s6  ;;  %v4656_v21 = vpop.permute.xlu2 %4655 }
 0x61b   :  { %v4658_v22 = vunpack.i.h.bf16 %v4656_v21  ;;  %v4657_v58 = vunpack.i.l.bf16 %v4656_v21 }
 0x629   :  { %v2065_v48 = vpop.f32.mrf.mxu3 }
 0x62a   :  { %v2066_v60 = vadd.f32 %v6478_v27, %v2065_v48 }
 0x62b   :  { %v4646_v10 = vpop.permute.xlu1 %4645 }
 0x62c   :  { %v4648_v14 = vunpack.i.h.bf16 %v4646_v10  ;;  %v4647_v19 = vunpack.i.l.bf16 %v4646_v10  ;;  %v2090_v5 = vadd.f32 %v2066_v60, %v6229_v23  ;;  %v6667_v38 = vpop.permute.xlu0 %4650  ;;  %v6707_v10 = vpop.permute.xlu2 %4660 }
 0x62e   :  { %v2662_v2 = vsel %vm2658_vm0, %v2645_v36, %v4648_v14  ;;  %v2661_v37 = vsel %vm2658_vm0, %v2644_v26, %v4647_v19  ;;  %2107 = vst.msk [vmem:[#allocation3 + $0xd1] sm:$0xff] %vm84_vm2, %v2090_v5 }
 0x62f   :  { %v2678_v30 = vsel %vm2675_vm1, %v2661_v37, %v4657_v58  ;;  %v2679_v25 = vsel %vm2675_vm1, %v2662_v2, %v4658_v22 }
 0x630   :  { %v2743_v24 = vpack.c.bf16 %v2679_v25, %v2678_v30 }
 0x631   :  { %v2067_v56 = vpop.f32.mrf.mxu3 }
 0x632   :  { %2949 = vmatmul.bf16.gmra.mxu0 %v2743_v24  ;;  %v2068_v31 = vadd.f32 %v6478_v27, %v2067_v56 }
 0x633   :  { %v6684_v20 = vpop.permute.xlu1 %4665 }
 0x634   :  { %v2091_v57 = vadd.f32 %v2068_v31, %v6232_v28  ;;  %v4272_v31 = vld [vmem:[%s7423_s15 + $0x50] sm:$0xff] }
 0x635   :  { %v2156_v23 = vld [vmem:[#allocation3 + $0xd2] sm:$0xff]  ;;  %2990 = vmatpush.bf16.msra.mxu1 %v4272_v31 }
 0x636   :  { %v6673_v51 = vld [vmem:[#allocation3 + $0xd1] sm:$0xff]  ;;  %2108 = vst.msk [vmem:[#allocation3 + $0xe1] sm:$0xff] %vm84_vm2, %v2091_v57  ;;  %v4764_v29 = vpack.i.bf16 %v2156_v23, %v2202_v7  ;;  %v2754_v41 = vpack.c.bf16 %v2156_v23, %v2202_v7 }
 0x637   :  { %v4759_v50 = vpack.i.bf16 %v6673_v51, %v6671_v44  ;;  %v6687_v13 = vld [vmem:[#allocation3 + $0xd0] sm:$0xff] }
 0x638   :  { %4765 = vrot.lane.b32.xlu0 %v4764_v29, %s5295_s14  ;;  %4231 = vmatmul.msk.bf16.gmra.mxu2 %vm84_vm2, %v2754_v41  ;;  %v4769_v7 = vpack.i.bf16 %v6687_v13, %v6643_v33 }
 0x639   :  { %4760 = vrot.lane.b32.xlu2 %v4759_v50, %s5293_s6  ;;  %v2070_v28 = vpop.f32.mrf.mxu3  ;;  %2991 = vmatpush.bf16.msra.mxu1 %v4271_v52  ;;  %v2257_v52 = vld [vmem:[#allocation3 + $0x132] sm:$0xff] }
 0x63a   :  { %v2071_v4 = vadd.f32 %v6478_v27, %v2070_v28  ;;  %v4671_v9 = vpop.permute.xlu0 %4670 }
 0x63b   :  { %v4673_v49 = vunpack.i.h.bf16 %v4671_v9 }
 0x63c   :  { %v2092_v11 = vadd.f32 %v2071_v4, %v6238_v55  ;;  %v4672_v55 = vunpack.i.l.bf16 %v4671_v9 }
 0x63d   :  { %v6690_v17 = vld [vmem:[#allocation3 + $0xe0] sm:$0xff]  ;;  %v2647_v26 = vsel %vm84_vm2, %v6555_v12, %v4673_v49  ;;  %2992 = vmatpush.bf16.msra.mxu1 %v4270_v15  ;;  %v2225_v15 = vld [vmem:[#allocation3 + $0x130] sm:$0xff] }
 0x63e   :  { %2109 = vst.msk [vmem:[#allocation3 + $0xf1] sm:$0xff] %vm84_vm2, %v2092_v11  ;;  %v4779_v0 = vpack.i.bf16 %v6690_v17, %v6687_v13  ;;  %v2204_v1 = vld [vmem:[#allocation3 + $0xe2] sm:$0xff]  ;;  %v2646_v22 = vsel %vm84_vm2, %v6529_v40, %v4672_v55  ;;  %v6745_v11 = vpop.permute.xlu2 %4690 }
 0x63f   :  { %v4784_v58 = vpack.i.bf16 %v2204_v1, %v2156_v23  ;;  %v6719_v24 = vld [vmem:[#allocation3 + $0xe1] sm:$0xff] }
 0x640   :  { %4780 = vrot.lane.b32.xlu1 %v4779_v0, %s5296_s23  ;;  %4770 = vrot.lane.b32.xlu0 %v4769_v7, %s5295_s14 }
 0x641   :  { %4775 = vrot.lane.b32.xlu2 %v4759_v50, %s5296_s23  ;;  %v2072_v43 = vpop.f32.mrf.mxu3 }
 0x642   :  { %v2073_v46 = vadd.f32 %v6478_v27, %v2072_v43  ;;  %v4676_v21 = vpop.permute.xlu0 %4675 }
 0x643   :  { %v4686_v34 = vpop.permute.xlu1 %4685  ;;  %v4678_v14 = vunpack.i.h.bf16 %v4676_v21  ;;  %v4677_v19 = vunpack.i.l.bf16 %v4676_v21 }
 0x644   :  { %v4688_v48 = vunpack.i.h.bf16 %v4686_v34  ;;  %v4687_v60 = vunpack.i.l.bf16 %v4686_v34  ;;  %v2093_v36 = vadd.f32 %v2073_v46, %v6241_v59 }
 0x645   :  { %v2253_v5 = vld [vmem:[#allocation3 + $0xf2] sm:$0xff]  ;;  %v2663_v37 = vsel %vm2658_vm0, %v2646_v22, %v4677_v19  ;;  %v2664_v30 = vsel %vm2658_vm0, %v2647_v26, %v4678_v14 }
 0x646   :  { %v6714_v2 = vld [vmem:[#allocation3 + $0xf1] sm:$0xff]  ;;  %2110 = vst.msk [vmem:[#allocation3 + $0x101] sm:$0xff] %vm84_vm2, %v2093_v36  ;;  %v2757_v59 = vpack.c.bf16 %v2253_v5, %v2204_v1  ;;  %v4794_v25 = vpack.i.bf16 %v2253_v5, %v2204_v1  ;;  %v2680_v40 = vsel %vm2675_vm1, %v2663_v37, %v4687_v60  ;;  %v2681_v56 = vsel %vm2675_vm1, %v2664_v30, %v4688_v48  ;;  %v4706_v26 = vpop.permute.xlu2 %4705 }
 0x647   :  { %v4789_v12 = vpack.i.bf16 %v6714_v2, %v6719_v24  ;;  %v2746_v57 = vpack.c.bf16 %v2681_v56, %v2680_v40  ;;  %v6741_v4 = vld [vmem:[#allocation3 + $0xf0] sm:$0xff] }
 0x648   :  { %4785 = vrot.lane.b32.xlu0 %v4784_v58, %s5293_s6  ;;  %4232 = vmatmul.msk.bf16.gmra.mxu2 %vm84_vm2, %v2757_v59  ;;  %v4799_v7 = vpack.i.bf16 %v6741_v4, %v6690_v17  ;;  %v4708_v58 = vunpack.i.h.bf16 %v4706_v26 }
 0x649   :  { %4795 = vrot.lane.b32.xlu2 %v4794_v25, %s5295_s14  ;;  %v2075_v23 = vpop.f32.mrf.mxu3  ;;  %4790 = vrot.lane.b32.xlu1 %v4789_v12, %s5293_s6 }
 0x64a   :  { %v2076_v29 = vadd.f32 %v6478_v27, %v2075_v23  ;;  %2954 = vmatmul.bf16.gmra.mxu0 %v2746_v57  ;;  %v6735_v41 = vpop.permute.xlu0 %4680 }
 0x64b   :  { %v6733_v50 = vpop.permute.xlu1 %4695 }
 0x64c   :  { %v2094_v28 = vadd.f32 %v2076_v29, %v6260_v63 }
 0x64d   :  { %v6743_v9 = vld [vmem:[#allocation3 + $0x100] sm:$0xff] }
 0x64e   :  { %2111 = vst.msk [vmem:[#allocation3 + $0x111] sm:$0xff] %vm84_vm2, %v2094_v28  ;;  %v4809_v0 = vpack.i.bf16 %v6743_v9, %v6741_v4  ;;  %v2206_v34 = vld [vmem:[#allocation3 + $0x102] sm:$0xff]  ;;  %v6789_v29 = vpop.permute.xlu2 %4720 }
 0x64f   :  { %v6765_v14 = vld [vmem:[#allocation3 + $0x101] sm:$0xff]  ;;  %v4814_v19 = vpack.i.bf16 %v2206_v34, %v2253_v5  ;;  %v4707_v5 = vunpack.i.l.bf16 %v4706_v26 }
 0x650   :  { %4810 = vrot.lane.b32.xlu0 %v4809_v0, %s5296_s23 }
 0x651   :  { %4800 = vrot.lane.b32.xlu2 %v4799_v7, %s5295_s14  ;;  %v2077_v63 = vpop.f32.mrf.mxu3  ;;  %4805 = vrot.lane.b32.xlu1 %v4789_v12, %s5296_s23  ;;  %v2241_v7 = vld [vmem:[#allocation3 + $0x131] sm:$0xff] }
 0x652   :  { %v2078_v49 = vadd.f32 %v6478_v27, %v2077_v63  ;;  %v6759_v55 = vpop.permute.xlu0 %4710  ;;  %v4638_v63 = vunpack.i.h.bf16 %v6651_v16 }
 0x653   :  { %v4701_v43 = vpop.permute.xlu1 %4700 }
 0x654   :  { %v2095_v46 = vadd.f32 %v2078_v49, %v6263_v54  ;;  %v4703_v21 = vunpack.i.h.bf16 %v4701_v43  ;;  %v4702_v48 = vunpack.i.l.bf16 %v4701_v43  ;;  %v4653_v49 = vunpack.i.h.bf16 %v6667_v38 }
 0x655   :  { %v2255_v1 = vld [vmem:[#allocation3 + $0x112] sm:$0xff] }
 0x656   :  { %v6762_v8 = vld [vmem:[#allocation3 + $0x111] sm:$0xff]  ;;  %2112 = vst.msk [vmem:[#allocation3 + $0x121] sm:$0xff] %vm84_vm2, %v2095_v46  ;;  %v2760_v60 = vpack.c.bf16 %v2255_v1, %v2206_v34  ;;  %v4824_v36 = vpack.i.bf16 %v2255_v1, %v2206_v34  ;;  %v2649_v54 = vsel %vm84_vm2, %v6590_v47, %v4703_v21  ;;  %v2648_v22 = vsel %vm84_vm2, %v6557_v35, %v4702_v48 }
 0x657   :  { %v4819_v27 = vpack.i.bf16 %v6762_v8, %v6765_v14  ;;  %v6777_v25 = vld [vmem:[#allocation3 + $0x110] sm:$0xff]  ;;  %v2665_v40 = vsel %vm2658_vm0, %v2648_v22, %v4707_v5  ;;  %v2666_v56 = vsel %vm2658_vm0, %v2649_v54, %v4708_v58  ;;  %v4637_v34 = vunpack.i.l.bf16 %v6651_v16 }
 0x658   :  { %4233 = vmatmul.msk.bf16.gmra.mxu2 %vm84_vm2, %v2760_v60  ;;  %v4829_v23 = vpack.i.bf16 %v6777_v25, %v6743_v9  ;;  %v4652_v60 = vunpack.i.l.bf16 %v6667_v38  ;;  %v4668_v58 = vunpack.i.h.bf16 %v6684_v20  ;;  %v4667_v5 = vunpack.i.l.bf16 %v6684_v20 }
 0x659   :  { %4815 = vrot.lane.b32.xlu2 %v4814_v19, %s5293_s6  ;;  %4825 = vrot.lane.b32.xlu1 %v4824_v36, %s5295_s14  ;;  %v2693_v36 = vsel %vm84_vm2, %v6511_v6, %v4638_v63  ;;  %v2692_v16 = vsel %vm84_vm2, %v6485_v3, %v4637_v34  ;;  %v4713_v63 = vunpack.i.h.bf16 %v6759_v55 }
 0x65a   :  { %4820 = vrot.lane.b32.xlu0 %v4819_v27, %s5293_s6  ;;  %v4716_v37 = vpop.permute.xlu0 %4715  ;;  %v2709_v19 = vsel %vm2658_vm0, %v2693_v36, %v4653_v49  ;;  %v2708_v26 = vsel %vm2658_vm0, %v2692_v16, %v4652_v60  ;;  %v2695_v3 = vsel %vm84_vm2, %v6537_v18, %v4668_v58  ;;  %v4712_v49 = vunpack.i.l.bf16 %v6759_v55 }
 0x65b   :  { %v4718_v30 = vunpack.i.h.bf16 %v4716_v37  ;;  %v4717_v59 = vunpack.i.l.bf16 %v4716_v37  ;;  %v4683_v37 = vunpack.i.h.bf16 %v6735_v41 }
 0x65d   :  { %v2176_v12 = vld [vmem:[#allocation3 + $0x120] sm:$0xff]  ;;  %v2682_v35 = vsel %vm2675_vm1, %v2665_v40, %v4717_v59  ;;  %v2683_v31 = vsel %vm2675_vm1, %v2666_v56, %v4718_v30  ;;  %v4682_v30 = vunpack.i.l.bf16 %v6735_v41  ;;  %v2694_v59 = vsel %vm84_vm2, %v6513_v62, %v4667_v5 }
 0x65e   :  { %v4839_v47 = vpack.i.bf16 %v2176_v12, %v6777_v25  ;;  %v2749_v57 = vpack.c.bf16 %v2683_v31, %v2682_v35  ;;  %v2256_v28 = vld [vmem:[#allocation3 + $0x122] sm:$0xff]  ;;  %v4849_v48 = vpack.i.bf16 %v2225_v15, %v2176_v12  ;;  %v2711_v40 = vsel %vm2658_vm0, %v2695_v3, %v4683_v37  ;;  %v4726_v35 = vpop.permute.xlu1 %4725 }
 0x65f   :  { %v6791_v0 = vld [vmem:[#allocation3 + $0x121] sm:$0xff]  ;;  %v2763_v43 = vpack.c.bf16 %v2257_v52, %v2256_v28  ;;  %v4844_v21 = vpack.i.bf16 %v2256_v28, %v2255_v1  ;;  %v4662_v1 = vunpack.i.l.bf16 %v6707_v10  ;;  %v2710_v12 = vsel %vm2658_vm0, %v2694_v59, %v4682_v30 }
 0x660   :  { %2959 = vmatmul.bf16.gmra.mxu0 %v2749_v57  ;;  %v4854_v46 = vpack.i.bf16 %v2241_v7, %v6791_v0  ;;  %v4663_v56 = vunpack.i.h.bf16 %v6707_v10  ;;  %v4697_v62 = vunpack.i.l.bf16 %v6733_v50  ;;  %v2121_v28 = vld [vmem:[#allocation3 + $0xa0] sm:$0xff]  ;;  %v4727_v58 = vunpack.i.l.bf16 %v4726_v35 }
 0x661   :  { %4840 = vrot.lane.b32.xlu2 %v4839_v47, %s5296_s23  ;;  %4830 = vrot.lane.b32.xlu1 %v4829_v23, %s5295_s14  ;;  %v2725_v22 = vsel %vm2675_vm1, %v2709_v19, %v4662_v1  ;;  %v4692_v47 = vunpack.i.l.bf16 %v6745_v11  ;;  %v4698_v23 = vunpack.i.h.bf16 %v6733_v50 }
 0x662   :  { %4835 = vrot.lane.b32.xlu0 %v4819_v27, %s5296_s23  ;;  %v4731_v20 = vpop.permute.xlu0 %4730  ;;  %v2726_v31 = vsel %vm2675_vm1, %v2710_v12, %v4663_v56  ;;  %v2696_v36 = vsel %vm84_vm2, %v6540_v39, %v4697_v62 }
 0x663   :  { %v2727_v41 = vsel %vm2675_vm1, %v2711_v40, %v4692_v47  ;;  %v2697_v50 = vsel %vm84_vm2, %v6553_v42, %v4698_v23  ;;  %v2712_v55 = vsel %vm2658_vm0, %v2696_v36, %v4712_v49  ;;  %v4733_v5 = vunpack.i.h.bf16 %v4731_v20 }
 0x664   :  { %v2744_v57 = vpack.c.bf16 %v2727_v41, %v2726_v31  ;;  %v4732_v37 = vunpack.i.l.bf16 %v4731_v20  ;;  %v4723_v40 = vunpack.i.h.bf16 %v6789_v29 }
 0x668   :  { %4234 = vmatmul.msk.bf16.gmra.mxu2 %vm84_vm2, %v2763_v43 }
 0x669   :  { %4855 = vrot.lane.b32.xlu2 %v4854_v46, %s5296_s23  ;;  %4845 = vrot.lane.b32.xlu1 %v4844_v21, %s5293_s6 }
 0x66a   :  { %4850 = vrot.lane.b32.xlu0 %v4849_v48, %s5295_s14 }
 0x66b   :  { %v4746_v27 = vpop.permute.xlu2 %4745 }
 0x66c   :  { %v4748_v38 = vunpack.i.h.bf16 %v4746_v27  ;;  %v4747_v34 = vunpack.i.l.bf16 %v4746_v27  ;;  %v2713_v27 = vsel %vm2658_vm0, %v2697_v50, %v4713_v63 }
 0x66e   :  { %v2724_v54 = vsel %vm2675_vm1, %v2708_v26, %v4748_v38  ;;  %v4693_v38 = vunpack.i.h.bf16 %v6745_v11  ;;  %v4722_v26 = vunpack.i.l.bf16 %v6789_v29  ;;  %v2698_v11 = vsel %vm84_vm2, %v6585_v45, %v4727_v58 }
 0x66f   :  { %v2741_v6 = vpack.c.bf16 %v2725_v22, %v2724_v54  ;;  %v2714_v59 = vsel %vm2658_vm0, %v2698_v11, %v4732_v37 }
 0x670   :  { %v2728_v39 = vsel %vm2675_vm1, %v2712_v55, %v4693_v38  ;;  %v2729_v54 = vsel %vm2675_vm1, %v2713_v27, %v4722_v26 }
 0x671   :  { %2993 = vmatmul.bf16.vlgmr.msra.gmra.mxu1 %v2741_v6  ;;  %v2747_v22 = vpack.c.bf16 %v2729_v54, %v2728_v39  ;;  %v4728_v6 = vunpack.i.h.bf16 %v4726_v35  ;;  %v2730_v35 = vsel %vm2675_vm1, %v2714_v59, %v4723_v40 }
 0x673   :  { %v4751_v52 = vpop.permute.xlu2 %4750  ;;  %v2699_v3 = vsel %vm84_vm2, %v6592_v32, %v4728_v6 }
 0x674   :  { %v4753_v21 = vunpack.i.h.bf16 %v4751_v52  ;;  %v4752_v30 = vunpack.i.l.bf16 %v4751_v52  ;;  %v2715_v12 = vsel %vm2658_vm0, %v2699_v3, %v4733_v5 }
 0x676   :  { %v2731_v47 = vsel %vm2675_vm1, %v2715_v12, %v4752_v30 }
 0x677   :  { %v2750_v31 = vpack.c.bf16 %v2731_v47, %v2730_v35 }
 0x681   :  { %2998 = vmatmul.bf16.gmra.mxu1 %v2744_v57 }
 0x684   :  { %v4741_v18 = vpop.permute.xlu1 %4740 }
 0x685   :  { %v4736_v7 = vpop.permute.xlu0 %4735  ;;  %v4743_v15 = vunpack.i.h.bf16 %v4741_v18  ;;  %v4742_v10 = vunpack.i.l.bf16 %v4741_v18 }
 0x686   :  { %v4738_v43 = vunpack.i.h.bf16 %v4736_v7  ;;  %v4737_v46 = vunpack.i.l.bf16 %v4736_v7 }
 0x688   :  { %v2651_v48 = vsel %vm84_vm2, %v6632_v61, %v4738_v43  ;;  %v2650_v60 = vsel %vm84_vm2, %v2121_v28, %v4737_v46 }
 0x689   :  { %v2668_v19 = vsel %vm2658_vm0, %v2651_v48, %v4743_v15  ;;  %v2667_v16 = vsel %vm2658_vm0, %v2650_v60, %v4742_v10 }
 0x68a   :  { %v2684_v1 = vsel %vm2675_vm1, %v2667_v16, %v4747_v34  ;;  %v2685_v61 = vsel %vm2675_vm1, %v2668_v19, %v4753_v21 }
 0x68b   :  { %v2752_v42 = vpack.c.bf16 %v2685_v61, %v2684_v1 }
 0x68c   :  { %v4756_v41 = vpop.permute.xlu1 %4755 }
 0x68d   :  { %2964 = vmatmul.bf16.gmra.mxu0 %v2752_v42  ;;  %v4758_v32 = vunpack.i.h.bf16 %v4756_v41  ;;  %v4757_v18 = vunpack.i.l.bf16 %v4756_v41 }
 0x68f   :  { %v2701_v29 = vsel %vm84_vm2, %v6671_v44, %v4758_v32  ;;  %v2700_v7 = vsel %vm84_vm2, %v6634_v53, %v4757_v18 }
 0x691   :  { %3003 = vmatmul.bf16.gmra.mxu1 %v2747_v22 }
 0x693   :  { %v4761_v56 = vpop.permute.xlu2 %4760 }
 0x694   :  { %v4763_v23 = vunpack.i.h.bf16 %v4761_v56  ;;  %v4762_v45 = vunpack.i.l.bf16 %v4761_v56 }
 0x696   :  { %v2652_v15 = vsel %vm84_vm2, %v6643_v33, %v4762_v45  ;;  %v2653_v10 = vsel %vm84_vm2, %v6687_v13, %v4763_v23 }
 0x69b   :  { %v4776_v20 = vpop.permute.xlu2 %4775 }
 0x69c   :  { %v4778_v48 = vunpack.i.h.bf16 %v4776_v20  ;;  %v4777_v60 = vunpack.i.l.bf16 %v4776_v20 }
 0x6a1   :  { %3008 = vmatmul.bf16.gmra.mxu1 %v2750_v31 }
 0x6a3   :  { %v4796_v62 = vpop.permute.xlu2 %4795 }
 0x6a4   :  { %v4798_v58 = vunpack.i.h.bf16 %v4796_v62  ;;  %v4797_v5 = vunpack.i.l.bf16 %v4796_v62 }
 0x6aa   :  { %v4766_v57 = vpop.permute.xlu0 %4765 }
 0x6ab   :  { %v4768_v52 = vunpack.i.h.bf16 %v4766_v57  ;;  %v4767_v28 = vunpack.i.l.bf16 %v4766_v57  ;;  %v4801_v1 = vpop.permute.xlu2 %4800 }
 0x6ac   :  { %v4803_v12 = vunpack.i.h.bf16 %v4801_v1  ;;  %v4802_v40 = vunpack.i.l.bf16 %v4801_v1 }
 0x6ad   :  { %v2669_v50 = vsel %vm2658_vm0, %v2652_v15, %v4767_v28  ;;  %v2670_v44 = vsel %vm2658_vm0, %v2653_v10, %v4768_v52 }
 0x6b2   :  { %v4771_v63 = vpop.permute.xlu0 %4770  ;;  %v4781_v49 = vpop.permute.xlu1 %4780 }
 0x6b3   :  { %v4773_v43 = vunpack.i.h.bf16 %v4771_v63  ;;  %v4772_v46 = vunpack.i.l.bf16 %v4771_v63  ;;  %v4783_v34 = vunpack.i.h.bf16 %v4781_v49  ;;  %v4782_v21 = vunpack.i.l.bf16 %v4781_v49  ;;  %v4816_v56 = vpop.permute.xlu2 %4815 }
 0x6b5   :  { %v2716_v53 = vsel %vm2658_vm0, %v2700_v7, %v4772_v46  ;;  %v2717_v36 = vsel %vm2658_vm0, %v2701_v29, %v4773_v43  ;;  %v2686_v33 = vsel %vm2675_vm1, %v2669_v50, %v4782_v21  ;;  %v2687_v13 = vsel %vm2675_vm1, %v2670_v44, %v4783_v34 }
 0x6b6   :  { %v2755_v19 = vpack.c.bf16 %v2687_v13, %v2686_v33  ;;  %v2732_v16 = vsel %vm2675_vm1, %v2716_v53, %v4777_v60  ;;  %v2733_v55 = vsel %vm2675_vm1, %v2717_v36, %v4778_v48  ;;  %v4818_v21 = vunpack.i.h.bf16 %v4816_v56 }
 0x6b7   :  { %v2753_v27 = vpack.c.bf16 %v2733_v55, %v2732_v16  ;;  %v4817_v48 = vunpack.i.l.bf16 %v4816_v56 }
 0x6b8   :  { %2969 = vmatmul.bf16.gmra.mxu0 %v2755_v19 }
 0x6b9   :  { %3013 = vmatmul.bf16.gmra.mxu1 %v2753_v27  ;;  %v2704_v19 = vsel %vm84_vm2, %v6714_v2, %v4817_v48  ;;  %v2945_v2 = vpop.f32.mrf.mxu0 }
 0x6ba   :  { %v4786_v61 = vpop.permute.xlu0 %4785 }
 0x6bb   :  { %v4791_v38 = vpop.permute.xlu1 %4790  ;;  %v4788_v39 = vunpack.i.h.bf16 %v4786_v61  ;;  %v4787_v54 = vunpack.i.l.bf16 %v4786_v61  ;;  %v4841_v15 = vpop.permute.xlu2 %4840 }
 0x6bc   :  { %v4793_v26 = vunpack.i.h.bf16 %v4791_v38  ;;  %v4792_v42 = vunpack.i.l.bf16 %v4791_v38  ;;  %v4843_v46 = vunpack.i.h.bf16 %v4841_v15  ;;  %v4842_v34 = vunpack.i.l.bf16 %v4841_v15 }
 0x6bd   :  { %v2703_v30 = vsel %vm84_vm2, %v6719_v24, %v4788_v39  ;;  %v2702_v3 = vsel %vm84_vm2, %v6673_v51, %v4787_v54 }
 0x6be   :  { %v2655_v22 = vsel %vm84_vm2, %v6741_v4, %v4793_v26  ;;  %v2654_v6 = vsel %vm84_vm2, %v6690_v17, %v4792_v42  ;;  %v2718_v57 = vsel %vm2658_vm0, %v2702_v3, %v4802_v40  ;;  %v2719_v51 = vsel %vm2658_vm0, %v2703_v30, %v4803_v12 }
 0x6bf   :  { %v2671_v4 = vsel %vm2658_vm0, %v2654_v6, %v4797_v5  ;;  %v2672_v35 = vsel %vm2658_vm0, %v2655_v22, %v4798_v58 }
 0x6c2   :  { %v4811_v37 = vpop.permute.xlu0 %4810 }
 0x6c3   :  { %v4813_v11 = vunpack.i.h.bf16 %v4811_v37  ;;  %v4812_v59 = vunpack.i.l.bf16 %v4811_v37  ;;  %v4806_v47 = vpop.permute.xlu1 %4805  ;;  %v4856_v37 = vpop.permute.xlu2 %4855 }
 0x6c4   :  { %v4808_v17 = vunpack.i.h.bf16 %v4806_v47  ;;  %v4807_v31 = vunpack.i.l.bf16 %v4806_v47  ;;  %v6914_v47 = vld [vmem:[%s7424_s16] ss:$0 sm:$0xff] }
 0x6c5   :  { %v2688_v20 = vsel %vm2675_vm1, %v2671_v4, %v4812_v59  ;;  %v2689_v41 = vsel %vm2675_vm1, %v2672_v35, %v4813_v11  ;;  %v4858_v11 = vunpack.i.h.bf16 %v4856_v37  ;;  %v4857_v59 = vunpack.i.l.bf16 %v4856_v37  ;;  %v2947_v4 = vpop.f32.mrf.mxu0 }
 0x6c6   :  { %v2758_v24 = vpack.c.bf16 %v2689_v41, %v2688_v20  ;;  %v2734_v32 = vsel %vm2675_vm1, %v2718_v57, %v4807_v31  ;;  %v2735_v18 = vsel %vm2675_vm1, %v2719_v51, %v4808_v17  ;;  %v3083_v57 = vld [vmem:[#allocation2 + $0x11] sm:$0xff]  ;;  %v2948_v51 = vadd.f32 %v6914_v47, %v2947_v4 }
 0x6c7   :  { %v2756_v23 = vpack.c.bf16 %v2735_v18, %v2734_v32  ;;  %v3087_v4 = vld [vmem:[#allocation2 + $0x51] sm:$0xff] }
 0x6c8   :  { %2974 = vmatmul.bf16.gmra.mxu0 %v2758_v24 }
 0x6c9   :  { %3018 = vmatmul.bf16.gmra.mxu1 %v2756_v23 }
 0x6cb   :  { %v4826_v62 = vpop.permute.xlu1 %4825 }
 0x6cc   :  { %v4821_v45 = vpop.permute.xlu0 %4820  ;;  %v4828_v29 = vunpack.i.h.bf16 %v4826_v62  ;;  %v4827_v7 = vunpack.i.l.bf16 %v4826_v62 }
 0x6cd   :  { %v4823_v52 = vunpack.i.h.bf16 %v4821_v45  ;;  %v4822_v28 = vunpack.i.l.bf16 %v4821_v45  ;;  %v2950_v41 = vpop.f32.mrf.mxu0 }
 0x6ce   :  { %v2951_v15 = vadd.f32 %v6914_v47, %v2950_v41 }
 0x6cf   :  { %v2656_v10 = vsel %vm84_vm2, %v6743_v9, %v4822_v28  ;;  %v2657_v63 = vsel %vm84_vm2, %v6777_v25, %v4823_v52  ;;  %v2705_v25 = vsel %vm84_vm2, %v6765_v14, %v4818_v21  ;;  %v3043_v14 = vpop.f32.mrf.mxu2 }
 0x6d0   :  { %v2674_v49 = vsel %vm2658_vm0, %v2657_v63, %v4828_v29  ;;  %v2673_v43 = vsel %vm2658_vm0, %v2656_v10, %v4827_v7  ;;  %v3084_v7 = vld [vmem:[#allocation2 + $0x21] sm:$0xff] }
 0x6d1   :  { %v2690_v60 = vsel %vm2675_vm1, %v2673_v43, %v4842_v34  ;;  %v2691_v50 = vsel %vm2675_vm1, %v2674_v49, %v4843_v46  ;;  %v3195_v49 = vld [vmem:[#allocation2 + $0x2] sm:$0xff] }
 0x6d2   :  { %v2761_v16 = vpack.c.bf16 %v2691_v50, %v2690_v60  ;;  %v3179_v43 = vld [vmem:[#allocation2 + $0x1] sm:$0xff] }
 0x6d3   :  { %v4831_v53 = vpop.permute.xlu1 %4830 }
 0x6d4   :  { %v4836_v44 = vpop.permute.xlu0 %4835  ;;  %v4833_v9 = vunpack.i.h.bf16 %v4831_v53  ;;  %v4832_v13 = vunpack.i.l.bf16 %v4831_v53 }
 0x6d5   :  { %v4838_v36 = vunpack.i.h.bf16 %v4836_v44  ;;  %v4837_v33 = vunpack.i.l.bf16 %v4836_v44  ;;  %v2952_v29 = vpop.f32.mrf.mxu0 }
 0x6d6   :  { %v2721_v55 = vsel %vm2658_vm0, %v2705_v25, %v4833_v9  ;;  %v2720_v27 = vsel %vm2658_vm0, %v2704_v19, %v4832_v13  ;;  %v2953_v9 = vadd.f32 %v6914_v47, %v2952_v29  ;;  %v3088_v29 = vld [vmem:[#allocation2 + $0x61] sm:$0xff] }
 0x6d7   :  { %v2736_v1 = vsel %vm2675_vm1, %v2720_v27, %v4837_v33  ;;  %v2737_v61 = vsel %vm2675_vm1, %v2721_v55, %v4838_v36  ;;  %v3045_v56 = vpop.f32.mrf.mxu2  ;;  %v3085_v33 = vld [vmem:[#allocation2 + $0x31] sm:$0xff] }
 0x6d8   :  { %2979 = vmatmul.bf16.gmra.mxu0 %v2761_v16  ;;  %v2759_v38 = vpack.c.bf16 %v2737_v61, %v2736_v1 }
 0x6da   :  { %3023 = vmatmul.bf16.gmra.mxu1 %v2759_v38 }
 0x6db   :  { %v4846_v42 = vpop.permute.xlu1 %4845 }
 0x6dc   :  { %v4851_v26 = vpop.permute.xlu0 %4850  ;;  %v4848_v39 = vunpack.i.h.bf16 %v4846_v42  ;;  %v4847_v54 = vunpack.i.l.bf16 %v4846_v42 }
 0x6dd   :  { %v4853_v22 = vunpack.i.h.bf16 %v4851_v26  ;;  %v4852_v6 = vunpack.i.l.bf16 %v4851_v26  ;;  %v2955_v36 = vpop.f32.mrf.mxu0 }
 0x6de   :  { %v2707_v58 = vsel %vm84_vm2, %v6791_v0, %v4848_v39  ;;  %v2706_v5 = vsel %vm84_vm2, %v6762_v8, %v4847_v54  ;;  %v2946_v8 = vadd.f32 %v6914_v47, %v2945_v2 }
 0x6df   :  { %v2722_v30 = vsel %vm2658_vm0, %v2706_v5, %v4852_v6  ;;  %v2723_v3 = vsel %vm2658_vm0, %v2707_v58, %v4853_v22  ;;  %v3048_v20 = vpop.f32.mrf.mxu2  ;;  %v3086_v22 = vld [vmem:[#allocation2 + $0x41] sm:$0xff]  ;;  %v2956_v6 = vadd.f32 %v6914_v47, %v2955_v36 }
 0x6e0   :  { %v2738_v12 = vsel %vm2675_vm1, %v2722_v30, %v4857_v59  ;;  %v2739_v40 = vsel %vm2675_vm1, %v2723_v3, %v4858_v11 }
 0x6e1   :  { %v2762_v0 = vpack.c.bf16 %v2739_v40, %v2738_v12 }
 0x6e5   :  { %v2957_v58 = vpop.f32.mrf.mxu0 }
 0x6e7   :  { %v3050_v28 = vpop.f32.mrf.mxu2 }
 0x6ea   :  { %3028 = vmatmul.bf16.gmra.mxu1 %v2762_v0 }
 0x6ee   :  { %v2994_v35 = vpop.f32.mrf.mxu1 }
 0x6ef   :  { %v2995_v17 = vadd.f32 %v2994_v35, %v2946_v8  ;;  %v3053_v25 = vpop.f32.mrf.mxu2  ;;  %v2958_v8 = vadd.f32 %v6914_v47, %v2957_v58 }
 0x6f1   :  { %v3044_v31 = vadd.f32 %v3043_v14, %v2995_v17  ;;  %v2960_v17 = vpop.f32.mrf.mxu0 }
 0x6f3   :  { %v3099_v24 = vmul.f32 0.99766725, %v3044_v31 }
 0x6f5   :  { %v3115_v32 = vsub.f32 %v3083_v57, %v3099_v24 }
 0x6f6   :  { %v2996_v18 = vpop.f32.mrf.mxu1 }
 0x6f7   :  { %v3131_v23 = vmul.f32 80.42171, %v3115_v32  ;;  %v2997_v45 = vadd.f32 %v2996_v18, %v2948_v51  ;;  %v3055_v3 = vpop.f32.mrf.mxu2 }
 0x6f9   :  { %3147 = vst.msk [vmem:[#allocation2 + $0x11] sm:$0xff] %vm532_vm4, %v3131_v23  ;;  %v3046_v62 = vadd.f32 %v3045_v56, %v2997_v45 }
 0x6fb   :  { %v3100_v52 = vmul.f32 0.99766725, %v3046_v62 }
 0x6fd   :  { %v3116_v10 = vsub.f32 %v3084_v7, %v3100_v52  ;;  %v2961_v7 = vadd.f32 %v6914_v47, %v2960_v17 }
 0x6fe   :  { %v2999_v63 = vpop.f32.mrf.mxu1 }
 0x6ff   :  { %v3132_v46 = vmul.f32 80.42171, %v3116_v10  ;;  %v3000_v34 = vadd.f32 %v2999_v63, %v2951_v15  ;;  %v3058_v52 = vpop.f32.mrf.mxu2 }
 0x700   :  { %v6920_v21 = vld [vmem:[#allocation2 + $0x12] sm:$0xff] }
 0x701   :  { %v6922_v48 = vld [vmem:[#allocation2 + $0x11] sm:$0xff]  ;;  %3148 = vst.msk [vmem:[#allocation2 + $0x21] sm:$0xff] %vm532_vm4, %v3132_v46  ;;  %v3049_v60 = vadd.f32 %v3048_v20, %v3000_v34  ;;  %v4864_v50 = vpack.i.bf16 %v6920_v21, %v3195_v49 }
 0x702   :  { %v4859_v44 = vpack.i.bf16 %v6922_v48, %v3179_v43  ;;  %v6930_v27 = vld [vmem:[#allocation2 + $0x10] sm:$0xff]  ;;  %v2962_v43 = vpop.f32.mrf.mxu0 }
 0x703   :  { %v3101_v53 = vmul.f32 0.99766725, %v3049_v60  ;;  %4865 = vrot.lane.b32.xlu2 %v4864_v50, %s5292_s20 }
 0x704   :  { %4860 = vrot.lane.b32.xlu1 %v4859_v44, %s5285_s28 }
 0x705   :  { %v3117_v13 = vsub.f32 %v3085_v33, %v3101_v53  ;;  %v3089_v33 = vld [vmem:[#allocation2 + $0x71] sm:$0xff] }
 0x706   :  { %v3001_v19 = vpop.f32.mrf.mxu1 }
 0x707   :  { %v3133_v16 = vmul.f32 80.42171, %v3117_v13  ;;  %v3002_v55 = vadd.f32 %v3001_v19, %v2953_v9  ;;  %v3060_v36 = vpop.f32.mrf.mxu2  ;;  %v2963_v9 = vadd.f32 %v6914_v47, %v2962_v43 }
 0x708   :  { %v6932_v1 = vld [vmem:[#allocation2 + $0x20] sm:$0xff] }
 0x709   :  { %v6934_v61 = vld [vmem:[#allocation2 + $0x21] sm:$0xff]  ;;  %3149 = vst.msk [vmem:[#allocation2 + $0x31] sm:$0xff] %vm532_vm4, %v3133_v16  ;;  %v3051_v26 = vadd.f32 %v3050_v28, %v3002_v55  ;;  %v4869_v42 = vpack.i.bf16 %v6932_v1, %v6930_v27 }
 0x70a   :  { %v6936_v38 = vld [vmem:[#allocation2 + $0x22] sm:$0xff]  ;;  %v5154_v39 = vpack.i.bf16 %v6934_v61, %v6922_v48 }
 0x70b   :  { %v5159_v54 = vpack.i.bf16 %v6936_v38, %v6920_v21  ;;  %v3102_v14 = vmul.f32 0.99766725, %v3051_v26  ;;  %4870 = vrot.lane.b32.xlu0 %v4869_v42, %s5289_s27  ;;  %v2965_v26 = vpop.f32.mrf.mxu0 }
 0x70d   :  { %v3118_v2 = vsub.f32 %v3086_v22, %v3102_v14 }
 0x70e   :  { %v3004_v5 = vpop.f32.mrf.mxu1 }
 0x70f   :  { %v3134_v37 = vmul.f32 80.42171, %v3118_v2  ;;  %v3005_v30 = vadd.f32 %v3004_v5, %v2956_v6 }
 0x710   :  { %v6947_v11 = vld [vmem:[#allocation2 + $0x31] sm:$0xff] }
 0x711   :  { %v6949_v59 = vld [vmem:[#allocation2 + $0x32] sm:$0xff]  ;;  %3150 = vst.msk [vmem:[#allocation2 + $0x41] sm:$0xff] %vm532_vm4, %v3134_v37  ;;  %v3054_v12 = vadd.f32 %v3053_v25, %v3005_v30  ;;  %v6954_v40 = vpack.i.bf16 %v6947_v11, %v6934_v61  ;;  %v3063_v30 = vpop.f32.mrf.mxu2 }
 0x712   :  { %v6958_v56 = vpack.i.bf16 %v6949_v59, %v6936_v38  ;;  %v6965_v24 = vld [vmem:[#allocation2 + $0x30] sm:$0xff] }
 0x713   :  { %v3103_v0 = vmul.f32 0.99766725, %v3054_v12  ;;  %4875 = vrot.lane.b32.xlu0 %v6954_v40, %s5285_s28 }
 0x714   :  { %4880 = vrot.lane.b32.xlu1 %v6958_v56, %s5292_s20 }
 0x715   :  { %v3119_v35 = vsub.f32 %v3087_v4, %v3103_v0 }
 0x716   :  { %v3006_v31 = vpop.f32.mrf.mxu1 }
 0x717   :  { %v3135_v20 = vmul.f32 80.42171, %v3119_v35  ;;  %v3007_v41 = vadd.f32 %v3006_v31, %v2958_v8  ;;  %v2967_v31 = vpop.f32.mrf.mxu0 }
 0x718   :  { %v6967_v57 = vld [vmem:[#allocation2 + $0x40] sm:$0xff] }
 0x719   :  { %v6969_v51 = vld [vmem:[#allocation2 + $0x42] sm:$0xff]  ;;  %3151 = vst.msk [vmem:[#allocation2 + $0x51] sm:$0xff] %vm532_vm4, %v3135_v20  ;;  %v3056_v18 = vadd.f32 %v3055_v3, %v3007_v41  ;;  %v4884_v23 = vpack.i.bf16 %v6967_v57, %v6965_v24  ;;  %v3065_v20 = vpop.f32.mrf.mxu2  ;;  %v2966_v41 = vadd.f32 %v6914_v47, %v2965_v26 }
 0x71a   :  { %v6971_v32 = vld [vmem:[#allocation2 + $0x41] sm:$0xff]  ;;  %v5134_v45 = vpack.i.bf16 %v6969_v51, %v6949_v59 }
 0x71b   :  { %v5129_v62 = vpack.i.bf16 %v6971_v32, %v6947_v11  ;;  %v3104_v28 = vmul.f32 0.99766725, %v3056_v18  ;;  %4885 = vrot.lane.b32.xlu2 %v4884_v23, %s5289_s27  ;;  %v3090_v3 = vld [vmem:[#allocation2 + $0x81] sm:$0xff] }
 0x71d   :  { %v3120_v15 = vsub.f32 %v3088_v29, %v3104_v28 }
 0x71e   :  { %v3009_v10 = vpop.f32.mrf.mxu1 }
 0x71f   :  { %v3136_v63 = vmul.f32 80.42171, %v3120_v15  ;;  %v3010_v49 = vadd.f32 %v3009_v10, %v2961_v7 }
 0x720   :  { %v6982_v46 = vld [vmem:[#allocation2 + $0x52] sm:$0xff] }
 0x721   :  { %v6984_v34 = vld [vmem:[#allocation2 + $0x51] sm:$0xff]  ;;  %3152 = vst.msk [vmem:[#allocation2 + $0x61] sm:$0xff] %vm532_vm4, %v3136_v63  ;;  %v3059_v60 = vadd.f32 %v3058_v52, %v3010_v49  ;;  %v6989_v50 = vpack.i.bf16 %v6982_v46, %v6969_v51  ;;  %v2968_v49 = vadd.f32 %v6914_v47, %v2967_v31 }
 0x722   :  { %v6993_v44 = vpack.i.bf16 %v6984_v34, %v6971_v32  ;;  %v7000_v55 = vld [vmem:[#allocation2 + $0x50] sm:$0xff] }
 0x723   :  { %v3105_v53 = vmul.f32 0.99766725, %v3059_v60  ;;  %4895 = vrot.lane.b32.xlu0 %v6989_v50, %s5292_s20  ;;  %v3091_v63 = vld [vmem:[#allocation2 + $0xb1] sm:$0xff] }
 0x724   :  { %4890 = vrot.lane.b32.xlu2 %v6993_v44, %s5285_s28 }
 0x725   :  { %v3121_v13 = vsub.f32 %v3089_v33, %v3105_v53  ;;  %v3068_v53 = vpop.f32.mrf.mxu2 }
 0x726   :  { %v3011_v25 = vpop.f32.mrf.mxu1 }
 0x727   :  { %v3137_v19 = vmul.f32 80.42171, %v3121_v13  ;;  %v3012_v16 = vadd.f32 %v3011_v25, %v2963_v9 }
 0x728   :  { %v7002_v42 = vld [vmem:[#allocation2 + $0x60] sm:$0xff] }
 0x729   :  { %v7004_v14 = vld [vmem:[#allocation2 + $0x62] sm:$0xff]  ;;  %3153 = vst.msk [vmem:[#allocation2 + $0x71] sm:$0xff] %vm532_vm4, %v3137_v19  ;;  %v3061_v6 = vadd.f32 %v3060_v36, %v3012_v16  ;;  %v4899_v2 = vpack.i.bf16 %v7002_v42, %v7000_v55 }
 0x72a   :  { %v7006_v22 = vld [vmem:[#allocation2 + $0x61] sm:$0xff]  ;;  %v5109_v5 = vpack.i.bf16 %v7004_v14, %v6982_v46 }
 0x72b   :  { %v5104_v58 = vpack.i.bf16 %v7006_v22, %v6984_v34  ;;  %v3106_v37 = vmul.f32 0.99766725, %v3061_v6  ;;  %4900 = vrot.lane.b32.xlu1 %v4899_v2, %s5289_s27  ;;  %v3092_v19 = vld [vmem:[#allocation2 + $0xc1] sm:$0xff] }
 0x72c   :  { %v3187_v2 = vld [vmem:[#allocation2 + $0xa1] sm:$0xff] }
 0x72d   :  { %v3122_v12 = vsub.f32 %v3090_v3, %v3106_v37  ;;  %v3203_v37 = vld [vmem:[#allocation2 + $0xa2] sm:$0xff]  ;;  %v3070_v31 = vpop.f32.mrf.mxu2 }
 0x72f   :  { %v3138_v0 = vmul.f32 80.42171, %v3122_v12 }
 0x730   :  { %v7016_v4 = vld [vmem:[#allocation2 + $0x72] sm:$0xff] }
 0x731   :  { %v7018_v8 = vld [vmem:[#allocation2 + $0x71] sm:$0xff]  ;;  %3154 = vst.msk [vmem:[#allocation2 + $0x81] sm:$0xff] %vm532_vm4, %v3138_v0  ;;  %v7023_v35 = vpack.i.bf16 %v7016_v4, %v7004_v14 }
 0x732   :  { %v7027_v17 = vpack.i.bf16 %v7018_v8, %v7006_v22  ;;  %v7034_v52 = vld [vmem:[#allocation2 + $0x70] sm:$0xff] }
 0x733   :  { %4910 = vrot.lane.b32.xlu2 %v7023_v35, %s5292_s20  ;;  %v5114_v22 = vpack.i.bf16 %v7034_v52, %v7002_v42 }
 0x734   :  { %4905 = vrot.lane.b32.xlu1 %v7027_v17, %s5285_s28 }
 0x735   :  { %v2970_v7 = vpop.f32.mrf.mxu0 }
 0x736   :  { %v3014_v18 = vpop.f32.mrf.mxu1  ;;  %v2971_v16 = vadd.f32 %v6914_v47, %v2970_v7 }
 0x737   :  { %v3015_v23 = vadd.f32 %v3014_v18, %v2966_v41 }
 0x738   :  { %v7036_v28 = vld [vmem:[#allocation2 + $0x80] sm:$0xff] }
 0x739   :  { %v4914_v29 = vpack.i.bf16 %v7036_v28, %v7034_v52  ;;  %v3064_v15 = vadd.f32 %v3063_v30, %v3015_v23 }
 0x73b   :  { %4915 = vrot.lane.b32.xlu0 %v4914_v29, %s5289_s27  ;;  %v3107_v10 = vmul.f32 0.99766725, %v3064_v15  ;;  %v3093_v29 = vld [vmem:[#allocation2 + $0xd1] sm:$0xff] }
 0x73d   :  { %v3123_v43 = vsub.f32 %v3091_v63, %v3107_v10  ;;  %v2972_v13 = vpop.f32.mrf.mxu0 }
 0x73e   :  { %v3016_v60 = vpop.f32.mrf.mxu1  ;;  %v2973_v7 = vadd.f32 %v6914_v47, %v2972_v13  ;;  %v3073_v13 = vpop.f32.mrf.mxu2 }
 0x73f   :  { %v3139_v36 = vmul.f32 80.42171, %v3123_v43  ;;  %v3017_v33 = vadd.f32 %v3016_v60, %v2968_v49 }
 0x741   :  { %3155 = vst.msk [vmem:[#allocation2 + $0xb1] sm:$0xff] %vm532_vm4, %v3139_v36  ;;  %v3066_v9 = vadd.f32 %v3065_v20, %v3017_v33 }
 0x743   :  { %v3108_v25 = vmul.f32 0.99766725, %v3066_v9 }
 0x745   :  { %v3124_v26 = vsub.f32 %v3092_v19, %v3108_v25  ;;  %v2975_v15 = vpop.f32.mrf.mxu0 }
 0x746   :  { %v3019_v6 = vpop.f32.mrf.mxu1 }
 0x747   :  { %v3140_v30 = vmul.f32 80.42171, %v3124_v26  ;;  %v3020_v3 = vadd.f32 %v3019_v6, %v2971_v16  ;;  %v3094_v6 = vld [vmem:[#allocation2 + $0xe1] sm:$0xff] }
 0x748   :  { %v3188_v12 = vld [vmem:[#allocation2 + $0xb1] sm:$0xff] }
 0x749   :  { %v3204_v0 = vld [vmem:[#allocation2 + $0xb2] sm:$0xff]  ;;  %3156 = vst.msk [vmem:[#allocation2 + $0xc1] sm:$0xff] %vm532_vm4, %v3140_v30  ;;  %v3069_v41 = vadd.f32 %v3068_v53, %v3020_v3  ;;  %v4919_v18 = vpack.i.bf16 %v3188_v12, %v3187_v2 }
 0x74a   :  { %v4924_v23 = vpack.i.bf16 %v3204_v0, %v3203_v37  ;;  %v7048_v60 = vld [vmem:[#allocation2 + $0xb0] sm:$0xff]  ;;  %v2976_v37 = vadd.f32 %v6914_v47, %v2975_v15 }
 0x74b   :  { %v3109_v20 = vmul.f32 0.99766725, %v3069_v41  ;;  %4920 = vrot.lane.b32.xlu0 %v4919_v18, %s5285_s28  ;;  %v3095_v15 = vld [vmem:[#allocation2 + $0xf1] sm:$0xff] }
 0x74c   :  { %4925 = vrot.lane.b32.xlu1 %v4924_v23, %s5292_s20 }
 0x74d   :  { %v3125_v10 = vsub.f32 %v3093_v29, %v3109_v20  ;;  %v2977_v30 = vpop.f32.mrf.mxu0 }
 0x74e   :  { %v3021_v63 = vpop.f32.mrf.mxu1 }
 0x74f   :  { %v3141_v49 = vmul.f32 80.42171, %v3125_v10  ;;  %v3022_v43 = vadd.f32 %v3021_v63, %v2973_v7  ;;  %v3075_v7 = vpop.f32.mrf.mxu2  ;;  %v2978_v10 = vadd.f32 %v6914_v47, %v2977_v30  ;;  %v3096_v30 = vld [vmem:[#allocation2 + $0x101] sm:$0xff] }
 0x750   :  { %v3252_v36 = vld [vmem:[#allocation2 + $0xc2] sm:$0xff] }
 0x751   :  { %v7050_v33 = vld [vmem:[#allocation2 + $0xc0] sm:$0xff]  ;;  %3157 = vst.msk [vmem:[#allocation2 + $0xd1] sm:$0xff] %vm532_vm4, %v3141_v49  ;;  %v3071_v9 = vadd.f32 %v3070_v31, %v3022_v43  ;;  %v4939_v25 = vpack.i.bf16 %v3252_v36, %v3204_v0 }
 0x752   :  { %v3236_v53 = vld [vmem:[#allocation2 + $0xc1] sm:$0xff]  ;;  %v4929_v19 = vpack.i.bf16 %v7050_v33, %v7048_v60 }
 0x753   :  { %v4934_v16 = vpack.i.bf16 %v3236_v53, %v3188_v12  ;;  %v3110_v26 = vmul.f32 0.99766725, %v3071_v9  ;;  %4940 = vrot.lane.b32.xlu0 %v4939_v25, %s5290_s30 }
 0x754   :  { %4930 = vrot.lane.b32.xlu2 %v4929_v19, %s5289_s27 }
 0x755   :  { %4935 = vrot.lane.b32.xlu1 %v4934_v16, %s5288_s7  ;;  %v3126_v2 = vsub.f32 %v3094_v6, %v3110_v26  ;;  %v2980_v16 = vpop.f32.mrf.mxu0 }
 0x757   :  { %v3142_v3 = vmul.f32 80.42171, %v3126_v2  ;;  %v3024_v31 = vpop.f32.mrf.mxu1 }
 0x758   :  { %v3025_v0 = vadd.f32 %v3024_v31, %v2976_v37  ;;  %v3206_v41 = vld [vmem:[#allocation2 + $0xd2] sm:$0xff] }
 0x759   :  { %v3190_v18 = vld [vmem:[#allocation2 + $0xd1] sm:$0xff]  ;;  %3158 = vst.msk [vmem:[#allocation2 + $0xe1] sm:$0xff] %vm532_vm4, %v3142_v3  ;;  %v7060_v12 = vpack.i.bf16 %v3206_v41, %v3252_v36  ;;  %v2981_v3 = vadd.f32 %v6914_v47, %v2980_v16 }
 0x75a   :  { %v7062_v23 = vpack.i.bf16 %v3190_v18, %v3236_v53  ;;  %v3074_v20 = vadd.f32 %v3073_v13, %v3025_v0  ;;  %v7069_v43 = vld [vmem:[#allocation2 + $0xd0] sm:$0xff]  ;;  %v3078_v0 = vpop.f32.mrf.mxu2 }
 0x75b   :  { %4950 = vrot.lane.b32.xlu0 %v7060_v12, %s5292_s20 }
 0x75c   :  { %4945 = vrot.lane.b32.xlu2 %v7062_v23, %s5285_s28  ;;  %v3111_v29 = vmul.f32 0.99766725, %v3074_v20 }
 0x75e   :  { %v3127_v63 = vsub.f32 %v3095_v15, %v3111_v29 }
 0x75f   :  { %v3026_v49 = vpop.f32.mrf.mxu1 }
 0x760   :  { %v3143_v36 = vmul.f32 80.42171, %v3127_v63  ;;  %v3027_v9 = vadd.f32 %v3026_v49, %v2978_v10  ;;  %v3238_v53 = vld [vmem:[#allocation2 + $0xe1] sm:$0xff]  ;;  %v2982_v49 = vpop.f32.mrf.mxu0 }
 0x761   :  { %v3254_v25 = vld [vmem:[#allocation2 + $0xe2] sm:$0xff]  ;;  %v4959_v13 = vpack.i.bf16 %v3238_v53, %v3190_v18  ;;  %v2983_v16 = vadd.f32 %v6914_v47, %v2982_v49 }
 0x762   :  { %v7071_v19 = vld [vmem:[#allocation2 + $0xe0] sm:$0xff]  ;;  %v4964_v26 = vpack.i.bf16 %v3254_v25, %v3206_v41  ;;  %3159 = vst.msk [vmem:[#allocation2 + $0xf1] sm:$0xff] %vm532_vm4, %v3143_v36  ;;  %v3076_v2 = vadd.f32 %v3075_v7, %v3027_v9  ;;  %v3097_v9 = vld [vmem:[#allocation2 + $0x111] sm:$0xff] }
 0x763   :  { %v4954_v6 = vpack.i.bf16 %v7071_v19, %v7069_v43  ;;  %4960 = vrot.lane.b32.xlu0 %v4959_v13, %s5288_s7 }
 0x764   :  { %4965 = vrot.lane.b32.xlu2 %v4964_v26, %s5290_s30  ;;  %v3112_v37 = vmul.f32 0.99766725, %v3076_v2 }
 0x765   :  { %4955 = vrot.lane.b32.xlu1 %v4954_v6, %s5289_s27 }
 0x766   :  { %v3128_v31 = vsub.f32 %v3096_v30, %v3112_v37  ;;  %v3080_v30 = vpop.f32.mrf.mxu2 }
 0x767   :  { %v3029_v18 = vpop.f32.mrf.mxu1 }
 0x768   :  { %v3144_v41 = vmul.f32 80.42171, %v3128_v31  ;;  %v3030_v20 = vadd.f32 %v3029_v18, %v2981_v3  ;;  %v4866_v31 = vpop.permute.xlu2 %4865  ;;  %v3163_v18 = vld [vmem:[#allocation2] sm:$0xff] }
 0x769   :  { %v3286_v29 = vld [vmem:[#allocation2 + $0xf1] sm:$0xff]  ;;  %v4868_v49 = vunpack.i.h.bf16 %v4866_v31 }
 0x76a   :  { %v3208_v15 = vld [vmem:[#allocation2 + $0xf2] sm:$0xff]  ;;  %3160 = vst.msk [vmem:[#allocation2 + $0x101] sm:$0xff] %vm532_vm4, %v3144_v41  ;;  %v3079_v7 = vadd.f32 %v3078_v0, %v3030_v20  ;;  %v4984_v10 = vpack.i.bf16 %v3286_v29, %v3238_v53  ;;  %v3098_v20 = vld [vmem:[#allocation2 + $0x121] sm:$0xff] }
 0x76b   :  { %v4974_v63 = vpack.i.bf16 %v3208_v15, %v3254_v25  ;;  %v7085_v37 = vld [vmem:[#allocation2 + $0xf0] sm:$0xff] }
 0x76c   :  { %v3113_v36 = vmul.f32 0.99766725, %v3079_v7  ;;  %4985 = vrot.lane.b32.xlu0 %v4984_v10, %s5294_s8  ;;  %v4979_v0 = vpack.i.bf16 %v7085_v37, %v7071_v19 }
 0x76d   :  { %4975 = vrot.lane.b32.xlu2 %v4974_v63, %s5292_s20  ;;  %4970 = vrot.lane.b32.xlu1 %v4984_v10, %s5285_s28 }
 0x76e   :  { %v3129_v13 = vsub.f32 %v3097_v9, %v3113_v36  ;;  %v4867_v36 = vunpack.i.l.bf16 %v4866_v31 }
 0x76f   :  { %v3031_v26 = vpop.f32.mrf.mxu1 }
 0x770   :  { %v3145_v6 = vmul.f32 80.42171, %v3129_v13  ;;  %v3032_v2 = vadd.f32 %v3031_v26, %v2983_v16 }
 0x771   :  { %v7087_v53 = vld [vmem:[#allocation2 + $0x100] sm:$0xff] }
 0x772   :  { %3161 = vst.msk [vmem:[#allocation2 + $0x111] sm:$0xff] %vm532_vm4, %v3145_v6  ;;  %v3081_v25 = vadd.f32 %v3080_v30, %v3032_v2  ;;  %v4994_v3 = vpack.i.bf16 %v7087_v53, %v7085_v37  ;;  %v3193_v26 = vld [vmem:[#allocation2 + $0x101] sm:$0xff] }
 0x773   :  { %v3256_v2 = vld [vmem:[#allocation2 + $0x102] sm:$0xff] }
 0x774   :  { %v3114_v47 = vmul.f32 0.99766725, %v3081_v25  ;;  %4995 = vrot.lane.b32.xlu0 %v4994_v3, %s5289_s27 }
 0x775   :  { %4990 = vrot.lane.b32.xlu2 %v4974_v63, %s5293_s6  ;;  %4980 = vrot.lane.b32.xlu1 %v4979_v0, %s5291_s21  ;;  %v4999_v0 = vpack.i.bf16 %v3193_v26, %v3286_v29 }
 0x776   :  { %v4861_v41 = vpop.permute.xlu1 %4860  ;;  %v3130_v9 = vsub.f32 %v3098_v20, %v3114_v47 }
 0x777   :  { %v4863_v7 = vunpack.i.h.bf16 %v4861_v41  ;;  %v4862_v10 = vunpack.i.l.bf16 %v4861_v41  ;;  %v5004_v41 = vpack.i.bf16 %v3256_v2, %v3208_v15  ;;  %v4886_v15 = vpop.permute.xlu2 %4885 }
 0x778   :  { %v3146_v6 = vmul.f32 80.42171, %v3130_v9 }
 0x779   :  { %v3819_v16 = vsel %vm532_vm4, %v3163_v18, %v4862_v10  ;;  %v3820_v13 = vsel %vm532_vm4, %v6930_v27, %v4863_v7  ;;  %v3194_v25 = vld [vmem:[#allocation2 + $0x111] sm:$0xff] }
 0x77a   :  { %v3835_v63 = vsel %vm1305_vm7, %v3819_v16, %v4867_v36  ;;  %v3836_v30 = vsel %vm1305_vm7, %v3820_v13, %v4868_v49  ;;  %3162 = vst.msk [vmem:[#allocation2 + $0x121] sm:$0xff] %vm532_vm4, %v3146_v6  ;;  %v5009_v3 = vpack.i.bf16 %v3194_v25, %v3193_v26  ;;  %v7112_v7 = vld [vmem:[#allocation2 + $0x110] sm:$0xff] }
 0x77b   :  { %v3210_v10 = vld [vmem:[#allocation2 + $0x112] sm:$0xff]  ;;  %v5019_v29 = vpack.i.bf16 %v7112_v7, %v7087_v53 }
 0x77c   :  { %5010 = vrot.lane.b32.xlu0 %v5009_v3, %s5285_s28  ;;  %v5014_v49 = vpack.i.bf16 %v3210_v10, %v3256_v2 }
 0x77d   :  { %5000 = vrot.lane.b32.xlu2 %v4999_v0, %s5288_s7  ;;  %v4871_v31 = vpop.permute.xlu0 %4870  ;;  %5005 = vrot.lane.b32.xlu1 %v5004_v41, %s5290_s30 }
 0x77e   :  { %v4873_v27 = vunpack.i.h.bf16 %v4871_v31  ;;  %v4872_v47 = vunpack.i.l.bf16 %v4871_v31 }
 0x780   :  { %v7107_v18 = vsel %vm1322_vm8, %v3835_v63, %v4872_v47  ;;  %v7110_v20 = vsel %vm1322_vm8, %v3836_v30, %v4873_v27  ;;  %v4888_v63 = vunpack.i.h.bf16 %v4886_v15  ;;  %v4887_v30 = vunpack.i.l.bf16 %v4886_v15 }
 0x781   :  { %v3258_v41 = vld [vmem:[#allocation2 + $0x122] sm:$0xff] }
 0x782   :  { %v3226_v31 = vld [vmem:[#allocation2 + $0x120] sm:$0xff] }
 0x783   :  { %v5034_v15 = vpack.i.bf16 %v3226_v31, %v7112_v7 }
 0x784   :  { %5020 = vrot.lane.b32.xlu0 %v5019_v29, %s5291_s21 }
 0x785   :  { %5025 = vrot.lane.b32.xlu2 %v5009_v3, %s5294_s8  ;;  %v4876_v36 = vpop.permute.xlu0 %4875  ;;  %5015 = vrot.lane.b32.xlu1 %v5014_v49, %s5292_s20 }
 0x786   :  { %v4881_v9 = vpop.permute.xlu1 %4880  ;;  %v4878_v16 = vunpack.i.h.bf16 %v4876_v36  ;;  %v4877_v13 = vunpack.i.l.bf16 %v4876_v36  ;;  %v5044_v36 = vpack.i.bf16 %v3258_v41, %v3210_v10 }
 0x787   :  { %v4883_v26 = vunpack.i.h.bf16 %v4881_v9  ;;  %v4882_v6 = vunpack.i.l.bf16 %v4881_v9  ;;  %v4891_v9 = vpop.permute.xlu2 %4890 }
 0x788   :  { %v3822_v0 = vsel %vm532_vm4, %v6965_v24, %v4878_v16  ;;  %v3821_v2 = vsel %vm532_vm4, %v6932_v1, %v4877_v13  ;;  %v3306_v16 = vld [vmem:[#allocation2 + $0x132] sm:$0xff] }
 0x789   :  { %v3838_v3 = vsel %vm1305_vm7, %v3822_v0, %v4883_v26  ;;  %v3837_v27 = vsel %vm1305_vm7, %v3821_v2, %v4882_v6  ;;  %v3274_v13 = vld [vmem:[#allocation2 + $0x130] sm:$0xff]  ;;  %v3242_v26 = vld [vmem:[#allocation2 + $0x121] sm:$0xff]  ;;  %v4893_v6 = vunpack.i.h.bf16 %v4891_v9  ;;  %v4892_v0 = vunpack.i.l.bf16 %v4891_v9 }
 0x78a   :  { %v7126_v47 = vsel %vm1322_vm8, %v3837_v27, %v4887_v30  ;;  %v7129_v29 = vsel %vm1322_vm8, %v3838_v3, %v4888_v63  ;;  %v5069_v30 = vpack.i.bf16 %v3306_v16, %v3258_v41  ;;  %v5049_v2 = vpack.i.bf16 %v3274_v13, %v3226_v31 }
 0x78b   :  { %v5039_v27 = vpack.i.bf16 %v3242_v26, %v3194_v25  ;;  %v3290_v25 = vld [vmem:[#allocation2 + $0x131] sm:$0xff]  ;;  %v5054_v31 = vpack.i.bf16 %v7069_v43, %v7050_v33 }
 0x78c   :  { %5045 = vrot.lane.b32.xlu0 %v5044_v36, %s5290_s30  ;;  %v3823_v36 = vsel %vm532_vm4, %v6967_v57, %v4892_v0  ;;  %v5059_v9 = vpack.i.bf16 %v3290_v25, %v3242_v26  ;;  %v3250_v25 = vld [vmem:[#allocation2 + $0x82] sm:$0xff] }
 0x78d   :  { %5035 = vrot.lane.b32.xlu2 %v5034_v15, %s5289_s27  ;;  %5030 = vrot.lane.b32.xlu1 %v5014_v49, %s5293_s6  ;;  %v3824_v49 = vsel %vm532_vm4, %v7000_v55, %v4893_v6 }
 0x794   :  { %5070 = vrot.lane.b32.xlu0 %v5069_v30, %s5293_s6 }
 0x795   :  { %5050 = vrot.lane.b32.xlu2 %v5049_v2, %s5291_s21  ;;  %v4896_v10 = vpop.permute.xlu0 %4895  ;;  %5040 = vrot.lane.b32.xlu1 %v5039_v27, %s5288_s7  ;;  %v3266_v2 = vld [vmem:[#allocation2 + $0x90] sm:$0xff]  ;;  %v3234_v27 = vld [vmem:[#allocation2 + $0x81] sm:$0xff] }
 0x796   :  { %v4898_v63 = vunpack.i.h.bf16 %v4896_v10  ;;  %v4897_v3 = vunpack.i.l.bf16 %v4896_v10  ;;  %v5089_v26 = vpack.i.bf16 %v3266_v2, %v7036_v28  ;;  %v5079_v10 = vpack.i.bf16 %v3234_v27, %v7018_v8  ;;  %v3282_v8 = vld [vmem:[#allocation2 + $0x91] sm:$0xff] }
 0x798   :  { %v3839_v15 = vsel %vm1305_vm7, %v3823_v36, %v4897_v3  ;;  %v3840_v41 = vsel %vm1305_vm7, %v3824_v49, %v4898_v63 }
 0x79c   :  { %5075 = vrot.lane.b32.xlu0 %v7060_v12, %s5293_s6  ;;  %v4911_v12 = vpop.permute.xlu2 %4910 }
 0x79d   :  { %5055 = vrot.lane.b32.xlu2 %v5054_v31, %s5291_s21  ;;  %v4901_v16 = vpop.permute.xlu1 %4900  ;;  %5060 = vrot.lane.b32.xlu1 %v5059_v9, %s5294_s8  ;;  %v4913_v36 = vunpack.i.h.bf16 %v4911_v12 }
 0x79e   :  { %v4903_v13 = vunpack.i.h.bf16 %v4901_v16  ;;  %v4902_v6 = vunpack.i.l.bf16 %v4901_v16  ;;  %v5094_v16 = vpack.i.bf16 %v3282_v8, %v3234_v27 }
 0x7a0   :  { %v7151_v0 = vsel %vm1322_vm8, %v3840_v41, %v4903_v13  ;;  %v7154_v30 = vsel %vm1322_vm8, %v3839_v15, %v4902_v6  ;;  %v4912_v15 = vunpack.i.l.bf16 %v4911_v12  ;;  %v5084_v13 = vpack.i.bf16 %v3250_v25, %v7016_v4  ;;  %v3298_v4 = vld [vmem:[#allocation2 + $0x92] sm:$0xff] }
 0x7a1   :  { %v5099_v12 = vpack.i.bf16 %v3298_v4, %v3250_v25 }
 0x7a4   :  { %5090 = vrot.lane.b32.xlu0 %v5089_v26, %s5291_s21 }
 0x7a5   :  { %5080 = vrot.lane.b32.xlu2 %v5079_v10, %s5288_s7  ;;  %5065 = vrot.lane.b32.xlu1 %v7062_v23, %s5294_s8 }
 0x7a6   :  { %v4906_v63 = vpop.permute.xlu1 %4905 }
 0x7a7   :  { %v4908_v3 = vunpack.i.h.bf16 %v4906_v63  ;;  %v4907_v49 = vunpack.i.l.bf16 %v4906_v63 }
 0x7a9   :  { %v3826_v41 = vsel %vm532_vm4, %v7034_v52, %v4908_v3  ;;  %v3825_v28 = vsel %vm532_vm4, %v7002_v42, %v4907_v49  ;;  %v5139_v52 = vpack.i.bf16 %v7000_v55, %v6967_v57 }
 0x7aa   :  { %v3841_v31 = vsel %vm1305_vm7, %v3825_v28, %v4912_v15  ;;  %v3842_v9 = vsel %vm1305_vm7, %v3826_v41, %v4913_v36 }
 0x7ac   :  { %5105 = vrot.lane.b32.xlu0 %v5104_v58, %s5288_s7  ;;  %v3171_v58 = vld [vmem:[#allocation2 + $0xa0] sm:$0xff] }
 0x7ad   :  { %5095 = vrot.lane.b32.xlu2 %v5094_v16, %s5294_s8  ;;  %v4916_v23 = vpop.permute.xlu0 %4915  ;;  %5085 = vrot.lane.b32.xlu1 %v5084_v13, %s5290_s30 }
 0x7ae   :  { %v4918_v6 = vunpack.i.h.bf16 %v4916_v23  ;;  %v4917_v2 = vunpack.i.l.bf16 %v4916_v23  ;;  %v4931_v26 = vpop.permute.xlu2 %4930 }
 0x7af   :  { %v4933_v49 = vunpack.i.h.bf16 %v4931_v26  ;;  %v4932_v36 = vunpack.i.l.bf16 %v4931_v26 }
 0x7b0   :  { %v7176_v10 = vsel %vm1322_vm8, %v3841_v31, %v4917_v2  ;;  %v7179_v27 = vsel %vm1322_vm8, %v3842_v9, %v4918_v6 }
 0x7b4   :  { %5120 = vrot.lane.b32.xlu0 %v7027_v17, %s5294_s8 }
 0x7b5   :  { %5110 = vrot.lane.b32.xlu2 %v5109_v5, %s5290_s30  ;;  %5100 = vrot.lane.b32.xlu1 %v5099_v12, %s5293_s6 }
 0x7b6   :  { %v4946_v34 = vpop.permute.xlu2 %4945 }
 0x7b7   :  { %v4948_v32 = vunpack.i.h.bf16 %v4946_v34 }
 0x7b9   :  { %v3830_v6 = vsel %vm532_vm4, %v7069_v43, %v4948_v32 }
 0x7bc   :  { %5135 = vrot.lane.b32.xlu0 %v5134_v45, %s5290_s30 }
 0x7bd   :  { %5125 = vrot.lane.b32.xlu2 %v7023_v35, %s5293_s6  ;;  %5115 = vrot.lane.b32.xlu1 %v5114_v22, %s5291_s21  ;;  %v4921_v17 = vpop.permute.xlu0 %4920 }
 0x7be   :  { %v4923_v46 = vunpack.i.h.bf16 %v4921_v17  ;;  %v4922_v14 = vunpack.i.l.bf16 %v4921_v17  ;;  %v4926_v5 = vpop.permute.xlu1 %4925  ;;  %v4966_v51 = vpop.permute.xlu2 %4965 }
 0x7bf   :  { %v4928_v63 = vunpack.i.h.bf16 %v4926_v5  ;;  %v4927_v3 = vunpack.i.l.bf16 %v4926_v5 }
 0x7c0   :  { %v3828_v42 = vsel %vm532_vm4, %v7048_v60, %v4923_v46  ;;  %v3827_v59 = vsel %vm532_vm4, %v3171_v58, %v4922_v14  ;;  %v4968_v46 = vunpack.i.h.bf16 %v4966_v51  ;;  %v4967_v14 = vunpack.i.l.bf16 %v4966_v51 }
 0x7c1   :  { %v3844_v45 = vsel %vm1305_vm7, %v3828_v42, %v4928_v63  ;;  %v3843_v35 = vsel %vm1305_vm7, %v3827_v59, %v4927_v3 }
 0x7c2   :  { %v3859_v15 = vsel %vm1322_vm8, %v3843_v35, %v4932_v36  ;;  %v3860_v41 = vsel %vm1322_vm8, %v3844_v45, %v4933_v49 }
 0x7c4   :  { %5150 = vrot.lane.b32.xlu0 %v6989_v50, %s5293_s6  ;;  %v5164_v50 = vpack.i.bf16 %v6965_v24, %v6932_v1 }
 0x7c5   :  { %5140 = vrot.lane.b32.xlu2 %v5139_v52, %s5291_s21  ;;  %5130 = vrot.lane.b32.xlu1 %v5129_v62, %s5288_s7  ;;  %v4941_v60 = vpop.permute.xlu0 %4940  ;;  %v4947_v62 = vunpack.i.l.bf16 %v4946_v34 }
 0x7c6   :  { %v4943_v28 = vunpack.i.h.bf16 %v4941_v60  ;;  %v4942_v8 = vunpack.i.l.bf16 %v4941_v60 }
 0x7c7   :  { %v4936_v25 = vpop.permute.xlu1 %4935  ;;  %v7215_v16 = vpop.permute.xlu2 %4975  ;;  %v3829_v2 = vsel %vm532_vm4, %v7050_v33, %v4947_v62 }
 0x7c8   :  { %v4938_v31 = vunpack.i.h.bf16 %v4936_v25  ;;  %v4937_v57 = vunpack.i.l.bf16 %v4936_v25 }
 0x7ca   :  { %v3875_v55 = vsel %vm1339_vm9, %v3859_v15, %v4937_v57  ;;  %v3876_v9 = vsel %vm1339_vm9, %v3860_v41, %v4938_v31 }
 0x7cb   :  { %v7220_v13 = vsel %vm1356_vm10, %v3875_v55, %v4942_v8  ;;  %v7223_v11 = vsel %vm1356_vm10, %v3876_v9, %v4943_v28 }
 0x7cc   :  { %5165 = vrot.lane.b32.xlu0 %v5164_v50, %s5291_s21 }
 0x7cd   :  { %5155 = vrot.lane.b32.xlu2 %v5154_v39, %s5288_s7  ;;  %5145 = vrot.lane.b32.xlu1 %v6993_v44, %s5294_s8  ;;  %v4951_v23 = vpop.permute.xlu0 %4950 }
 0x7ce   :  { %v4953_v1 = vunpack.i.h.bf16 %v4951_v23  ;;  %v4952_v24 = vunpack.i.l.bf16 %v4951_v23 }
 0x7cf   :  { %v4991_v12 = vpop.permute.xlu2 %4990 }
 0x7d0   :  { %v3845_v26 = vsel %vm1305_vm7, %v3829_v2, %v4952_v24  ;;  %v3846_v4 = vsel %vm1305_vm7, %v3830_v6, %v4953_v1  ;;  %v4993_v45 = vunpack.i.h.bf16 %v4991_v12  ;;  %v4992_v35 = vunpack.i.l.bf16 %v4991_v12 }
 0x7d1   :  { %v4977_v12 = vunpack.i.l.bf16 %v7215_v16 }
 0x7d5   :  { %5170 = vrot.lane.b32.xlu2 %v6954_v40, %s5294_s8  ;;  %5160 = vrot.lane.b32.xlu1 %v5159_v54, %s5290_s30  ;;  %v4961_v48 = vpop.permute.xlu0 %4960 }
 0x7d6   :  { %v4963_v58 = vunpack.i.h.bf16 %v4961_v48  ;;  %v4962_v17 = vunpack.i.l.bf16 %v4961_v48 }
 0x7d7   :  { %v4956_v61 = vpop.permute.xlu1 %4955  ;;  %v7248_v34 = vpop.permute.xlu2 %5000 }
 0x7d8   :  { %v4958_v39 = vunpack.i.h.bf16 %v4956_v61  ;;  %v4957_v44 = vunpack.i.l.bf16 %v4956_v61 }
 0x7da   :  { %v3862_v43 = vsel %vm1322_vm8, %v3846_v4, %v4958_v39  ;;  %v3861_v33 = vsel %vm1322_vm8, %v3845_v26, %v4957_v44  ;;  %v4978_v4 = vunpack.i.h.bf16 %v7215_v16 }
 0x7db   :  { %v3878_v21 = vsel %vm1339_vm9, %v3862_v43, %v4963_v58  ;;  %v3877_v38 = vsel %vm1339_vm9, %v3861_v33, %v4962_v17 }
 0x7dc   :  { %v3893_v42 = vsel %vm1356_vm10, %v3877_v38, %v4967_v14  ;;  %v3894_v59 = vsel %vm1356_vm10, %v3878_v21, %v4968_v46 }
 0x7dd   :  { %5175 = vrot.lane.b32.xlu1 %v6958_v56, %s5293_s6 }
 0x7de   :  { %v4986_v22 = vpop.permute.xlu0 %4985 }
 0x7df   :  { %v4971_v40 = vpop.permute.xlu1 %4970  ;;  %v7252_v63 = vpop.permute.xlu2 %5025  ;;  %v4988_v36 = vunpack.i.h.bf16 %v4986_v22  ;;  %v4987_v56 = vunpack.i.l.bf16 %v4986_v22 }
 0x7e0   :  { %v4973_v23 = vunpack.i.h.bf16 %v4971_v40  ;;  %v4972_v1 = vunpack.i.l.bf16 %v4971_v40 }
 0x7e2   :  { %v3832_v48 = vsel %vm532_vm4, %v7085_v37, %v4973_v23  ;;  %v3831_v61 = vsel %vm532_vm4, %v7071_v19, %v4972_v1 }
 0x7e3   :  { %v3847_v46 = vsel %vm1305_vm7, %v3831_v61, %v4977_v12 }
 0x7e6   :  { %v4996_v54 = vpop.permute.xlu0 %4995 }
 0x7e7   :  { %v4981_v5 = vpop.permute.xlu1 %4980  ;;  %v5036_v57 = vpop.permute.xlu2 %5035  ;;  %v4998_v22 = vunpack.i.h.bf16 %v4996_v54  ;;  %v4997_v40 = vunpack.i.l.bf16 %v4996_v54 }
 0x7e8   :  { %v4983_v3 = vunpack.i.h.bf16 %v4981_v5  ;;  %v4982_v49 = vunpack.i.l.bf16 %v4981_v5  ;;  %v5038_v37 = vunpack.i.h.bf16 %v5036_v57  ;;  %v5037_v21 = vunpack.i.l.bf16 %v5036_v57 }
 0x7e9   :  { %v3863_v5 = vsel %vm1322_vm8, %v3847_v46, %v4997_v40 }
 0x7ea   :  { %v3909_v52 = vsel %vm1373_vm11, %v3893_v42, %v4982_v49  ;;  %v3910_v15 = vsel %vm1373_vm11, %v3894_v59, %v4983_v3 }
 0x7eb   :  { %v3925_v41 = vsel %vm1390_vm12, %v3909_v52, %v4987_v56  ;;  %v3926_v51 = vsel %vm1390_vm12, %v3910_v15, %v4988_v36 }
 0x7ec   :  { %v7261_v60 = vsel %vm84_vm2, %v3925_v41, %v4992_v35  ;;  %v7264_v28 = vsel %vm84_vm2, %v3926_v51, %v4993_v45  ;;  %v5003_v45 = vunpack.i.h.bf16 %v7248_v34  ;;  %v5002_v35 = vunpack.i.l.bf16 %v7248_v34 }
 0x7ed   :  { %v3952_v8 = vpack.c.bf16 %v7264_v28, %v7261_v60 }
 0x7ee   :  { %v5011_v25 = vpop.permute.xlu0 %5010  ;;  %v3879_v23 = vsel %vm1339_vm9, %v3863_v5, %v5002_v35 }
 0x7ef   :  { %v5006_v31 = vpop.permute.xlu1 %5005  ;;  %v5051_v50 = vpop.permute.xlu2 %5050  ;;  %v5013_v24 = vunpack.i.h.bf16 %v5011_v25  ;;  %v5012_v6 = vunpack.i.l.bf16 %v5011_v25 }
 0x7f0   :  { %v5008_v36 = vunpack.i.h.bf16 %v5006_v31  ;;  %v5007_v56 = vunpack.i.l.bf16 %v5006_v31  ;;  %v5053_v57 = vunpack.i.h.bf16 %v5051_v50 }
 0x7f1   :  { %v3834_v39 = vsel %vm532_vm4, %v7112_v7, %v5013_v24  ;;  %v3833_v44 = vsel %vm532_vm4, %v7087_v53, %v5012_v6  ;;  %v3848_v7 = vsel %vm1305_vm7, %v3832_v48, %v4978_v4 }
 0x7f2   :  { %v3864_v54 = vsel %vm1322_vm8, %v3848_v7, %v4998_v22  ;;  %v3895_v1 = vsel %vm1356_vm10, %v3879_v23, %v5007_v56 }
 0x7f3   :  { %v3880_v31 = vsel %vm1339_vm9, %v3864_v54, %v5003_v45 }
 0x7f4   :  { %v3896_v34 = vsel %vm1356_vm10, %v3880_v31, %v5008_v36 }
 0x7f6   :  { %v7268_v55 = vpop.permute.xlu0 %5020 }
 0x7f7   :  { %v5016_v9 = vpop.permute.xlu1 %5015  ;;  %v7282_v43 = vpop.permute.xlu2 %5055  ;;  %v5023_v52 = vunpack.i.h.bf16 %v7268_v55  ;;  %v5022_v15 = vunpack.i.l.bf16 %v7268_v55 }
 0x7f8   :  { %v5018_v2 = vunpack.i.h.bf16 %v5016_v9  ;;  %v5017_v26 = vunpack.i.l.bf16 %v5016_v9  ;;  %v5052_v9 = vunpack.i.l.bf16 %v5051_v50 }
 0x7f9   :  { %v3911_v50 = vsel %vm1373_vm11, %v3895_v1, %v5022_v15  ;;  %v3912_v48 = vsel %vm1373_vm11, %v3896_v34, %v5023_v52 }
 0x7fa   :  { %v3850_v58 = vsel %vm1305_vm7, %v3834_v39, %v5018_v2  ;;  %v3849_v16 = vsel %vm1305_vm7, %v3833_v44, %v5017_v26 }
 0x7fb   :  { %v3865_v53 = vsel %vm1322_vm8, %v3849_v16, %v5037_v21  ;;  %v3866_v14 = vsel %vm1322_vm8, %v3850_v58, %v5038_v37  ;;  %v5028_v58 = vunpack.i.h.bf16 %v7252_v63  ;;  %v5027_v16 = vunpack.i.l.bf16 %v7252_v63 }
 0x7fc   :  { %v5058_v37 = vunpack.i.h.bf16 %v7282_v43  ;;  %v5057_v21 = vunpack.i.l.bf16 %v7282_v43 }
 0x7fd   :  { %v3927_v46 = vsel %vm1390_vm12, %v3911_v50, %v5027_v16 }
 0x7fe   :  { %v5046_v32 = vpop.permute.xlu0 %5045  ;;  %v3907_v54 = vsel %vm1373_vm11, %v7220_v13, %v5057_v21  ;;  %v3908_v43 = vsel %vm1373_vm11, %v7223_v11, %v5058_v37 }
 0x7ff   :  { %v7270_v62 = vpop.permute.xlu1 %5030  ;;  %v5048_v42 = vunpack.i.h.bf16 %v5046_v32  ;;  %v5047_v59 = vunpack.i.l.bf16 %v5046_v32  ;;  %v5081_v24 = vpop.permute.xlu2 %5080 }
 0x800   :  { %v5033_v44 = vunpack.i.h.bf16 %v7270_v62  ;;  %v5032_v22 = vunpack.i.l.bf16 %v7270_v62  ;;  %v3928_v62 = vsel %vm1390_vm12, %v3912_v48, %v5028_v58  ;;  %v5083_v15 = vunpack.i.h.bf16 %v5081_v24 }
 0x802   :  { %v3874_v23 = vsel %vm1339_vm9, %v7179_v27, %v5083_v15 }
 0x806   :  { %v5071_v33 = vpop.permute.xlu0 %5070 }
 0x807   :  { %v5041_v17 = vpop.permute.xlu1 %5040  ;;  %v5073_v55 = vunpack.i.h.bf16 %v5071_v33  ;;  %v5072_v26 = vunpack.i.l.bf16 %v5071_v33  ;;  %v5096_v36 = vpop.permute.xlu2 %5095 }
 0x808   :  { %v5043_v38 = vunpack.i.h.bf16 %v5041_v17  ;;  %v5042_v19 = vunpack.i.l.bf16 %v5041_v17 }
 0x80a   :  { %v3881_v3 = vsel %vm1339_vm9, %v3865_v53, %v5042_v19  ;;  %v3882_v49 = vsel %vm1339_vm9, %v3866_v14, %v5043_v38  ;;  %v3943_v53 = vsel %vm84_vm2, %v3927_v46, %v5032_v22  ;;  %v3944_v14 = vsel %vm84_vm2, %v3928_v62, %v5033_v44 }
 0x80b   :  { %v3897_v41 = vsel %vm1356_vm10, %v3881_v3, %v5047_v59  ;;  %v3898_v51 = vsel %vm1356_vm10, %v3882_v49, %v5048_v42  ;;  %v3953_v59 = vpack.c.bf16 %v3944_v14, %v3943_v53 }
 0x80c   :  { %v3913_v4 = vsel %vm1373_vm11, %v3897_v41, %v5052_v9  ;;  %v3914_v12 = vsel %vm1373_vm11, %v3898_v51, %v5053_v57  ;;  %v5082_v41 = vunpack.i.l.bf16 %v5081_v24 }
 0x80d   :  { %v3996_v13 = vsel %vm1455_vm13, %v3953_v59, 0 }
 0x80e   :  { %v5076_v25 = vpop.permute.xlu0 %5075  ;;  %v3873_v9 = vsel %vm1339_vm9, %v7176_v10, %v5082_v41  ;;  %v5098_v10 = vunpack.i.h.bf16 %v5096_v36 }
 0x80f   :  { %v5061_v32 = vpop.permute.xlu1 %5060  ;;  %v5078_v3 = vunpack.i.h.bf16 %v5076_v25  ;;  %v5077_v49 = vunpack.i.l.bf16 %v5076_v25  ;;  %v5111_v1 = vpop.permute.xlu2 %5110 }
 0x810   :  { %v5063_v6 = vunpack.i.h.bf16 %v5061_v32  ;;  %v5062_v2 = vunpack.i.l.bf16 %v5061_v32  ;;  %v5113_v16 = vunpack.i.h.bf16 %v5111_v1 }
 0x812   :  { %v3929_v61 = vsel %vm1390_vm12, %v3913_v4, %v5062_v2  ;;  %v3930_v39 = vsel %vm1390_vm12, %v3914_v12, %v5063_v6 }
 0x813   :  { %v3945_v40 = vsel %vm84_vm2, %v3929_v61, %v5072_v26  ;;  %v3946_v33 = vsel %vm84_vm2, %v3930_v39, %v5073_v55  ;;  %v3993_v55 = vsel %vm1455_vm13, %v3952_v8, 0  ;;  %v5097_v26 = vunpack.i.l.bf16 %v5096_v36 }
 0x814   :  { %v3954_v17 = vpack.c.bf16 %v3946_v33, %v3945_v40 }
 0x816   :  { %v5091_v38 = vpop.permute.xlu0 %5090  ;;  %v3999_v19 = vsel %vm1455_vm13, %v3954_v17, 0  ;;  %v5112_v17 = vunpack.i.l.bf16 %v5111_v1 }
 0x817   :  { %v5066_v7 = vpop.permute.xlu1 %5065  ;;  %4001 = vmatpush.bf16.xpose.msrb.mxu3 %v3999_v19  ;;  %v5093_v34 = vunpack.i.h.bf16 %v5091_v38  ;;  %v5092_v24 = vunpack.i.l.bf16 %v5091_v38  ;;  %v5126_v28 = vpop.permute.xlu2 %5125 }
 0x818   :  { %v5068_v5 = vunpack.i.h.bf16 %v5066_v7  ;;  %v5067_v63 = vunpack.i.l.bf16 %v5066_v7  ;;  %v5128_v53 = vunpack.i.h.bf16 %v5126_v28  ;;  %v5127_v14 = vunpack.i.l.bf16 %v5126_v28 }
 0x81a   :  { %v3923_v56 = vsel %vm1390_vm12, %v3907_v54, %v5067_v63  ;;  %v3924_v42 = vsel %vm1390_vm12, %v3908_v43, %v5068_v5 }
 0x81b   :  { %v3939_v45 = vsel %vm84_vm2, %v3923_v56, %v5077_v49  ;;  %v3940_v35 = vsel %vm84_vm2, %v3924_v42, %v5078_v3 }
 0x81c   :  { %v3951_v52 = vpack.c.bf16 %v3940_v35, %v3939_v45 }
 0x81e   :  { %v5106_v11 = vpop.permute.xlu0 %5105  ;;  %v3990_v58 = vsel %vm1455_vm13, %v3951_v52, 0 }
 0x81f   :  { %v5086_v51 = vpop.permute.xlu1 %5085  ;;  %4002 = vmatpush.bf16.xpose.msrb.mxu3 %v3996_v13  ;;  %v5108_v61 = vunpack.i.h.bf16 %v5106_v11  ;;  %v5107_v39 = vunpack.i.l.bf16 %v5106_v11  ;;  %v5141_v42 = vpop.permute.xlu2 %5140  ;;  %v3957_v13 = vld [vmem:[%s7425_s18] sm:$0xff] }
 0x820   :  { %v5088_v57 = vunpack.i.h.bf16 %v5086_v51  ;;  %v5087_v25 = vunpack.i.l.bf16 %v5086_v51  ;;  %v3958_v51 = vld [vmem:[%s7425_s18 + $0x8] sm:$0xf] }
 0x821   :  { %v3871_v8 = vsel %vm1339_vm9, %v7154_v30, %v5107_v39  ;;  %v3872_v33 = vsel %vm1339_vm9, %v7151_v0, %v5108_v61 }
 0x822   :  { %v3889_v31 = vsel %vm1356_vm10, %v3873_v9, %v5087_v25  ;;  %v3890_v32 = vsel %vm1356_vm10, %v3874_v23, %v5088_v57  ;;  %v3887_v62 = vsel %vm1356_vm10, %v3871_v8, %v5112_v17  ;;  %v3888_v7 = vsel %vm1356_vm10, %v3872_v33, %v5113_v16 }
 0x823   :  { %v3905_v6 = vsel %vm1373_vm11, %v3889_v31, %v5092_v24  ;;  %v3906_v2 = vsel %vm1373_vm11, %v3890_v32, %v5093_v34  ;;  %v5297_v9 = vmov 0   ;;  %v5142_v23 = vunpack.i.l.bf16 %v5141_v42 }
 0x824   :  { %v3921_v50 = vsel %vm1390_vm12, %v3905_v6, %v5097_v26  ;;  %v3922_v48 = vsel %vm1390_vm12, %v3906_v2, %v5098_v10  ;;  %5179 = vset.pattern.permute.xlu0 %v5297_v9  ;;  %5180 = vset.pattern.permute.xlu2 %v5297_v9 }
 0x825   :  { %3961 = vperm.xlu0 %5179, %v3957_v13   ;;  %3966 = vperm.xlu2 %5180, %v3958_v51  }
 0x826   :  { %v5121_v44 = vpop.permute.xlu0 %5120 }
 0x827   :  { %v5101_v4 = vpop.permute.xlu1 %5100  ;;  %4003 = vmatpush.bf16.xpose.msrb.mxu3 %v3993_v55  ;;  %v5123_v19 = vunpack.i.h.bf16 %v5121_v44  ;;  %v5122_v46 = vunpack.i.l.bf16 %v5121_v44  ;;  %v5156_v55 = vpop.permute.xlu2 %5155 }
 0x828   :  { %v5103_v27 = vunpack.i.h.bf16 %v5101_v4  ;;  %v5102_v12 = vunpack.i.l.bf16 %v5101_v4 }
 0x82a   :  { %v3937_v22 = vsel %vm84_vm2, %v3921_v50, %v5102_v12  ;;  %v3938_v40 = vsel %vm84_vm2, %v3922_v48, %v5103_v27  ;;  %v5158_v50 = vunpack.i.h.bf16 %v5156_v55  ;;  %v5157_v48 = vunpack.i.l.bf16 %v5156_v55 }
 0x82b   :  { %v3950_v60 = vpack.c.bf16 %v3938_v40, %v3937_v22 }
 0x82c   :  { %v3868_v28 = vsel %vm1339_vm9, %v7110_v20, %v5158_v50 }
 0x82d   :  { %v3987_v36 = vsel %vm1455_vm13, %v3950_v60, 0  ;;  %v3867_v60 = vsel %vm1339_vm9, %v7107_v18, %v5157_v48 }
 0x82e   :  { %v5136_v54 = vpop.permute.xlu0 %5135 }
 0x82f   :  { %v5116_v37 = vpop.permute.xlu1 %5115  ;;  %4004 = vmatpush.bf16.xpose.msrb.mxu3 %v3990_v58  ;;  %v5138_v15 = vunpack.i.h.bf16 %v5136_v54  ;;  %v5137_v41 = vunpack.i.l.bf16 %v5136_v54  ;;  %v5171_v58 = vpop.permute.xlu2 %5170 }
 0x830   :  { %v5118_v21 = vunpack.i.h.bf16 %v5116_v37  ;;  %v5117_v38 = vunpack.i.l.bf16 %v5116_v37 }
 0x832   :  { %v3903_v30 = vsel %vm1373_vm11, %v3887_v62, %v5117_v38  ;;  %v3904_v0 = vsel %vm1373_vm11, %v3888_v7, %v5118_v21  ;;  %v5173_v38 = vunpack.i.h.bf16 %v5171_v58 }
 0x833   :  { %v3919_v5 = vsel %vm1390_vm12, %v3903_v30, %v5122_v46  ;;  %v3920_v63 = vsel %vm1390_vm12, %v3904_v0, %v5123_v19  ;;  %v5172_v19 = vunpack.i.l.bf16 %v5171_v58 }
 0x834   :  { %v3935_v43 = vsel %vm84_vm2, %v3919_v5, %v5127_v14  ;;  %v3936_v3 = vsel %vm84_vm2, %v3920_v63, %v5128_v53  ;;  %v4237_v5 = vld [vmem:[%s7426_s17] sm:$0xf]  ;;  %v4280_v63 = vld [vmem:[%s7426_s17] sm:$0x30] }
 0x835   :  { %v3949_v49 = vpack.c.bf16 %v3936_v3, %v3935_v43  ;;  %v4238_v54 = vor.u32 %v4280_v63, %v4237_v5 }
 0x836   :  { %v5151_v11 = vpop.permute.xlu0 %5150 }
 0x837   :  { %v5131_v56 = vpop.permute.xlu1 %5130  ;;  %4005 = vmatpush.bf16.xpose.msrb.mxu3 %v3987_v36  ;;  %v5153_v34 = vunpack.i.h.bf16 %v5151_v11  ;;  %v5152_v24 = vunpack.i.l.bf16 %v5151_v11 }
 0x838   :  { %v5133_v59 = vunpack.i.h.bf16 %v5131_v56  ;;  %v5132_v45 = vunpack.i.l.bf16 %v5131_v56 }
 0x83a   :  { %v3869_v35 = vsel %vm1339_vm9, %v7126_v47, %v5132_v45  ;;  %v3870_v52 = vsel %vm1339_vm9, %v7129_v29, %v5133_v59  ;;  %v3984_v47 = vsel %vm1455_vm13, %v3949_v49, 0  ;;  %v5143_v29 = vunpack.i.h.bf16 %v5141_v42 }
 0x83b   :  { %v3885_v57 = vsel %vm1356_vm10, %v3869_v35, %v5137_v41  ;;  %v3886_v25 = vsel %vm1356_vm10, %v3870_v52, %v5138_v15 }
 0x83c   :  { %v3901_v6 = vsel %vm1373_vm11, %v3885_v57, %v5142_v23  ;;  %v3902_v2 = vsel %vm1373_vm11, %v3886_v25, %v5143_v29 }
 0x83e   :  { %v5166_v40 = vpop.permute.xlu0 %5165 }
 0x83f   :  { %v5146_v31 = vpop.permute.xlu1 %5145  ;;  %4006 = vmatpush.bf16.xpose.msrb.mxu3 %v3984_v47  ;;  %v5168_v16 = vunpack.i.h.bf16 %v5166_v40  ;;  %v5167_v17 = vunpack.i.l.bf16 %v5166_v40 }
 0x840   :  { %v5148_v32 = vunpack.i.h.bf16 %v5146_v31  ;;  %v5147_v1 = vunpack.i.l.bf16 %v5146_v31 }
 0x842   :  { %v3917_v10 = vsel %vm1390_vm12, %v3901_v6, %v5147_v1  ;;  %v3918_v26 = vsel %vm1390_vm12, %v3902_v2, %v5148_v32 }
 0x843   :  { %v3933_v4 = vsel %vm84_vm2, %v3917_v10, %v5152_v24  ;;  %v3934_v27 = vsel %vm84_vm2, %v3918_v26, %v5153_v34 }
 0x844   :  { %v3948_v12 = vpack.c.bf16 %v3934_v27, %v3933_v4 }
 0x846   :  { %v3981_v61 = vsel %vm1455_vm13, %v3948_v12, 0 }
 0x847   :  { %v5161_v39 = vpop.permute.xlu1 %5160  ;;  %4007 = vmatpush.bf16.xpose.msrb.mxu3 %v3981_v61 }
 0x848   :  { %v5163_v44 = vunpack.i.h.bf16 %v5161_v39  ;;  %v5162_v22 = vunpack.i.l.bf16 %v5161_v39 }
 0x84a   :  { %v3883_v8 = vsel %vm1356_vm10, %v3867_v60, %v5162_v22  ;;  %v3884_v33 = vsel %vm1356_vm10, %v3868_v28, %v5163_v44 }
 0x84b   :  { %v3899_v37 = vsel %vm1373_vm11, %v3883_v8, %v5167_v17  ;;  %v3900_v21 = vsel %vm1373_vm11, %v3884_v33, %v5168_v16 }
 0x84c   :  { %v3915_v18 = vsel %vm1390_vm12, %v3899_v37, %v5172_v19  ;;  %v3916_v20 = vsel %vm1390_vm12, %v3900_v21, %v5173_v38 }
 0x84f   :  { %v5176_v46 = vpop.permute.xlu1 %5175 }
 0x850   :  { %v5178_v62 = vunpack.i.h.bf16 %v5176_v46  ;;  %v5177_v7 = vunpack.i.l.bf16 %v5176_v46 }
 0x852   :  { %v3931_v53 = vsel %vm84_vm2, %v3915_v18, %v5177_v7  ;;  %v3932_v14 = vsel %vm84_vm2, %v3916_v20, %v5178_v62 }
 0x853   :  { %v3947_v30 = vpack.c.bf16 %v3932_v14, %v3931_v53 }
 0x855   :  { %v3978_v0 = vsel %vm1455_vm13, %v3947_v30, 0 }
 0x856   :  { %4008 = vmatpush.bf16.xpose.msrb.mxu3 %v3978_v0 }
 0x85d   :  { %4239 = vmatmul.msk.bf16.vlgmr.msrb.gmra.mxu3 %vm1455_vm13, %v4238_v54 }
 0x87f   :  { %v3967_v56 = vpop.permute.xlu2 %3966 }
 0x897   :  { %v3962_v43 = vpop.permute.xlu0 %3961 }
 0x8e0   :  { %v4010_v3 = vpop.f32.mrf.mxu3 }
 0x8e1   :  { %v4011_v49 = vadd.f32 %v4010_v3, %v3962_v43 }
 0x8e3   :  { %v4240_v36 = vclamps-f32 %v4011_v49, 1.0 }
 0x8e5   :  { %4019 = vst [vmem:[%s7427_s19] sm:$0xff] %v4240_v36 }
 0x8e8   :  { %v4012_v42 = vpop.f32.mrf.mxu3 }
 0x8e9   :  { %v4013_v59 = vadd.f32 %v4012_v42, %v3967_v56 }
 0x8eb   :  { %v4241_v45 = vclamps-f32 %v4013_v59, 1.0 }
 0x8ed   :  { %4020 = vst [vmem:[%s7427_s19 + $0x8] sm:$0xf] %v4241_v45 }

</bundles_post_ra>
